<compile_context>
chip_gen: v5e
topology: v5e:2x2
jax: 0.10.0
libtpu: 0.0.40
codegen_flags: <defaults>
</compile_context>

<pallas_src>
import functools

import jax
import jax.numpy as jnp
from jax.experimental import pallas as pl
from jax.experimental.pallas import tpu as pltpu


def _extract_patches_kernel(x_ref, o_ref, t_ref, *, C, P, Wp, rows_per_block):
    """Unfold `rows_per_block` patch-rows of one image into lane-dense patches.

    x_ref : (1, C, rows_per_block * P, W)   input row band (W = Wp * P)
    o_ref : (1, rows_per_block * Wp, N)     N = C * P * P, flat patch = (c, kh, kw)
    t_ref : (C, Wp, P, P)                   VMEM scratch, indexed [c, pw, kh, kw]

    The permutation needs kh (input sublane) to become a lane offset and pw
    (input lane block) to become an output sublane.  We do that crossing by
    round-tripping through the scratch: it is *written* with pw as a leading
    index and *read back* with (c, kh) as leading/sublane indices.  Every op
    is a plain static ref load/store (no vreg transposes / reshapes).
    """
    for ph in range(rows_per_block):
        # Stage the Wp (C, P, P) patch blocks of this patch-row.
        for pw in range(Wp):
            t_ref[:, pw, :, :] = x_ref[0, :, ph * P:(ph + 1) * P,
                                       pw * P:(pw + 1) * P]
        # Emit the Wp lane-dense output rows of this patch-row.  Output row
        # ph*Wp + pw, lane block [(c*P + kh)*P, +P) <- t[c, pw, kh, :], which
        # reproduces nn.Unfold's (channel, kernel_row, kernel_col) ordering.
        row0 = ph * Wp
        for c in range(C):
            for kh in range(P):
                lane0 = (c * P + kh) * P
                o_ref[0, row0:row0 + Wp, lane0:lane0 + P] = t_ref[c, :, kh, :]


def _pick_rows_per_block(Hp, Wp, C, P, W, itemsize,
                         vmem_budget_bytes=8 * 1024 * 1024):
    """Largest number of patch-rows per grid step whose double-buffered
    input+output blocks fit the budget, subject to the BlockSpec rule that the
    output block's second-minor dim is a multiple of 8 or the full dim."""
    N = C * P * P

    def block_bytes(hb):
        return 2 * (C * hb * P * W + hb * Wp * N) * itemsize  # 2x: dbl buffer

    candidates = [d for d in range(1, Hp + 1)
                  if Hp % d == 0 and (d == Hp or (d * Wp) % 8 == 0)]
    fitting = [d for d in candidates if block_bytes(d) <= vmem_budget_bytes]
    return max(fitting) if fitting else min(candidates)


def extract_patches(x: jax.Array, patch_size: int = 16) -> jax.Array:
    """Pallas equivalent of ExtractPatches.forward: (B,C,H,W) -> (B, L, C*P*P)."""
    B, C, H, W = x.shape
    P = patch_size
    assert H % P == 0 and W % P == 0, "H and W must be multiples of patch_size"
    Hp, Wp = H // P, W // P
    L, N = Hp * Wp, C * P * P
    itemsize = jnp.dtype(x.dtype).itemsize

    # Whole image per step when it fits VMEM, otherwise a row band.
    hb = _pick_rows_per_block(Hp, Wp, C, P, W, itemsize)
    G = Hp // hb  # number of row-band steps per image

    kernel = functools.partial(_extract_patches_kernel,
                               C=C, P=P, Wp=Wp, rows_per_block=hb)

    return pl.pallas_call(
        kernel,
        out_shape=jax.ShapeDtypeStruct((B, L, N), x.dtype),
        grid=(B, G),
        in_specs=[pl.BlockSpec((1, C, hb * P, W), lambda b, g: (b, 0, g, 0))],
        out_specs=pl.BlockSpec((1, hb * Wp, N), lambda b, g: (b, g, 0)),
        scratch_shapes=[pltpu.VMEM((C, Wp, P, P), x.dtype)],
        compiler_params=pltpu.CompilerParams(
            dimension_semantics=("parallel", "parallel")),
        cost_estimate=pl.CostEstimate(
            flops=0, transcendentals=0,
            bytes_accessed=2 * B * C * H * W * itemsize),
    )(x)


def _reference(x: jax.Array, patch_size: int) -> jax.Array:
    """Pure-JAX reference reproducing torch nn.Unfold semantics."""
    B, C, H, W = x.shape
    Hp, Wp = H // patch_size, W // patch_size
    y = x.reshape(B, C, Hp, patch_size, Wp, patch_size)
    y = jnp.transpose(y, (0, 2, 4, 1, 3, 5))        # (B, Hp, Wp, C, P, P)
    return y.reshape(B, Hp * Wp, C * patch_size * patch_size)


if __name__ == "__main__":
    key = jax.random.PRNGKey(0)
    B, C, H, W = 2, 4, 32, 32
    patch_size = 16  # matches the module default; no learnable parameters

    x = jax.random.normal(key, (B, C, H, W), dtype=jnp.float32)

    out = extract_patches(x, patch_size=patch_size)
    out = jax.block_until_ready(out)

    ref = _reference(x, patch_size)
    expected_shape = (B, (H // patch_size) * (W // patch_size),
                      C * patch_size * patch_size)
    assert out.shape == expected_shape, (out.shape, expected_shape)
    assert out.dtype == x.dtype
    assert jnp.allclose(out, ref), "kernel output mismatch vs reference"

    print("KERNEL_OK")
</pallas_src>

<mosaic_0001>
module attributes {stable_mosaic.version = 11 : i64} {
  func.func @_extract_patches_kernel(%arg0: i32, %arg1: i32, %arg2: memref<1x4x32x32xf32, #tpu.memory_space<vmem>>, %arg3: memref<1x4x1024xf32, #tpu.memory_space<vmem>>, %arg4: memref<4x2x16x16xf32, #tpu.memory_space<vmem>>) attributes {dimension_semantics = [#tpu.dimension_semantics<parallel>, #tpu.dimension_semantics<parallel>], iteration_bounds = array<i64: 2, 1>, scalar_prefetch = 0 : i64, scratch_operands = 1 : i64, tpu.core_type = #tpu.core_type<tc>, window_params = [{transform_indices = @transform_0, window_bounds = array<i64: 1, 4, 32, 32>}, {transform_indices = @transform_1, window_bounds = array<i64: 1, 4, 1024>}]} {
    %c0 = arith.constant 0 : index
    %c0_0 = arith.constant 0 : index
    %c0_1 = arith.constant 0 : index
    %c0_2 = arith.constant 0 : index
    %0 = vector.load %arg2[%c0, %c0_0, %c0_1, %c0_2] : memref<1x4x32x32xf32, #tpu.memory_space<vmem>>, vector<1x4x16x16xf32>
    %1 = vector.shape_cast %0 : vector<1x4x16x16xf32> to vector<4x16x16xf32>
    %c0_3 = arith.constant 0 : index
    %c0_4 = arith.constant 0 : index
    %c0_5 = arith.constant 0 : index
    %c0_6 = arith.constant 0 : index
    %2 = vector.load %arg4[%c0_3, %c0_4, %c0_5, %c0_6] : memref<4x2x16x16xf32, #tpu.memory_space<vmem>>, vector<4x1x16x16xf32>
    %3 = vector.shape_cast %2 : vector<4x1x16x16xf32> to vector<4x16x16xf32>
    %4 = vector.shape_cast %1 : vector<4x16x16xf32> to vector<4x1x16x16xf32>
    tpu.vector_store %arg4[%c0_3, %c0_4, %c0_5, %c0_6], %4 {strides = array<i32>} : memref<4x2x16x16xf32, #tpu.memory_space<vmem>>, vector<4x1x16x16xf32>,
    %c0_7 = arith.constant 0 : index
    %c0_8 = arith.constant 0 : index
    %c0_9 = arith.constant 0 : index
    %c16 = arith.constant 16 : index
    %5 = vector.load %arg2[%c0_7, %c0_8, %c0_9, %c16] : memref<1x4x32x32xf32, #tpu.memory_space<vmem>>, vector<1x4x16x16xf32>
    %6 = vector.shape_cast %5 : vector<1x4x16x16xf32> to vector<4x16x16xf32>
    %c0_10 = arith.constant 0 : index
    %c1 = arith.constant 1 : index
    %c0_11 = arith.constant 0 : index
    %c0_12 = arith.constant 0 : index
    %7 = vector.load %arg4[%c0_10, %c1, %c0_11, %c0_12] : memref<4x2x16x16xf32, #tpu.memory_space<vmem>>, vector<4x1x16x16xf32>
    %8 = vector.shape_cast %7 : vector<4x1x16x16xf32> to vector<4x16x16xf32>
    %9 = vector.shape_cast %6 : vector<4x16x16xf32> to vector<4x1x16x16xf32>
    tpu.vector_store %arg4[%c0_10, %c1, %c0_11, %c0_12], %9 {strides = array<i32>} : memref<4x2x16x16xf32, #tpu.memory_space<vmem>>, vector<4x1x16x16xf32>,
    %c0_13 = arith.constant 0 : index
    %c0_14 = arith.constant 0 : index
    %c0_15 = arith.constant 0 : index
    %c0_16 = arith.constant 0 : index
    %10 = vector.load %arg4[%c0_13, %c0_14, %c0_15, %c0_16] : memref<4x2x16x16xf32, #tpu.memory_space<vmem>>, vector<1x2x1x16xf32>
    %11 = vector.shape_cast %10 : vector<1x2x1x16xf32> to vector<2x16xf32>
    %c0_17 = arith.constant 0 : index
    %c0_18 = arith.constant 0 : index
    %c0_19 = arith.constant 0 : index
    %12 = vector.load %arg3[%c0_17, %c0_18, %c0_19] : memref<1x4x1024xf32, #tpu.memory_space<vmem>>, vector<1x2x16xf32>
    %13 = vector.shape_cast %12 : vector<1x2x16xf32> to vector<2x16xf32>
    %14 = vector.shape_cast %11 : vector<2x16xf32> to vector<1x2x16xf32>
    tpu.vector_store %arg3[%c0_17, %c0_18, %c0_19], %14 {strides = array<i32>} : memref<1x4x1024xf32, #tpu.memory_space<vmem>>, vector<1x2x16xf32>,
    %c0_20 = arith.constant 0 : index
    %c0_21 = arith.constant 0 : index
    %c1_22 = arith.constant 1 : index
    %c0_23 = arith.constant 0 : index
    %15 = vector.load %arg4[%c0_20, %c0_21, %c1_22, %c0_23] : memref<4x2x16x16xf32, #tpu.memory_space<vmem>>, vector<1x2x1x16xf32>
    %16 = vector.shape_cast %15 : vector<1x2x1x16xf32> to vector<2x16xf32>
    %c0_24 = arith.constant 0 : index
    %c0_25 = arith.constant 0 : index
    %c16_26 = arith.constant 16 : index
    %17 = vector.load %arg3[%c0_24, %c0_25, %c16_26] : memref<1x4x1024xf32, #tpu.memory_space<vmem>>, vector<1x2x16xf32>
    %18 = vector.shape_cast %17 : vector<1x2x16xf32> to vector<2x16xf32>
    %19 = vector.shape_cast %16 : vector<2x16xf32> to vector<1x2x16xf32>
    tpu.vector_store %arg3[%c0_24, %c0_25, %c16_26], %19 {strides = array<i32>} : memref<1x4x1024xf32, #tpu.memory_space<vmem>>, vector<1x2x16xf32>,
    %c0_27 = arith.constant 0 : index
    %c0_28 = arith.constant 0 : index
    %c2 = arith.constant 2 : index
    %c0_29 = arith.constant 0 : index
    %20 = vector.load %arg4[%c0_27, %c0_28, %c2, %c0_29] : memref<4x2x16x16xf32, #tpu.memory_space<vmem>>, vector<1x2x1x16xf32>
    %21 = vector.shape_cast %20 : vector<1x2x1x16xf32> to vector<2x16xf32>
    %c0_30 = arith.constant 0 : index
    %c0_31 = arith.constant 0 : index
    %c32 = arith.constant 32 : index
    %22 = vector.load %arg3[%c0_30, %c0_31, %c32] : memref<1x4x1024xf32, #tpu.memory_space<vmem>>, vector<1x2x16xf32>
    %23 = vector.shape_cast %22 : vector<1x2x16xf32> to vector<2x16xf32>
    %24 = vector.shape_cast %21 : vector<2x16xf32> to vector<1x2x16xf32>
    tpu.vector_store %arg3[%c0_30, %c0_31, %c32], %24 {strides = array<i32>} : memref<1x4x1024xf32, #tpu.memory_space<vmem>>, vector<1x2x16xf32>,
    %c0_32 = arith.constant 0 : index
    %c0_33 = arith.constant 0 : index
    %c3 = arith.constant 3 : index
    %c0_34 = arith.constant 0 : index
    %25 = vector.load %arg4[%c0_32, %c0_33, %c3, %c0_34] : memref<4x2x16x16xf32, #tpu.memory_space<vmem>>, vector<1x2x1x16xf32>
    %26 = vector.shape_cast %25 : vector<1x2x1x16xf32> to vector<2x16xf32>
    %c0_35 = arith.constant 0 : index
    %c0_36 = arith.constant 0 : index
    %c48 = arith.constant 48 : index
    %27 = vector.load %arg3[%c0_35, %c0_36, %c48] : memref<1x4x1024xf32, #tpu.memory_space<vmem>>, vector<1x2x16xf32>
    %28 = vector.shape_cast %27 : vector<1x2x16xf32> to vector<2x16xf32>
    %29 = vector.shape_cast %26 : vector<2x16xf32> to vector<1x2x16xf32>
    tpu.vector_store %arg3[%c0_35, %c0_36, %c48], %29 {strides = array<i32>} : memref<1x4x1024xf32, #tpu.memory_space<vmem>>, vector<1x2x16xf32>,
    %c0_37 = arith.constant 0 : index
    %c0_38 = arith.constant 0 : index
    %c4 = arith.constant 4 : index
    %c0_39 = arith.constant 0 : index
    %30 = vector.load %arg4[%c0_37, %c0_38, %c4, %c0_39] : memref<4x2x16x16xf32, #tpu.memory_space<vmem>>, vector<1x2x1x16xf32>
    %31 = vector.shape_cast %30 : vector<1x2x1x16xf32> to vector<2x16xf32>
    %c0_40 = arith.constant 0 : index
    %c0_41 = arith.constant 0 : index
    %c64 = arith.constant 64 : index
    %32 = vector.load %arg3[%c0_40, %c0_41, %c64] : memref<1x4x1024xf32, #tpu.memory_space<vmem>>, vector<1x2x16xf32>
    %33 = vector.shape_cast %32 : vector<1x2x16xf32> to vector<2x16xf32>
    %34 = vector.shape_cast %31 : vector<2x16xf32> to vector<1x2x16xf32>
    tpu.vector_store %arg3[%c0_40, %c0_41, %c64], %34 {strides = array<i32>} : memref<1x4x1024xf32, #tpu.memory_space<vmem>>, vector<1x2x16xf32>,
    %c0_42 = arith.constant 0 : index
    %c0_43 = arith.constant 0 : index
    %c5 = arith.constant 5 : index
    %c0_44 = arith.constant 0 : index
    %35 = vector.load %arg4[%c0_42, %c0_43, %c5, %c0_44] : memref<4x2x16x16xf32, #tpu.memory_space<vmem>>, vector<1x2x1x16xf32>
    %36 = vector.shape_cast %35 : vector<1x2x1x16xf32> to vector<2x16xf32>
    %c0_45 = arith.constant 0 : index
    %c0_46 = arith.constant 0 : index
    %c80 = arith.constant 80 : index
    %37 = vector.load %arg3[%c0_45, %c0_46, %c80] : memref<1x4x1024xf32, #tpu.memory_space<vmem>>, vector<1x2x16xf32>
    %38 = vector.shape_cast %37 : vector<1x2x16xf32> to vector<2x16xf32>
    %39 = vector.shape_cast %36 : vector<2x16xf32> to vector<1x2x16xf32>
    tpu.vector_store %arg3[%c0_45, %c0_46, %c80], %39 {strides = array<i32>} : memref<1x4x1024xf32, #tpu.memory_space<vmem>>, vector<1x2x16xf32>,
    %c0_47 = arith.constant 0 : index
    %c0_48 = arith.constant 0 : index
    %c6 = arith.constant 6 : index
    %c0_49 = arith.constant 0 : index
    %40 = vector.load %arg4[%c0_47, %c0_48, %c6, %c0_49] : memref<4x2x16x16xf32, #tpu.memory_space<vmem>>, vector<1x2x1x16xf32>
    %41 = vector.shape_cast %40 : vector<1x2x1x16xf32> to vector<2x16xf32>
    %c0_50 = arith.constant 0 : index
    %c0_51 = arith.constant 0 : index
    %c96 = arith.constant 96 : index
    %42 = vector.load %arg3[%c0_50, %c0_51, %c96] : memref<1x4x1024xf32, #tpu.memory_space<vmem>>, vector<1x2x16xf32>
    %43 = vector.shape_cast %42 : vector<1x2x16xf32> to vector<2x16xf32>
    %44 = vector.shape_cast %41 : vector<2x16xf32> to vector<1x2x16xf32>
    tpu.vector_store %arg3[%c0_50, %c0_51, %c96], %44 {strides = array<i32>} : memref<1x4x1024xf32, #tpu.memory_space<vmem>>, vector<1x2x16xf32>,
    %c0_52 = arith.constant 0 : index
    %c0_53 = arith.constant 0 : index
    %c7 = arith.constant 7 : index
    %c0_54 = arith.constant 0 : index
    %45 = vector.load %arg4[%c0_52, %c0_53, %c7, %c0_54] : memref<4x2x16x16xf32, #tpu.memory_space<vmem>>, vector<1x2x1x16xf32>
    %46 = vector.shape_cast %45 : vector<1x2x1x16xf32> to vector<2x16xf32>
    %c0_55 = arith.constant 0 : index
    %c0_56 = arith.constant 0 : index
    %c112 = arith.constant 112 : index
    %47 = vector.load %arg3[%c0_55, %c0_56, %c112] : memref<1x4x1024xf32, #tpu.memory_space<vmem>>, vector<1x2x16xf32>
    %48 = vector.shape_cast %47 : vector<1x2x16xf32> to vector<2x16xf32>
    %49 = vector.shape_cast %46 : vector<2x16xf32> to vector<1x2x16xf32>
    tpu.vector_store %arg3[%c0_55, %c0_56, %c112], %49 {strides = array<i32>} : memref<1x4x1024xf32, #tpu.memory_space<vmem>>, vector<1x2x16xf32>,
    %c0_57 = arith.constant 0 : index
    %c0_58 = arith.constant 0 : index
    %c8 = arith.constant 8 : index
    %c0_59 = arith.constant 0 : index
    %50 = vector.load %arg4[%c0_57, %c0_58, %c8, %c0_59] : memref<4x2x16x16xf32, #tpu.memory_space<vmem>>, vector<1x2x1x16xf32>
    %51 = vector.shape_cast %50 : vector<1x2x1x16xf32> to vector<2x16xf32>
    %c0_60 = arith.constant 0 : index
    %c0_61 = arith.constant 0 : index
    %c128 = arith.constant 128 : index
    %52 = vector.load %arg3[%c0_60, %c0_61, %c128] : memref<1x4x1024xf32, #tpu.memory_space<vmem>>, vector<1x2x16xf32>
    %53 = vector.shape_cast %52 : vector<1x2x16xf32> to vector<2x16xf32>
    %54 = vector.shape_cast %51 : vector<2x16xf32> to vector<1x2x16xf32>
    tpu.vector_store %arg3[%c0_60, %c0_61, %c128], %54 {strides = array<i32>} : memref<1x4x1024xf32, #tpu.memory_space<vmem>>, vector<1x2x16xf32>,
    %c0_62 = arith.constant 0 : index
    %c0_63 = arith.constant 0 : index
    %c9 = arith.constant 9 : index
    %c0_64 = arith.constant 0 : index
    %55 = vector.load %arg4[%c0_62, %c0_63, %c9, %c0_64] : memref<4x2x16x16xf32, #tpu.memory_space<vmem>>, vector<1x2x1x16xf32>
    %56 = vector.shape_cast %55 : vector<1x2x1x16xf32> to vector<2x16xf32>
    %c0_65 = arith.constant 0 : index
    %c0_66 = arith.constant 0 : index
    %c144 = arith.constant 144 : index
    %57 = vector.load %arg3[%c0_65, %c0_66, %c144] : memref<1x4x1024xf32, #tpu.memory_space<vmem>>, vector<1x2x16xf32>
    %58 = vector.shape_cast %57 : vector<1x2x16xf32> to vector<2x16xf32>
    %59 = vector.shape_cast %56 : vector<2x16xf32> to vector<1x2x16xf32>
    tpu.vector_store %arg3[%c0_65, %c0_66, %c144], %59 {strides = array<i32>} : memref<1x4x1024xf32, #tpu.memory_space<vmem>>, vector<1x2x16xf32>,
    %c0_67 = arith.constant 0 : index
    %c0_68 = arith.constant 0 : index
    %c10 = arith.constant 10 : index
    %c0_69 = arith.constant 0 : index
    %60 = vector.load %arg4[%c0_67, %c0_68, %c10, %c0_69] : memref<4x2x16x16xf32, #tpu.memory_space<vmem>>, vector<1x2x1x16xf32>
    %61 = vector.shape_cast %60 : vector<1x2x1x16xf32> to vector<2x16xf32>
    %c0_70 = arith.constant 0 : index
    %c0_71 = arith.constant 0 : index
    %c160 = arith.constant 160 : index
    %62 = vector.load %arg3[%c0_70, %c0_71, %c160] : memref<1x4x1024xf32, #tpu.memory_space<vmem>>, vector<1x2x16xf32>
    %63 = vector.shape_cast %62 : vector<1x2x16xf32> to vector<2x16xf32>
    %64 = vector.shape_cast %61 : vector<2x16xf32> to vector<1x2x16xf32>
    tpu.vector_store %arg3[%c0_70, %c0_71, %c160], %64 {strides = array<i32>} : memref<1x4x1024xf32, #tpu.memory_space<vmem>>, vector<1x2x16xf32>,
    %c0_72 = arith.constant 0 : index
    %c0_73 = arith.constant 0 : index
    %c11 = arith.constant 11 : index
    %c0_74 = arith.constant 0 : index
    %65 = vector.load %arg4[%c0_72, %c0_73, %c11, %c0_74] : memref<4x2x16x16xf32, #tpu.memory_space<vmem>>, vector<1x2x1x16xf32>
    %66 = vector.shape_cast %65 : vector<1x2x1x16xf32> to vector<2x16xf32>
    %c0_75 = arith.constant 0 : index
    %c0_76 = arith.constant 0 : index
    %c176 = arith.constant 176 : index
    %67 = vector.load %arg3[%c0_75, %c0_76, %c176] : memref<1x4x1024xf32, #tpu.memory_space<vmem>>, vector<1x2x16xf32>
    %68 = vector.shape_cast %67 : vector<1x2x16xf32> to vector<2x16xf32>
    %69 = vector.shape_cast %66 : vector<2x16xf32> to vector<1x2x16xf32>
    tpu.vector_store %arg3[%c0_75, %c0_76, %c176], %69 {strides = array<i32>} : memref<1x4x1024xf32, #tpu.memory_space<vmem>>, vector<1x2x16xf32>,
    %c0_77 = arith.constant 0 : index
    %c0_78 = arith.constant 0 : index
    %c12 = arith.constant 12 : index
    %c0_79 = arith.constant 0 : index
    %70 = vector.load %arg4[%c0_77, %c0_78, %c12, %c0_79] : memref<4x2x16x16xf32, #tpu.memory_space<vmem>>, vector<1x2x1x16xf32>
    %71 = vector.shape_cast %70 : vector<1x2x1x16xf32> to vector<2x16xf32>
    %c0_80 = arith.constant 0 : index
    %c0_81 = arith.constant 0 : index
    %c192 = arith.constant 192 : index
    %72 = vector.load %arg3[%c0_80, %c0_81, %c192] : memref<1x4x1024xf32, #tpu.memory_space<vmem>>, vector<1x2x16xf32>
    %73 = vector.shape_cast %72 : vector<1x2x16xf32> to vector<2x16xf32>
    %74 = vector.shape_cast %71 : vector<2x16xf32> to vector<1x2x16xf32>
    tpu.vector_store %arg3[%c0_80, %c0_81, %c192], %74 {strides = array<i32>} : memref<1x4x1024xf32, #tpu.memory_space<vmem>>, vector<1x2x16xf32>,
    %c0_82 = arith.constant 0 : index
    %c0_83 = arith.constant 0 : index
    %c13 = arith.constant 13 : index
    %c0_84 = arith.constant 0 : index
    %75 = vector.load %arg4[%c0_82, %c0_83, %c13, %c0_84] : memref<4x2x16x16xf32, #tpu.memory_space<vmem>>, vector<1x2x1x16xf32>
    %76 = vector.shape_cast %75 : vector<1x2x1x16xf32> to vector<2x16xf32>
    %c0_85 = arith.constant 0 : index
    %c0_86 = arith.constant 0 : index
    %c208 = arith.constant 208 : index
    %77 = vector.load %arg3[%c0_85, %c0_86, %c208] : memref<1x4x1024xf32, #tpu.memory_space<vmem>>, vector<1x2x16xf32>
    %78 = vector.shape_cast %77 : vector<1x2x16xf32> to vector<2x16xf32>
    %79 = vector.shape_cast %76 : vector<2x16xf32> to vector<1x2x16xf32>
    tpu.vector_store %arg3[%c0_85, %c0_86, %c208], %79 {strides = array<i32>} : memref<1x4x1024xf32, #tpu.memory_space<vmem>>, vector<1x2x16xf32>,
    %c0_87 = arith.constant 0 : index
    %c0_88 = arith.constant 0 : index
    %c14 = arith.constant 14 : index
    %c0_89 = arith.constant 0 : index
    %80 = vector.load %arg4[%c0_87, %c0_88, %c14, %c0_89] : memref<4x2x16x16xf32, #tpu.memory_space<vmem>>, vector<1x2x1x16xf32>
    %81 = vector.shape_cast %80 : vector<1x2x1x16xf32> to vector<2x16xf32>
    %c0_90 = arith.constant 0 : index
    %c0_91 = arith.constant 0 : index
    %c224 = arith.constant 224 : index
    %82 = vector.load %arg3[%c0_90, %c0_91, %c224] : memref<1x4x1024xf32, #tpu.memory_space<vmem>>, vector<1x2x16xf32>
    %83 = vector.shape_cast %82 : vector<1x2x16xf32> to vector<2x16xf32>
    %84 = vector.shape_cast %81 : vector<2x16xf32> to vector<1x2x16xf32>
    tpu.vector_store %arg3[%c0_90, %c0_91, %c224], %84 {strides = array<i32>} : memref<1x4x1024xf32, #tpu.memory_space<vmem>>, vector<1x2x16xf32>,
    %c0_92 = arith.constant 0 : index
    %c0_93 = arith.constant 0 : index
    %c15 = arith.constant 15 : index
    %c0_94 = arith.constant 0 : index
    %85 = vector.load %arg4[%c0_92, %c0_93, %c15, %c0_94] : memref<4x2x16x16xf32, #tpu.memory_space<vmem>>, vector<1x2x1x16xf32>
    %86 = vector.shape_cast %85 : vector<1x2x1x16xf32> to vector<2x16xf32>
    %c0_95 = arith.constant 0 : index
    %c0_96 = arith.constant 0 : index
    %c240 = arith.constant 240 : index
    %87 = vector.load %arg3[%c0_95, %c0_96, %c240] : memref<1x4x1024xf32, #tpu.memory_space<vmem>>, vector<1x2x16xf32>
    %88 = vector.shape_cast %87 : vector<1x2x16xf32> to vector<2x16xf32>
    %89 = vector.shape_cast %86 : vector<2x16xf32> to vector<1x2x16xf32>
    tpu.vector_store %arg3[%c0_95, %c0_96, %c240], %89 {strides = array<i32>} : memref<1x4x1024xf32, #tpu.memory_space<vmem>>, vector<1x2x16xf32>,
    %c1_97 = arith.constant 1 : index
    %c0_98 = arith.constant 0 : index
    %c0_99 = arith.constant 0 : index
    %c0_100 = arith.constant 0 : index
    %90 = vector.load %arg4[%c1_97, %c0_98, %c0_99, %c0_100] : memref<4x2x16x16xf32, #tpu.memory_space<vmem>>, vector<1x2x1x16xf32>
    %91 = vector.shape_cast %90 : vector<1x2x1x16xf32> to vector<2x16xf32>
    %c0_101 = arith.constant 0 : index
    %c0_102 = arith.constant 0 : index
    %c256 = arith.constant 256 : index
    %92 = vector.load %arg3[%c0_101, %c0_102, %c256] : memref<1x4x1024xf32, #tpu.memory_space<vmem>>, vector<1x2x16xf32>
    %93 = vector.shape_cast %92 : vector<1x2x16xf32> to vector<2x16xf32>
    %94 = vector.shape_cast %91 : vector<2x16xf32> to vector<1x2x16xf32>
    tpu.vector_store %arg3[%c0_101, %c0_102, %c256], %94 {strides = array<i32>} : memref<1x4x1024xf32, #tpu.memory_space<vmem>>, vector<1x2x16xf32>,
    %c1_103 = arith.constant 1 : index
    %c0_104 = arith.constant 0 : index
    %c1_105 = arith.constant 1 : index
    %c0_106 = arith.constant 0 : index
    %95 = vector.load %arg4[%c1_103, %c0_104, %c1_105, %c0_106] : memref<4x2x16x16xf32, #tpu.memory_space<vmem>>, vector<1x2x1x16xf32>
    %96 = vector.shape_cast %95 : vector<1x2x1x16xf32> to vector<2x16xf32>
    %c0_107 = arith.constant 0 : index
    %c0_108 = arith.constant 0 : index
    %c272 = arith.constant 272 : index
    %97 = vector.load %arg3[%c0_107, %c0_108, %c272] : memref<1x4x1024xf32, #tpu.memory_space<vmem>>, vector<1x2x16xf32>
    %98 = vector.shape_cast %97 : vector<1x2x16xf32> to vector<2x16xf32>
    %99 = vector.shape_cast %96 : vector<2x16xf32> to vector<1x2x16xf32>
    tpu.vector_store %arg3[%c0_107, %c0_108, %c272], %99 {strides = array<i32>} : memref<1x4x1024xf32, #tpu.memory_space<vmem>>, vector<1x2x16xf32>,
    %c1_109 = arith.constant 1 : index
    %c0_110 = arith.constant 0 : index
    %c2_111 = arith.constant 2 : index
    %c0_112 = arith.constant 0 : index
    %100 = vector.load %arg4[%c1_109, %c0_110, %c2_111, %c0_112] : memref<4x2x16x16xf32, #tpu.memory_space<vmem>>, vector<1x2x1x16xf32>
    %101 = vector.shape_cast %100 : vector<1x2x1x16xf32> to vector<2x16xf32>
    %c0_113 = arith.constant 0 : index
    %c0_114 = arith.constant 0 : index
    %c288 = arith.constant 288 : index
    %102 = vector.load %arg3[%c0_113, %c0_114, %c288] : memref<1x4x1024xf32, #tpu.memory_space<vmem>>, vector<1x2x16xf32>
    %103 = vector.shape_cast %102 : vector<1x2x16xf32> to vector<2x16xf32>
    %104 = vector.shape_cast %101 : vector<2x16xf32> to vector<1x2x16xf32>
    tpu.vector_store %arg3[%c0_113, %c0_114, %c288], %104 {strides = array<i32>} : memref<1x4x1024xf32, #tpu.memory_space<vmem>>, vector<1x2x16xf32>,
    %c1_115 = arith.constant 1 : index
    %c0_116 = arith.constant 0 : index
    %c3_117 = arith.constant 3 : index
    %c0_118 = arith.constant 0 : index
    %105 = vector.load %arg4[%c1_115, %c0_116, %c3_117, %c0_118] : memref<4x2x16x16xf32, #tpu.memory_space<vmem>>, vector<1x2x1x16xf32>
    %106 = vector.shape_cast %105 : vector<1x2x1x16xf32> to vector<2x16xf32>
    %c0_119 = arith.constant 0 : index
    %c0_120 = arith.constant 0 : index
    %c304 = arith.constant 304 : index
    %107 = vector.load %arg3[%c0_119, %c0_120, %c304] : memref<1x4x1024xf32, #tpu.memory_space<vmem>>, vector<1x2x16xf32>
    %108 = vector.shape_cast %107 : vector<1x2x16xf32> to vector<2x16xf32>
    %109 = vector.shape_cast %106 : vector<2x16xf32> to vector<1x2x16xf32>
    tpu.vector_store %arg3[%c0_119, %c0_120, %c304], %109 {strides = array<i32>} : memref<1x4x1024xf32, #tpu.memory_space<vmem>>, vector<1x2x16xf32>,
    %c1_121 = arith.constant 1 : index
    %c0_122 = arith.constant 0 : index
    %c4_123 = arith.constant 4 : index
    %c0_124 = arith.constant 0 : index
    %110 = vector.load %arg4[%c1_121, %c0_122, %c4_123, %c0_124] : memref<4x2x16x16xf32, #tpu.memory_space<vmem>>, vector<1x2x1x16xf32>
    %111 = vector.shape_cast %110 : vector<1x2x1x16xf32> to vector<2x16xf32>
    %c0_125 = arith.constant 0 : index
    %c0_126 = arith.constant 0 : index
    %c320 = arith.constant 320 : index
    %112 = vector.load %arg3[%c0_125, %c0_126, %c320] : memref<1x4x1024xf32, #tpu.memory_space<vmem>>, vector<1x2x16xf32>
    %113 = vector.shape_cast %112 : vector<1x2x16xf32> to vector<2x16xf32>
    %114 = vector.shape_cast %111 : vector<2x16xf32> to vector<1x2x16xf32>
    tpu.vector_store %arg3[%c0_125, %c0_126, %c320], %114 {strides = array<i32>} : memref<1x4x1024xf32, #tpu.memory_space<vmem>>, vector<1x2x16xf32>,
    %c1_127 = arith.constant 1 : index
    %c0_128 = arith.constant 0 : index
    %c5_129 = arith.constant 5 : index
    %c0_130 = arith.constant 0 : index
    %115 = vector.load %arg4[%c1_127, %c0_128, %c5_129, %c0_130] : memref<4x2x16x16xf32, #tpu.memory_space<vmem>>, vector<1x2x1x16xf32>
    %116 = vector.shape_cast %115 : vector<1x2x1x16xf32> to vector<2x16xf32>
    %c0_131 = arith.constant 0 : index
    %c0_132 = arith.constant 0 : index
    %c336 = arith.constant 336 : index
    %117 = vector.load %arg3[%c0_131, %c0_132, %c336] : memref<1x4x1024xf32, #tpu.memory_space<vmem>>, vector<1x2x16xf32>
    %118 = vector.shape_cast %117 : vector<1x2x16xf32> to vector<2x16xf32>
    %119 = vector.shape_cast %116 : vector<2x16xf32> to vector<1x2x16xf32>
    tpu.vector_store %arg3[%c0_131, %c0_132, %c336], %119 {strides = array<i32>} : memref<1x4x1024xf32, #tpu.memory_space<vmem>>, vector<1x2x16xf32>,
    %c1_133 = arith.constant 1 : index
    %c0_134 = arith.constant 0 : index
    %c6_135 = arith.constant 6 : index
    %c0_136 = arith.constant 0 : index
    %120 = vector.load %arg4[%c1_133, %c0_134, %c6_135, %c0_136] : memref<4x2x16x16xf32, #tpu.memory_space<vmem>>, vector<1x2x1x16xf32>
    %121 = vector.shape_cast %120 : vector<1x2x1x16xf32> to vector<2x16xf32>
    %c0_137 = arith.constant 0 : index
    %c0_138 = arith.constant 0 : index
    %c352 = arith.constant 352 : index
    %122 = vector.load %arg3[%c0_137, %c0_138, %c352] : memref<1x4x1024xf32, #tpu.memory_space<vmem>>, vector<1x2x16xf32>
    %123 = vector.shape_cast %122 : vector<1x2x16xf32> to vector<2x16xf32>
    %124 = vector.shape_cast %121 : vector<2x16xf32> to vector<1x2x16xf32>
    tpu.vector_store %arg3[%c0_137, %c0_138, %c352], %124 {strides = array<i32>} : memref<1x4x1024xf32, #tpu.memory_space<vmem>>, vector<1x2x16xf32>,
    %c1_139 = arith.constant 1 : index
    %c0_140 = arith.constant 0 : index
    %c7_141 = arith.constant 7 : index
    %c0_142 = arith.constant 0 : index
    %125 = vector.load %arg4[%c1_139, %c0_140, %c7_141, %c0_142] : memref<4x2x16x16xf32, #tpu.memory_space<vmem>>, vector<1x2x1x16xf32>
    %126 = vector.shape_cast %125 : vector<1x2x1x16xf32> to vector<2x16xf32>
    %c0_143 = arith.constant 0 : index
    %c0_144 = arith.constant 0 : index
    %c368 = arith.constant 368 : index
    %127 = vector.load %arg3[%c0_143, %c0_144, %c368] : memref<1x4x1024xf32, #tpu.memory_space<vmem>>, vector<1x2x16xf32>
    %128 = vector.shape_cast %127 : vector<1x2x16xf32> to vector<2x16xf32>
    %129 = vector.shape_cast %126 : vector<2x16xf32> to vector<1x2x16xf32>
    tpu.vector_store %arg3[%c0_143, %c0_144, %c368], %129 {strides = array<i32>} : memref<1x4x1024xf32, #tpu.memory_space<vmem>>, vector<1x2x16xf32>,
    %c1_145 = arith.constant 1 : index
    %c0_146 = arith.constant 0 : index
    %c8_147 = arith.constant 8 : index
    %c0_148 = arith.constant 0 : index
    %130 = vector.load %arg4[%c1_145, %c0_146, %c8_147, %c0_148] : memref<4x2x16x16xf32, #tpu.memory_space<vmem>>, vector<1x2x1x16xf32>
    %131 = vector.shape_cast %130 : vector<1x2x1x16xf32> to vector<2x16xf32>
    %c0_149 = arith.constant 0 : index
    %c0_150 = arith.constant 0 : index
    %c384 = arith.constant 384 : index
    %132 = vector.load %arg3[%c0_149, %c0_150, %c384] : memref<1x4x1024xf32, #tpu.memory_space<vmem>>, vector<1x2x16xf32>
    %133 = vector.shape_cast %132 : vector<1x2x16xf32> to vector<2x16xf32>
    %134 = vector.shape_cast %131 : vector<2x16xf32> to vector<1x2x16xf32>
    tpu.vector_store %arg3[%c0_149, %c0_150, %c384], %134 {strides = array<i32>} : memref<1x4x1024xf32, #tpu.memory_space<vmem>>, vector<1x2x16xf32>,
    %c1_151 = arith.constant 1 : index
    %c0_152 = arith.constant 0 : index
    %c9_153 = arith.constant 9 : index
    %c0_154 = arith.constant 0 : index
    %135 = vector.load %arg4[%c1_151, %c0_152, %c9_153, %c0_154] : memref<4x2x16x16xf32, #tpu.memory_space<vmem>>, vector<1x2x1x16xf32>
    %136 = vector.shape_cast %135 : vector<1x2x1x16xf32> to vector<2x16xf32>
    %c0_155 = arith.constant 0 : index
    %c0_156 = arith.constant 0 : index
    %c400 = arith.constant 400 : index
    %137 = vector.load %arg3[%c0_155, %c0_156, %c400] : memref<1x4x1024xf32, #tpu.memory_space<vmem>>, vector<1x2x16xf32>
    %138 = vector.shape_cast %137 : vector<1x2x16xf32> to vector<2x16xf32>
    %139 = vector.shape_cast %136 : vector<2x16xf32> to vector<1x2x16xf32>
    tpu.vector_store %arg3[%c0_155, %c0_156, %c400], %139 {strides = array<i32>} : memref<1x4x1024xf32, #tpu.memory_space<vmem>>, vector<1x2x16xf32>,
    %c1_157 = arith.constant 1 : index
    %c0_158 = arith.constant 0 : index
    %c10_159 = arith.constant 10 : index
    %c0_160 = arith.constant 0 : index
    %140 = vector.load %arg4[%c1_157, %c0_158, %c10_159, %c0_160] : memref<4x2x16x16xf32, #tpu.memory_space<vmem>>, vector<1x2x1x16xf32>
    %141 = vector.shape_cast %140 : vector<1x2x1x16xf32> to vector<2x16xf32>
    %c0_161 = arith.constant 0 : index
    %c0_162 = arith.constant 0 : index
    %c416 = arith.constant 416 : index
    %142 = vector.load %arg3[%c0_161, %c0_162, %c416] : memref<1x4x1024xf32, #tpu.memory_space<vmem>>, vector<1x2x16xf32>
    %143 = vector.shape_cast %142 : vector<1x2x16xf32> to vector<2x16xf32>
    %144 = vector.shape_cast %141 : vector<2x16xf32> to vector<1x2x16xf32>
    tpu.vector_store %arg3[%c0_161, %c0_162, %c416], %144 {strides = array<i32>} : memref<1x4x1024xf32, #tpu.memory_space<vmem>>, vector<1x2x16xf32>,
    %c1_163 = arith.constant 1 : index
    %c0_164 = arith.constant 0 : index
    %c11_165 = arith.constant 11 : index
    %c0_166 = arith.constant 0 : index
    %145 = vector.load %arg4[%c1_163, %c0_164, %c11_165, %c0_166] : memref<4x2x16x16xf32, #tpu.memory_space<vmem>>, vector<1x2x1x16xf32>
    %146 = vector.shape_cast %145 : vector<1x2x1x16xf32> to vector<2x16xf32>
    %c0_167 = arith.constant 0 : index
    %c0_168 = arith.constant 0 : index
    %c432 = arith.constant 432 : index
    %147 = vector.load %arg3[%c0_167, %c0_168, %c432] : memref<1x4x1024xf32, #tpu.memory_space<vmem>>, vector<1x2x16xf32>
    %148 = vector.shape_cast %147 : vector<1x2x16xf32> to vector<2x16xf32>
    %149 = vector.shape_cast %146 : vector<2x16xf32> to vector<1x2x16xf32>
    tpu.vector_store %arg3[%c0_167, %c0_168, %c432], %149 {strides = array<i32>} : memref<1x4x1024xf32, #tpu.memory_space<vmem>>, vector<1x2x16xf32>,
    %c1_169 = arith.constant 1 : index
    %c0_170 = arith.constant 0 : index
    %c12_171 = arith.constant 12 : index
    %c0_172 = arith.constant 0 : index
    %150 = vector.load %arg4[%c1_169, %c0_170, %c12_171, %c0_172] : memref<4x2x16x16xf32, #tpu.memory_space<vmem>>, vector<1x2x1x16xf32>
    %151 = vector.shape_cast %150 : vector<1x2x1x16xf32> to vector<2x16xf32>
    %c0_173 = arith.constant 0 : index
    %c0_174 = arith.constant 0 : index
    %c448 = arith.constant 448 : index
    %152 = vector.load %arg3[%c0_173, %c0_174, %c448] : memref<1x4x1024xf32, #tpu.memory_space<vmem>>, vector<1x2x16xf32>
    %153 = vector.shape_cast %152 : vector<1x2x16xf32> to vector<2x16xf32>
    %154 = vector.shape_cast %151 : vector<2x16xf32> to vector<1x2x16xf32>
    tpu.vector_store %arg3[%c0_173, %c0_174, %c448], %154 {strides = array<i32>} : memref<1x4x1024xf32, #tpu.memory_space<vmem>>, vector<1x2x16xf32>,
    %c1_175 = arith.constant 1 : index
    %c0_176 = arith.constant 0 : index
    %c13_177 = arith.constant 13 : index
    %c0_178 = arith.constant 0 : index
    %155 = vector.load %arg4[%c1_175, %c0_176, %c13_177, %c0_178] : memref<4x2x16x16xf32, #tpu.memory_space<vmem>>, vector<1x2x1x16xf32>
    %156 = vector.shape_cast %155 : vector<1x2x1x16xf32> to vector<2x16xf32>
    %c0_179 = arith.constant 0 : index
    %c0_180 = arith.constant 0 : index
    %c464 = arith.constant 464 : index
    %157 = vector.load %arg3[%c0_179, %c0_180, %c464] : memref<1x4x1024xf32, #tpu.memory_space<vmem>>, vector<1x2x16xf32>
    %158 = vector.shape_cast %157 : vector<1x2x16xf32> to vector<2x16xf32>
    %159 = vector.shape_cast %156 : vector<2x16xf32> to vector<1x2x16xf32>
    tpu.vector_store %arg3[%c0_179, %c0_180, %c464], %159 {strides = array<i32>} : memref<1x4x1024xf32, #tpu.memory_space<vmem>>, vector<1x2x16xf32>,
    %c1_181 = arith.constant 1 : index
    %c0_182 = arith.constant 0 : index
    %c14_183 = arith.constant 14 : index
    %c0_184 = arith.constant 0 : index
    %160 = vector.load %arg4[%c1_181, %c0_182, %c14_183, %c0_184] : memref<4x2x16x16xf32, #tpu.memory_space<vmem>>, vector<1x2x1x16xf32>
    %161 = vector.shape_cast %160 : vector<1x2x1x16xf32> to vector<2x16xf32>
    %c0_185 = arith.constant 0 : index
    %c0_186 = arith.constant 0 : index
    %c480 = arith.constant 480 : index
    %162 = vector.load %arg3[%c0_185, %c0_186, %c480] : memref<1x4x1024xf32, #tpu.memory_space<vmem>>, vector<1x2x16xf32>
    %163 = vector.shape_cast %162 : vector<1x2x16xf32> to vector<2x16xf32>
    %164 = vector.shape_cast %161 : vector<2x16xf32> to vector<1x2x16xf32>
    tpu.vector_store %arg3[%c0_185, %c0_186, %c480], %164 {strides = array<i32>} : memref<1x4x1024xf32, #tpu.memory_space<vmem>>, vector<1x2x16xf32>,
    %c1_187 = arith.constant 1 : index
    %c0_188 = arith.constant 0 : index
    %c15_189 = arith.constant 15 : index
    %c0_190 = arith.constant 0 : index
    %165 = vector.load %arg4[%c1_187, %c0_188, %c15_189, %c0_190] : memref<4x2x16x16xf32, #tpu.memory_space<vmem>>, vector<1x2x1x16xf32>
    %166 = vector.shape_cast %165 : vector<1x2x1x16xf32> to vector<2x16xf32>
    %c0_191 = arith.constant 0 : index
    %c0_192 = arith.constant 0 : index
    %c496 = arith.constant 496 : index
    %167 = vector.load %arg3[%c0_191, %c0_192, %c496] : memref<1x4x1024xf32, #tpu.memory_space<vmem>>, vector<1x2x16xf32>
    %168 = vector.shape_cast %167 : vector<1x2x16xf32> to vector<2x16xf32>
    %169 = vector.shape_cast %166 : vector<2x16xf32> to vector<1x2x16xf32>
    tpu.vector_store %arg3[%c0_191, %c0_192, %c496], %169 {strides = array<i32>} : memref<1x4x1024xf32, #tpu.memory_space<vmem>>, vector<1x2x16xf32>,
    %c2_193 = arith.constant 2 : index
    %c0_194 = arith.constant 0 : index
    %c0_195 = arith.constant 0 : index
    %c0_196 = arith.constant 0 : index
    %170 = vector.load %arg4[%c2_193, %c0_194, %c0_195, %c0_196] : memref<4x2x16x16xf32, #tpu.memory_space<vmem>>, vector<1x2x1x16xf32>
    %171 = vector.shape_cast %170 : vector<1x2x1x16xf32> to vector<2x16xf32>
    %c0_197 = arith.constant 0 : index
    %c0_198 = arith.constant 0 : index
    %c512 = arith.constant 512 : index
    %172 = vector.load %arg3[%c0_197, %c0_198, %c512] : memref<1x4x1024xf32, #tpu.memory_space<vmem>>, vector<1x2x16xf32>
    %173 = vector.shape_cast %172 : vector<1x2x16xf32> to vector<2x16xf32>
    %174 = vector.shape_cast %171 : vector<2x16xf32> to vector<1x2x16xf32>
    tpu.vector_store %arg3[%c0_197, %c0_198, %c512], %174 {strides = array<i32>} : memref<1x4x1024xf32, #tpu.memory_space<vmem>>, vector<1x2x16xf32>,
    %c2_199 = arith.constant 2 : index
    %c0_200 = arith.constant 0 : index
    %c1_201 = arith.constant 1 : index
    %c0_202 = arith.constant 0 : index
    %175 = vector.load %arg4[%c2_199, %c0_200, %c1_201, %c0_202] : memref<4x2x16x16xf32, #tpu.memory_space<vmem>>, vector<1x2x1x16xf32>
    %176 = vector.shape_cast %175 : vector<1x2x1x16xf32> to vector<2x16xf32>
    %c0_203 = arith.constant 0 : index
    %c0_204 = arith.constant 0 : index
    %c528 = arith.constant 528 : index
    %177 = vector.load %arg3[%c0_203, %c0_204, %c528] : memref<1x4x1024xf32, #tpu.memory_space<vmem>>, vector<1x2x16xf32>
    %178 = vector.shape_cast %177 : vector<1x2x16xf32> to vector<2x16xf32>
    %179 = vector.shape_cast %176 : vector<2x16xf32> to vector<1x2x16xf32>
    tpu.vector_store %arg3[%c0_203, %c0_204, %c528], %179 {strides = array<i32>} : memref<1x4x1024xf32, #tpu.memory_space<vmem>>, vector<1x2x16xf32>,
    %c2_205 = arith.constant 2 : index
    %c0_206 = arith.constant 0 : index
    %c2_207 = arith.constant 2 : index
    %c0_208 = arith.constant 0 : index
    %180 = vector.load %arg4[%c2_205, %c0_206, %c2_207, %c0_208] : memref<4x2x16x16xf32, #tpu.memory_space<vmem>>, vector<1x2x1x16xf32>
    %181 = vector.shape_cast %180 : vector<1x2x1x16xf32> to vector<2x16xf32>
    %c0_209 = arith.constant 0 : index
    %c0_210 = arith.constant 0 : index
    %c544 = arith.constant 544 : index
    %182 = vector.load %arg3[%c0_209, %c0_210, %c544] : memref<1x4x1024xf32, #tpu.memory_space<vmem>>, vector<1x2x16xf32>
    %183 = vector.shape_cast %182 : vector<1x2x16xf32> to vector<2x16xf32>
    %184 = vector.shape_cast %181 : vector<2x16xf32> to vector<1x2x16xf32>
    tpu.vector_store %arg3[%c0_209, %c0_210, %c544], %184 {strides = array<i32>} : memref<1x4x1024xf32, #tpu.memory_space<vmem>>, vector<1x2x16xf32>,
    %c2_211 = arith.constant 2 : index
    %c0_212 = arith.constant 0 : index
    %c3_213 = arith.constant 3 : index
    %c0_214 = arith.constant 0 : index
    %185 = vector.load %arg4[%c2_211, %c0_212, %c3_213, %c0_214] : memref<4x2x16x16xf32, #tpu.memory_space<vmem>>, vector<1x2x1x16xf32>
    %186 = vector.shape_cast %185 : vector<1x2x1x16xf32> to vector<2x16xf32>
    %c0_215 = arith.constant 0 : index
    %c0_216 = arith.constant 0 : index
    %c560 = arith.constant 560 : index
    %187 = vector.load %arg3[%c0_215, %c0_216, %c560] : memref<1x4x1024xf32, #tpu.memory_space<vmem>>, vector<1x2x16xf32>
    %188 = vector.shape_cast %187 : vector<1x2x16xf32> to vector<2x16xf32>
    %189 = vector.shape_cast %186 : vector<2x16xf32> to vector<1x2x16xf32>
    tpu.vector_store %arg3[%c0_215, %c0_216, %c560], %189 {strides = array<i32>} : memref<1x4x1024xf32, #tpu.memory_space<vmem>>, vector<1x2x16xf32>,
    %c2_217 = arith.constant 2 : index
    %c0_218 = arith.constant 0 : index
    %c4_219 = arith.constant 4 : index
    %c0_220 = arith.constant 0 : index
    %190 = vector.load %arg4[%c2_217, %c0_218, %c4_219, %c0_220] : memref<4x2x16x16xf32, #tpu.memory_space<vmem>>, vector<1x2x1x16xf32>
    %191 = vector.shape_cast %190 : vector<1x2x1x16xf32> to vector<2x16xf32>
    %c0_221 = arith.constant 0 : index
    %c0_222 = arith.constant 0 : index
    %c576 = arith.constant 576 : index
    %192 = vector.load %arg3[%c0_221, %c0_222, %c576] : memref<1x4x1024xf32, #tpu.memory_space<vmem>>, vector<1x2x16xf32>
    %193 = vector.shape_cast %192 : vector<1x2x16xf32> to vector<2x16xf32>
    %194 = vector.shape_cast %191 : vector<2x16xf32> to vector<1x2x16xf32>
    tpu.vector_store %arg3[%c0_221, %c0_222, %c576], %194 {strides = array<i32>} : memref<1x4x1024xf32, #tpu.memory_space<vmem>>, vector<1x2x16xf32>,
    %c2_223 = arith.constant 2 : index
    %c0_224 = arith.constant 0 : index
    %c5_225 = arith.constant 5 : index
    %c0_226 = arith.constant 0 : index
    %195 = vector.load %arg4[%c2_223, %c0_224, %c5_225, %c0_226] : memref<4x2x16x16xf32, #tpu.memory_space<vmem>>, vector<1x2x1x16xf32>
    %196 = vector.shape_cast %195 : vector<1x2x1x16xf32> to vector<2x16xf32>
    %c0_227 = arith.constant 0 : index
    %c0_228 = arith.constant 0 : index
    %c592 = arith.constant 592 : index
    %197 = vector.load %arg3[%c0_227, %c0_228, %c592] : memref<1x4x1024xf32, #tpu.memory_space<vmem>>, vector<1x2x16xf32>
    %198 = vector.shape_cast %197 : vector<1x2x16xf32> to vector<2x16xf32>
    %199 = vector.shape_cast %196 : vector<2x16xf32> to vector<1x2x16xf32>
    tpu.vector_store %arg3[%c0_227, %c0_228, %c592], %199 {strides = array<i32>} : memref<1x4x1024xf32, #tpu.memory_space<vmem>>, vector<1x2x16xf32>,
    %c2_229 = arith.constant 2 : index
    %c0_230 = arith.constant 0 : index
    %c6_231 = arith.constant 6 : index
    %c0_232 = arith.constant 0 : index
    %200 = vector.load %arg4[%c2_229, %c0_230, %c6_231, %c0_232] : memref<4x2x16x16xf32, #tpu.memory_space<vmem>>, vector<1x2x1x16xf32>
    %201 = vector.shape_cast %200 : vector<1x2x1x16xf32> to vector<2x16xf32>
    %c0_233 = arith.constant 0 : index
    %c0_234 = arith.constant 0 : index
    %c608 = arith.constant 608 : index
    %202 = vector.load %arg3[%c0_233, %c0_234, %c608] : memref<1x4x1024xf32, #tpu.memory_space<vmem>>, vector<1x2x16xf32>
    %203 = vector.shape_cast %202 : vector<1x2x16xf32> to vector<2x16xf32>
    %204 = vector.shape_cast %201 : vector<2x16xf32> to vector<1x2x16xf32>
    tpu.vector_store %arg3[%c0_233, %c0_234, %c608], %204 {strides = array<i32>} : memref<1x4x1024xf32, #tpu.memory_space<vmem>>, vector<1x2x16xf32>,
    %c2_235 = arith.constant 2 : index
    %c0_236 = arith.constant 0 : index
    %c7_237 = arith.constant 7 : index
    %c0_238 = arith.constant 0 : index
    %205 = vector.load %arg4[%c2_235, %c0_236, %c7_237, %c0_238] : memref<4x2x16x16xf32, #tpu.memory_space<vmem>>, vector<1x2x1x16xf32>
    %206 = vector.shape_cast %205 : vector<1x2x1x16xf32> to vector<2x16xf32>
    %c0_239 = arith.constant 0 : index
    %c0_240 = arith.constant 0 : index
    %c624 = arith.constant 624 : index
    %207 = vector.load %arg3[%c0_239, %c0_240, %c624] : memref<1x4x1024xf32, #tpu.memory_space<vmem>>, vector<1x2x16xf32>
    %208 = vector.shape_cast %207 : vector<1x2x16xf32> to vector<2x16xf32>
    %209 = vector.shape_cast %206 : vector<2x16xf32> to vector<1x2x16xf32>
    tpu.vector_store %arg3[%c0_239, %c0_240, %c624], %209 {strides = array<i32>} : memref<1x4x1024xf32, #tpu.memory_space<vmem>>, vector<1x2x16xf32>,
    %c2_241 = arith.constant 2 : index
    %c0_242 = arith.constant 0 : index
    %c8_243 = arith.constant 8 : index
    %c0_244 = arith.constant 0 : index
    %210 = vector.load %arg4[%c2_241, %c0_242, %c8_243, %c0_244] : memref<4x2x16x16xf32, #tpu.memory_space<vmem>>, vector<1x2x1x16xf32>
    %211 = vector.shape_cast %210 : vector<1x2x1x16xf32> to vector<2x16xf32>
    %c0_245 = arith.constant 0 : index
    %c0_246 = arith.constant 0 : index
    %c640 = arith.constant 640 : index
    %212 = vector.load %arg3[%c0_245, %c0_246, %c640] : memref<1x4x1024xf32, #tpu.memory_space<vmem>>, vector<1x2x16xf32>
    %213 = vector.shape_cast %212 : vector<1x2x16xf32> to vector<2x16xf32>
    %214 = vector.shape_cast %211 : vector<2x16xf32> to vector<1x2x16xf32>
    tpu.vector_store %arg3[%c0_245, %c0_246, %c640], %214 {strides = array<i32>} : memref<1x4x1024xf32, #tpu.memory_space<vmem>>, vector<1x2x16xf32>,
    %c2_247 = arith.constant 2 : index
    %c0_248 = arith.constant 0 : index
    %c9_249 = arith.constant 9 : index
    %c0_250 = arith.constant 0 : index
    %215 = vector.load %arg4[%c2_247, %c0_248, %c9_249, %c0_250] : memref<4x2x16x16xf32, #tpu.memory_space<vmem>>, vector<1x2x1x16xf32>
    %216 = vector.shape_cast %215 : vector<1x2x1x16xf32> to vector<2x16xf32>
    %c0_251 = arith.constant 0 : index
    %c0_252 = arith.constant 0 : index
    %c656 = arith.constant 656 : index
    %217 = vector.load %arg3[%c0_251, %c0_252, %c656] : memref<1x4x1024xf32, #tpu.memory_space<vmem>>, vector<1x2x16xf32>
    %218 = vector.shape_cast %217 : vector<1x2x16xf32> to vector<2x16xf32>
    %219 = vector.shape_cast %216 : vector<2x16xf32> to vector<1x2x16xf32>
    tpu.vector_store %arg3[%c0_251, %c0_252, %c656], %219 {strides = array<i32>} : memref<1x4x1024xf32, #tpu.memory_space<vmem>>, vector<1x2x16xf32>,
    %c2_253 = arith.constant 2 : index
    %c0_254 = arith.constant 0 : index
    %c10_255 = arith.constant 10 : index
    %c0_256 = arith.constant 0 : index
    %220 = vector.load %arg4[%c2_253, %c0_254, %c10_255, %c0_256] : memref<4x2x16x16xf32, #tpu.memory_space<vmem>>, vector<1x2x1x16xf32>
    %221 = vector.shape_cast %220 : vector<1x2x1x16xf32> to vector<2x16xf32>
    %c0_257 = arith.constant 0 : index
    %c0_258 = arith.constant 0 : index
    %c672 = arith.constant 672 : index
    %222 = vector.load %arg3[%c0_257, %c0_258, %c672] : memref<1x4x1024xf32, #tpu.memory_space<vmem>>, vector<1x2x16xf32>
    %223 = vector.shape_cast %222 : vector<1x2x16xf32> to vector<2x16xf32>
    %224 = vector.shape_cast %221 : vector<2x16xf32> to vector<1x2x16xf32>
    tpu.vector_store %arg3[%c0_257, %c0_258, %c672], %224 {strides = array<i32>} : memref<1x4x1024xf32, #tpu.memory_space<vmem>>, vector<1x2x16xf32>,
    %c2_259 = arith.constant 2 : index
    %c0_260 = arith.constant 0 : index
    %c11_261 = arith.constant 11 : index
    %c0_262 = arith.constant 0 : index
    %225 = vector.load %arg4[%c2_259, %c0_260, %c11_261, %c0_262] : memref<4x2x16x16xf32, #tpu.memory_space<vmem>>, vector<1x2x1x16xf32>
    %226 = vector.shape_cast %225 : vector<1x2x1x16xf32> to vector<2x16xf32>
    %c0_263 = arith.constant 0 : index
    %c0_264 = arith.constant 0 : index
    %c688 = arith.constant 688 : index
    %227 = vector.load %arg3[%c0_263, %c0_264, %c688] : memref<1x4x1024xf32, #tpu.memory_space<vmem>>, vector<1x2x16xf32>
    %228 = vector.shape_cast %227 : vector<1x2x16xf32> to vector<2x16xf32>
    %229 = vector.shape_cast %226 : vector<2x16xf32> to vector<1x2x16xf32>
    tpu.vector_store %arg3[%c0_263, %c0_264, %c688], %229 {strides = array<i32>} : memref<1x4x1024xf32, #tpu.memory_space<vmem>>, vector<1x2x16xf32>,
    %c2_265 = arith.constant 2 : index
    %c0_266 = arith.constant 0 : index
    %c12_267 = arith.constant 12 : index
    %c0_268 = arith.constant 0 : index
    %230 = vector.load %arg4[%c2_265, %c0_266, %c12_267, %c0_268] : memref<4x2x16x16xf32, #tpu.memory_space<vmem>>, vector<1x2x1x16xf32>
    %231 = vector.shape_cast %230 : vector<1x2x1x16xf32> to vector<2x16xf32>
    %c0_269 = arith.constant 0 : index
    %c0_270 = arith.constant 0 : index
    %c704 = arith.constant 704 : index
    %232 = vector.load %arg3[%c0_269, %c0_270, %c704] : memref<1x4x1024xf32, #tpu.memory_space<vmem>>, vector<1x2x16xf32>
    %233 = vector.shape_cast %232 : vector<1x2x16xf32> to vector<2x16xf32>
    %234 = vector.shape_cast %231 : vector<2x16xf32> to vector<1x2x16xf32>
    tpu.vector_store %arg3[%c0_269, %c0_270, %c704], %234 {strides = array<i32>} : memref<1x4x1024xf32, #tpu.memory_space<vmem>>, vector<1x2x16xf32>,
    %c2_271 = arith.constant 2 : index
    %c0_272 = arith.constant 0 : index
    %c13_273 = arith.constant 13 : index
    %c0_274 = arith.constant 0 : index
    %235 = vector.load %arg4[%c2_271, %c0_272, %c13_273, %c0_274] : memref<4x2x16x16xf32, #tpu.memory_space<vmem>>, vector<1x2x1x16xf32>
    %236 = vector.shape_cast %235 : vector<1x2x1x16xf32> to vector<2x16xf32>
    %c0_275 = arith.constant 0 : index
    %c0_276 = arith.constant 0 : index
    %c720 = arith.constant 720 : index
    %237 = vector.load %arg3[%c0_275, %c0_276, %c720] : memref<1x4x1024xf32, #tpu.memory_space<vmem>>, vector<1x2x16xf32>
    %238 = vector.shape_cast %237 : vector<1x2x16xf32> to vector<2x16xf32>
    %239 = vector.shape_cast %236 : vector<2x16xf32> to vector<1x2x16xf32>
    tpu.vector_store %arg3[%c0_275, %c0_276, %c720], %239 {strides = array<i32>} : memref<1x4x1024xf32, #tpu.memory_space<vmem>>, vector<1x2x16xf32>,
    %c2_277 = arith.constant 2 : index
    %c0_278 = arith.constant 0 : index
    %c14_279 = arith.constant 14 : index
    %c0_280 = arith.constant 0 : index
    %240 = vector.load %arg4[%c2_277, %c0_278, %c14_279, %c0_280] : memref<4x2x16x16xf32, #tpu.memory_space<vmem>>, vector<1x2x1x16xf32>
    %241 = vector.shape_cast %240 : vector<1x2x1x16xf32> to vector<2x16xf32>
    %c0_281 = arith.constant 0 : index
    %c0_282 = arith.constant 0 : index
    %c736 = arith.constant 736 : index
    %242 = vector.load %arg3[%c0_281, %c0_282, %c736] : memref<1x4x1024xf32, #tpu.memory_space<vmem>>, vector<1x2x16xf32>
    %243 = vector.shape_cast %242 : vector<1x2x16xf32> to vector<2x16xf32>
    %244 = vector.shape_cast %241 : vector<2x16xf32> to vector<1x2x16xf32>
    tpu.vector_store %arg3[%c0_281, %c0_282, %c736], %244 {strides = array<i32>} : memref<1x4x1024xf32, #tpu.memory_space<vmem>>, vector<1x2x16xf32>,
    %c2_283 = arith.constant 2 : index
    %c0_284 = arith.constant 0 : index
    %c15_285 = arith.constant 15 : index
    %c0_286 = arith.constant 0 : index
    %245 = vector.load %arg4[%c2_283, %c0_284, %c15_285, %c0_286] : memref<4x2x16x16xf32, #tpu.memory_space<vmem>>, vector<1x2x1x16xf32>
    %246 = vector.shape_cast %245 : vector<1x2x1x16xf32> to vector<2x16xf32>
    %c0_287 = arith.constant 0 : index
    %c0_288 = arith.constant 0 : index
    %c752 = arith.constant 752 : index
    %247 = vector.load %arg3[%c0_287, %c0_288, %c752] : memref<1x4x1024xf32, #tpu.memory_space<vmem>>, vector<1x2x16xf32>
    %248 = vector.shape_cast %247 : vector<1x2x16xf32> to vector<2x16xf32>
    %249 = vector.shape_cast %246 : vector<2x16xf32> to vector<1x2x16xf32>
    tpu.vector_store %arg3[%c0_287, %c0_288, %c752], %249 {strides = array<i32>} : memref<1x4x1024xf32, #tpu.memory_space<vmem>>, vector<1x2x16xf32>,
    %c3_289 = arith.constant 3 : index
    %c0_290 = arith.constant 0 : index
    %c0_291 = arith.constant 0 : index
    %c0_292 = arith.constant 0 : index
    %250 = vector.load %arg4[%c3_289, %c0_290, %c0_291, %c0_292] : memref<4x2x16x16xf32, #tpu.memory_space<vmem>>, vector<1x2x1x16xf32>
    %251 = vector.shape_cast %250 : vector<1x2x1x16xf32> to vector<2x16xf32>
    %c0_293 = arith.constant 0 : index
    %c0_294 = arith.constant 0 : index
    %c768 = arith.constant 768 : index
    %252 = vector.load %arg3[%c0_293, %c0_294, %c768] : memref<1x4x1024xf32, #tpu.memory_space<vmem>>, vector<1x2x16xf32>
    %253 = vector.shape_cast %252 : vector<1x2x16xf32> to vector<2x16xf32>
    %254 = vector.shape_cast %251 : vector<2x16xf32> to vector<1x2x16xf32>
    tpu.vector_store %arg3[%c0_293, %c0_294, %c768], %254 {strides = array<i32>} : memref<1x4x1024xf32, #tpu.memory_space<vmem>>, vector<1x2x16xf32>,
    %c3_295 = arith.constant 3 : index
    %c0_296 = arith.constant 0 : index
    %c1_297 = arith.constant 1 : index
    %c0_298 = arith.constant 0 : index
    %255 = vector.load %arg4[%c3_295, %c0_296, %c1_297, %c0_298] : memref<4x2x16x16xf32, #tpu.memory_space<vmem>>, vector<1x2x1x16xf32>
    %256 = vector.shape_cast %255 : vector<1x2x1x16xf32> to vector<2x16xf32>
    %c0_299 = arith.constant 0 : index
    %c0_300 = arith.constant 0 : index
    %c784 = arith.constant 784 : index
    %257 = vector.load %arg3[%c0_299, %c0_300, %c784] : memref<1x4x1024xf32, #tpu.memory_space<vmem>>, vector<1x2x16xf32>
    %258 = vector.shape_cast %257 : vector<1x2x16xf32> to vector<2x16xf32>
    %259 = vector.shape_cast %256 : vector<2x16xf32> to vector<1x2x16xf32>
    tpu.vector_store %arg3[%c0_299, %c0_300, %c784], %259 {strides = array<i32>} : memref<1x4x1024xf32, #tpu.memory_space<vmem>>, vector<1x2x16xf32>,
    %c3_301 = arith.constant 3 : index
    %c0_302 = arith.constant 0 : index
    %c2_303 = arith.constant 2 : index
    %c0_304 = arith.constant 0 : index
    %260 = vector.load %arg4[%c3_301, %c0_302, %c2_303, %c0_304] : memref<4x2x16x16xf32, #tpu.memory_space<vmem>>, vector<1x2x1x16xf32>
    %261 = vector.shape_cast %260 : vector<1x2x1x16xf32> to vector<2x16xf32>
    %c0_305 = arith.constant 0 : index
    %c0_306 = arith.constant 0 : index
    %c800 = arith.constant 800 : index
    %262 = vector.load %arg3[%c0_305, %c0_306, %c800] : memref<1x4x1024xf32, #tpu.memory_space<vmem>>, vector<1x2x16xf32>
    %263 = vector.shape_cast %262 : vector<1x2x16xf32> to vector<2x16xf32>
    %264 = vector.shape_cast %261 : vector<2x16xf32> to vector<1x2x16xf32>
    tpu.vector_store %arg3[%c0_305, %c0_306, %c800], %264 {strides = array<i32>} : memref<1x4x1024xf32, #tpu.memory_space<vmem>>, vector<1x2x16xf32>,
    %c3_307 = arith.constant 3 : index
    %c0_308 = arith.constant 0 : index
    %c3_309 = arith.constant 3 : index
    %c0_310 = arith.constant 0 : index
    %265 = vector.load %arg4[%c3_307, %c0_308, %c3_309, %c0_310] : memref<4x2x16x16xf32, #tpu.memory_space<vmem>>, vector<1x2x1x16xf32>
    %266 = vector.shape_cast %265 : vector<1x2x1x16xf32> to vector<2x16xf32>
    %c0_311 = arith.constant 0 : index
    %c0_312 = arith.constant 0 : index
    %c816 = arith.constant 816 : index
    %267 = vector.load %arg3[%c0_311, %c0_312, %c816] : memref<1x4x1024xf32, #tpu.memory_space<vmem>>, vector<1x2x16xf32>
    %268 = vector.shape_cast %267 : vector<1x2x16xf32> to vector<2x16xf32>
    %269 = vector.shape_cast %266 : vector<2x16xf32> to vector<1x2x16xf32>
    tpu.vector_store %arg3[%c0_311, %c0_312, %c816], %269 {strides = array<i32>} : memref<1x4x1024xf32, #tpu.memory_space<vmem>>, vector<1x2x16xf32>,
    %c3_313 = arith.constant 3 : index
    %c0_314 = arith.constant 0 : index
    %c4_315 = arith.constant 4 : index
    %c0_316 = arith.constant 0 : index
    %270 = vector.load %arg4[%c3_313, %c0_314, %c4_315, %c0_316] : memref<4x2x16x16xf32, #tpu.memory_space<vmem>>, vector<1x2x1x16xf32>
    %271 = vector.shape_cast %270 : vector<1x2x1x16xf32> to vector<2x16xf32>
    %c0_317 = arith.constant 0 : index
    %c0_318 = arith.constant 0 : index
    %c832 = arith.constant 832 : index
    %272 = vector.load %arg3[%c0_317, %c0_318, %c832] : memref<1x4x1024xf32, #tpu.memory_space<vmem>>, vector<1x2x16xf32>
    %273 = vector.shape_cast %272 : vector<1x2x16xf32> to vector<2x16xf32>
    %274 = vector.shape_cast %271 : vector<2x16xf32> to vector<1x2x16xf32>
    tpu.vector_store %arg3[%c0_317, %c0_318, %c832], %274 {strides = array<i32>} : memref<1x4x1024xf32, #tpu.memory_space<vmem>>, vector<1x2x16xf32>,
    %c3_319 = arith.constant 3 : index
    %c0_320 = arith.constant 0 : index
    %c5_321 = arith.constant 5 : index
    %c0_322 = arith.constant 0 : index
    %275 = vector.load %arg4[%c3_319, %c0_320, %c5_321, %c0_322] : memref<4x2x16x16xf32, #tpu.memory_space<vmem>>, vector<1x2x1x16xf32>
    %276 = vector.shape_cast %275 : vector<1x2x1x16xf32> to vector<2x16xf32>
    %c0_323 = arith.constant 0 : index
    %c0_324 = arith.constant 0 : index
    %c848 = arith.constant 848 : index
    %277 = vector.load %arg3[%c0_323, %c0_324, %c848] : memref<1x4x1024xf32, #tpu.memory_space<vmem>>, vector<1x2x16xf32>
    %278 = vector.shape_cast %277 : vector<1x2x16xf32> to vector<2x16xf32>
    %279 = vector.shape_cast %276 : vector<2x16xf32> to vector<1x2x16xf32>
    tpu.vector_store %arg3[%c0_323, %c0_324, %c848], %279 {strides = array<i32>} : memref<1x4x1024xf32, #tpu.memory_space<vmem>>, vector<1x2x16xf32>,
    %c3_325 = arith.constant 3 : index
    %c0_326 = arith.constant 0 : index
    %c6_327 = arith.constant 6 : index
    %c0_328 = arith.constant 0 : index
    %280 = vector.load %arg4[%c3_325, %c0_326, %c6_327, %c0_328] : memref<4x2x16x16xf32, #tpu.memory_space<vmem>>, vector<1x2x1x16xf32>
    %281 = vector.shape_cast %280 : vector<1x2x1x16xf32> to vector<2x16xf32>
    %c0_329 = arith.constant 0 : index
    %c0_330 = arith.constant 0 : index
    %c864 = arith.constant 864 : index
    %282 = vector.load %arg3[%c0_329, %c0_330, %c864] : memref<1x4x1024xf32, #tpu.memory_space<vmem>>, vector<1x2x16xf32>
    %283 = vector.shape_cast %282 : vector<1x2x16xf32> to vector<2x16xf32>
    %284 = vector.shape_cast %281 : vector<2x16xf32> to vector<1x2x16xf32>
    tpu.vector_store %arg3[%c0_329, %c0_330, %c864], %284 {strides = array<i32>} : memref<1x4x1024xf32, #tpu.memory_space<vmem>>, vector<1x2x16xf32>,
    %c3_331 = arith.constant 3 : index
    %c0_332 = arith.constant 0 : index
    %c7_333 = arith.constant 7 : index
    %c0_334 = arith.constant 0 : index
    %285 = vector.load %arg4[%c3_331, %c0_332, %c7_333, %c0_334] : memref<4x2x16x16xf32, #tpu.memory_space<vmem>>, vector<1x2x1x16xf32>
    %286 = vector.shape_cast %285 : vector<1x2x1x16xf32> to vector<2x16xf32>
    %c0_335 = arith.constant 0 : index
    %c0_336 = arith.constant 0 : index
    %c880 = arith.constant 880 : index
    %287 = vector.load %arg3[%c0_335, %c0_336, %c880] : memref<1x4x1024xf32, #tpu.memory_space<vmem>>, vector<1x2x16xf32>
    %288 = vector.shape_cast %287 : vector<1x2x16xf32> to vector<2x16xf32>
    %289 = vector.shape_cast %286 : vector<2x16xf32> to vector<1x2x16xf32>
    tpu.vector_store %arg3[%c0_335, %c0_336, %c880], %289 {strides = array<i32>} : memref<1x4x1024xf32, #tpu.memory_space<vmem>>, vector<1x2x16xf32>,
    %c3_337 = arith.constant 3 : index
    %c0_338 = arith.constant 0 : index
    %c8_339 = arith.constant 8 : index
    %c0_340 = arith.constant 0 : index
    %290 = vector.load %arg4[%c3_337, %c0_338, %c8_339, %c0_340] : memref<4x2x16x16xf32, #tpu.memory_space<vmem>>, vector<1x2x1x16xf32>
    %291 = vector.shape_cast %290 : vector<1x2x1x16xf32> to vector<2x16xf32>
    %c0_341 = arith.constant 0 : index
    %c0_342 = arith.constant 0 : index
    %c896 = arith.constant 896 : index
    %292 = vector.load %arg3[%c0_341, %c0_342, %c896] : memref<1x4x1024xf32, #tpu.memory_space<vmem>>, vector<1x2x16xf32>
    %293 = vector.shape_cast %292 : vector<1x2x16xf32> to vector<2x16xf32>
    %294 = vector.shape_cast %291 : vector<2x16xf32> to vector<1x2x16xf32>
    tpu.vector_store %arg3[%c0_341, %c0_342, %c896], %294 {strides = array<i32>} : memref<1x4x1024xf32, #tpu.memory_space<vmem>>, vector<1x2x16xf32>,
    %c3_343 = arith.constant 3 : index
    %c0_344 = arith.constant 0 : index
    %c9_345 = arith.constant 9 : index
    %c0_346 = arith.constant 0 : index
    %295 = vector.load %arg4[%c3_343, %c0_344, %c9_345, %c0_346] : memref<4x2x16x16xf32, #tpu.memory_space<vmem>>, vector<1x2x1x16xf32>
    %296 = vector.shape_cast %295 : vector<1x2x1x16xf32> to vector<2x16xf32>
    %c0_347 = arith.constant 0 : index
    %c0_348 = arith.constant 0 : index
    %c912 = arith.constant 912 : index
    %297 = vector.load %arg3[%c0_347, %c0_348, %c912] : memref<1x4x1024xf32, #tpu.memory_space<vmem>>, vector<1x2x16xf32>
    %298 = vector.shape_cast %297 : vector<1x2x16xf32> to vector<2x16xf32>
    %299 = vector.shape_cast %296 : vector<2x16xf32> to vector<1x2x16xf32>
    tpu.vector_store %arg3[%c0_347, %c0_348, %c912], %299 {strides = array<i32>} : memref<1x4x1024xf32, #tpu.memory_space<vmem>>, vector<1x2x16xf32>,
    %c3_349 = arith.constant 3 : index
    %c0_350 = arith.constant 0 : index
    %c10_351 = arith.constant 10 : index
    %c0_352 = arith.constant 0 : index
    %300 = vector.load %arg4[%c3_349, %c0_350, %c10_351, %c0_352] : memref<4x2x16x16xf32, #tpu.memory_space<vmem>>, vector<1x2x1x16xf32>
    %301 = vector.shape_cast %300 : vector<1x2x1x16xf32> to vector<2x16xf32>
    %c0_353 = arith.constant 0 : index
    %c0_354 = arith.constant 0 : index
    %c928 = arith.constant 928 : index
    %302 = vector.load %arg3[%c0_353, %c0_354, %c928] : memref<1x4x1024xf32, #tpu.memory_space<vmem>>, vector<1x2x16xf32>
    %303 = vector.shape_cast %302 : vector<1x2x16xf32> to vector<2x16xf32>
    %304 = vector.shape_cast %301 : vector<2x16xf32> to vector<1x2x16xf32>
    tpu.vector_store %arg3[%c0_353, %c0_354, %c928], %304 {strides = array<i32>} : memref<1x4x1024xf32, #tpu.memory_space<vmem>>, vector<1x2x16xf32>,
    %c3_355 = arith.constant 3 : index
    %c0_356 = arith.constant 0 : index
    %c11_357 = arith.constant 11 : index
    %c0_358 = arith.constant 0 : index
    %305 = vector.load %arg4[%c3_355, %c0_356, %c11_357, %c0_358] : memref<4x2x16x16xf32, #tpu.memory_space<vmem>>, vector<1x2x1x16xf32>
    %306 = vector.shape_cast %305 : vector<1x2x1x16xf32> to vector<2x16xf32>
    %c0_359 = arith.constant 0 : index
    %c0_360 = arith.constant 0 : index
    %c944 = arith.constant 944 : index
    %307 = vector.load %arg3[%c0_359, %c0_360, %c944] : memref<1x4x1024xf32, #tpu.memory_space<vmem>>, vector<1x2x16xf32>
    %308 = vector.shape_cast %307 : vector<1x2x16xf32> to vector<2x16xf32>
    %309 = vector.shape_cast %306 : vector<2x16xf32> to vector<1x2x16xf32>
    tpu.vector_store %arg3[%c0_359, %c0_360, %c944], %309 {strides = array<i32>} : memref<1x4x1024xf32, #tpu.memory_space<vmem>>, vector<1x2x16xf32>,
    %c3_361 = arith.constant 3 : index
    %c0_362 = arith.constant 0 : index
    %c12_363 = arith.constant 12 : index
    %c0_364 = arith.constant 0 : index
    %310 = vector.load %arg4[%c3_361, %c0_362, %c12_363, %c0_364] : memref<4x2x16x16xf32, #tpu.memory_space<vmem>>, vector<1x2x1x16xf32>
    %311 = vector.shape_cast %310 : vector<1x2x1x16xf32> to vector<2x16xf32>
    %c0_365 = arith.constant 0 : index
    %c0_366 = arith.constant 0 : index
    %c960 = arith.constant 960 : index
    %312 = vector.load %arg3[%c0_365, %c0_366, %c960] : memref<1x4x1024xf32, #tpu.memory_space<vmem>>, vector<1x2x16xf32>
    %313 = vector.shape_cast %312 : vector<1x2x16xf32> to vector<2x16xf32>
    %314 = vector.shape_cast %311 : vector<2x16xf32> to vector<1x2x16xf32>
    tpu.vector_store %arg3[%c0_365, %c0_366, %c960], %314 {strides = array<i32>} : memref<1x4x1024xf32, #tpu.memory_space<vmem>>, vector<1x2x16xf32>,
    %c3_367 = arith.constant 3 : index
    %c0_368 = arith.constant 0 : index
    %c13_369 = arith.constant 13 : index
    %c0_370 = arith.constant 0 : index
    %315 = vector.load %arg4[%c3_367, %c0_368, %c13_369, %c0_370] : memref<4x2x16x16xf32, #tpu.memory_space<vmem>>, vector<1x2x1x16xf32>
    %316 = vector.shape_cast %315 : vector<1x2x1x16xf32> to vector<2x16xf32>
    %c0_371 = arith.constant 0 : index
    %c0_372 = arith.constant 0 : index
    %c976 = arith.constant 976 : index
    %317 = vector.load %arg3[%c0_371, %c0_372, %c976] : memref<1x4x1024xf32, #tpu.memory_space<vmem>>, vector<1x2x16xf32>
    %318 = vector.shape_cast %317 : vector<1x2x16xf32> to vector<2x16xf32>
    %319 = vector.shape_cast %316 : vector<2x16xf32> to vector<1x2x16xf32>
    tpu.vector_store %arg3[%c0_371, %c0_372, %c976], %319 {strides = array<i32>} : memref<1x4x1024xf32, #tpu.memory_space<vmem>>, vector<1x2x16xf32>,
    %c3_373 = arith.constant 3 : index
    %c0_374 = arith.constant 0 : index
    %c14_375 = arith.constant 14 : index
    %c0_376 = arith.constant 0 : index
    %320 = vector.load %arg4[%c3_373, %c0_374, %c14_375, %c0_376] : memref<4x2x16x16xf32, #tpu.memory_space<vmem>>, vector<1x2x1x16xf32>
    %321 = vector.shape_cast %320 : vector<1x2x1x16xf32> to vector<2x16xf32>
    %c0_377 = arith.constant 0 : index
    %c0_378 = arith.constant 0 : index
    %c992 = arith.constant 992 : index
    %322 = vector.load %arg3[%c0_377, %c0_378, %c992] : memref<1x4x1024xf32, #tpu.memory_space<vmem>>, vector<1x2x16xf32>
    %323 = vector.shape_cast %322 : vector<1x2x16xf32> to vector<2x16xf32>
    %324 = vector.shape_cast %321 : vector<2x16xf32> to vector<1x2x16xf32>
    tpu.vector_store %arg3[%c0_377, %c0_378, %c992], %324 {strides = array<i32>} : memref<1x4x1024xf32, #tpu.memory_space<vmem>>, vector<1x2x16xf32>,
    %c3_379 = arith.constant 3 : index
    %c0_380 = arith.constant 0 : index
    %c15_381 = arith.constant 15 : index
    %c0_382 = arith.constant 0 : index
    %325 = vector.load %arg4[%c3_379, %c0_380, %c15_381, %c0_382] : memref<4x2x16x16xf32, #tpu.memory_space<vmem>>, vector<1x2x1x16xf32>
    %326 = vector.shape_cast %325 : vector<1x2x1x16xf32> to vector<2x16xf32>
    %c0_383 = arith.constant 0 : index
    %c0_384 = arith.constant 0 : index
    %c1008 = arith.constant 1008 : index
    %327 = vector.load %arg3[%c0_383, %c0_384, %c1008] : memref<1x4x1024xf32, #tpu.memory_space<vmem>>, vector<1x2x16xf32>
    %328 = vector.shape_cast %327 : vector<1x2x16xf32> to vector<2x16xf32>
    %329 = vector.shape_cast %326 : vector<2x16xf32> to vector<1x2x16xf32>
    tpu.vector_store %arg3[%c0_383, %c0_384, %c1008], %329 {strides = array<i32>} : memref<1x4x1024xf32, #tpu.memory_space<vmem>>, vector<1x2x16xf32>,
    %c0_385 = arith.constant 0 : index
    %c0_386 = arith.constant 0 : index
    %c16_387 = arith.constant 16 : index
    %c0_388 = arith.constant 0 : index
    %330 = vector.load %arg2[%c0_385, %c0_386, %c16_387, %c0_388] : memref<1x4x32x32xf32, #tpu.memory_space<vmem>>, vector<1x4x16x16xf32>
    %331 = vector.shape_cast %330 : vector<1x4x16x16xf32> to vector<4x16x16xf32>
    %c0_389 = arith.constant 0 : index
    %c0_390 = arith.constant 0 : index
    %c0_391 = arith.constant 0 : index
    %c0_392 = arith.constant 0 : index
    %332 = vector.load %arg4[%c0_389, %c0_390, %c0_391, %c0_392] : memref<4x2x16x16xf32, #tpu.memory_space<vmem>>, vector<4x1x16x16xf32>
    %333 = vector.shape_cast %332 : vector<4x1x16x16xf32> to vector<4x16x16xf32>
    %334 = vector.shape_cast %331 : vector<4x16x16xf32> to vector<4x1x16x16xf32>
    tpu.vector_store %arg4[%c0_389, %c0_390, %c0_391, %c0_392], %334 {strides = array<i32>} : memref<4x2x16x16xf32, #tpu.memory_space<vmem>>, vector<4x1x16x16xf32>,
    %c0_393 = arith.constant 0 : index
    %c0_394 = arith.constant 0 : index
    %c16_395 = arith.constant 16 : index
    %c16_396 = arith.constant 16 : index
    %335 = vector.load %arg2[%c0_393, %c0_394, %c16_395, %c16_396] : memref<1x4x32x32xf32, #tpu.memory_space<vmem>>, vector<1x4x16x16xf32>
    %336 = vector.shape_cast %335 : vector<1x4x16x16xf32> to vector<4x16x16xf32>
    %c0_397 = arith.constant 0 : index
    %c1_398 = arith.constant 1 : index
    %c0_399 = arith.constant 0 : index
    %c0_400 = arith.constant 0 : index
    %337 = vector.load %arg4[%c0_397, %c1_398, %c0_399, %c0_400] : memref<4x2x16x16xf32, #tpu.memory_space<vmem>>, vector<4x1x16x16xf32>
    %338 = vector.shape_cast %337 : vector<4x1x16x16xf32> to vector<4x16x16xf32>
    %339 = vector.shape_cast %336 : vector<4x16x16xf32> to vector<4x1x16x16xf32>
    tpu.vector_store %arg4[%c0_397, %c1_398, %c0_399, %c0_400], %339 {strides = array<i32>} : memref<4x2x16x16xf32, #tpu.memory_space<vmem>>, vector<4x1x16x16xf32>,
    %c0_401 = arith.constant 0 : index
    %c0_402 = arith.constant 0 : index
    %c0_403 = arith.constant 0 : index
    %c0_404 = arith.constant 0 : index
    %340 = vector.load %arg4[%c0_401, %c0_402, %c0_403, %c0_404] : memref<4x2x16x16xf32, #tpu.memory_space<vmem>>, vector<1x2x1x16xf32>
    %341 = vector.shape_cast %340 : vector<1x2x1x16xf32> to vector<2x16xf32>
    %c0_405 = arith.constant 0 : index
    %c2_406 = arith.constant 2 : index
    %c0_407 = arith.constant 0 : index
    %342 = vector.load %arg3[%c0_405, %c2_406, %c0_407] : memref<1x4x1024xf32, #tpu.memory_space<vmem>>, vector<1x2x16xf32>
    %343 = vector.shape_cast %342 : vector<1x2x16xf32> to vector<2x16xf32>
    %344 = vector.shape_cast %341 : vector<2x16xf32> to vector<1x2x16xf32>
    tpu.vector_store %arg3[%c0_405, %c2_406, %c0_407], %344 {strides = array<i32>} : memref<1x4x1024xf32, #tpu.memory_space<vmem>>, vector<1x2x16xf32>,
    %c0_408 = arith.constant 0 : index
    %c0_409 = arith.constant 0 : index
    %c1_410 = arith.constant 1 : index
    %c0_411 = arith.constant 0 : index
    %345 = vector.load %arg4[%c0_408, %c0_409, %c1_410, %c0_411] : memref<4x2x16x16xf32, #tpu.memory_space<vmem>>, vector<1x2x1x16xf32>
    %346 = vector.shape_cast %345 : vector<1x2x1x16xf32> to vector<2x16xf32>
    %c0_412 = arith.constant 0 : index
    %c2_413 = arith.constant 2 : index
    %c16_414 = arith.constant 16 : index
    %347 = vector.load %arg3[%c0_412, %c2_413, %c16_414] : memref<1x4x1024xf32, #tpu.memory_space<vmem>>, vector<1x2x16xf32>
    %348 = vector.shape_cast %347 : vector<1x2x16xf32> to vector<2x16xf32>
    %349 = vector.shape_cast %346 : vector<2x16xf32> to vector<1x2x16xf32>
    tpu.vector_store %arg3[%c0_412, %c2_413, %c16_414], %349 {strides = array<i32>} : memref<1x4x1024xf32, #tpu.memory_space<vmem>>, vector<1x2x16xf32>,
    %c0_415 = arith.constant 0 : index
    %c0_416 = arith.constant 0 : index
    %c2_417 = arith.constant 2 : index
    %c0_418 = arith.constant 0 : index
    %350 = vector.load %arg4[%c0_415, %c0_416, %c2_417, %c0_418] : memref<4x2x16x16xf32, #tpu.memory_space<vmem>>, vector<1x2x1x16xf32>
    %351 = vector.shape_cast %350 : vector<1x2x1x16xf32> to vector<2x16xf32>
    %c0_419 = arith.constant 0 : index
    %c2_420 = arith.constant 2 : index
    %c32_421 = arith.constant 32 : index
    %352 = vector.load %arg3[%c0_419, %c2_420, %c32_421] : memref<1x4x1024xf32, #tpu.memory_space<vmem>>, vector<1x2x16xf32>
    %353 = vector.shape_cast %352 : vector<1x2x16xf32> to vector<2x16xf32>
    %354 = vector.shape_cast %351 : vector<2x16xf32> to vector<1x2x16xf32>
    tpu.vector_store %arg3[%c0_419, %c2_420, %c32_421], %354 {strides = array<i32>} : memref<1x4x1024xf32, #tpu.memory_space<vmem>>, vector<1x2x16xf32>,
    %c0_422 = arith.constant 0 : index
    %c0_423 = arith.constant 0 : index
    %c3_424 = arith.constant 3 : index
    %c0_425 = arith.constant 0 : index
    %355 = vector.load %arg4[%c0_422, %c0_423, %c3_424, %c0_425] : memref<4x2x16x16xf32, #tpu.memory_space<vmem>>, vector<1x2x1x16xf32>
    %356 = vector.shape_cast %355 : vector<1x2x1x16xf32> to vector<2x16xf32>
    %c0_426 = arith.constant 0 : index
    %c2_427 = arith.constant 2 : index
    %c48_428 = arith.constant 48 : index
    %357 = vector.load %arg3[%c0_426, %c2_427, %c48_428] : memref<1x4x1024xf32, #tpu.memory_space<vmem>>, vector<1x2x16xf32>
    %358 = vector.shape_cast %357 : vector<1x2x16xf32> to vector<2x16xf32>
    %359 = vector.shape_cast %356 : vector<2x16xf32> to vector<1x2x16xf32>
    tpu.vector_store %arg3[%c0_426, %c2_427, %c48_428], %359 {strides = array<i32>} : memref<1x4x1024xf32, #tpu.memory_space<vmem>>, vector<1x2x16xf32>,
    %c0_429 = arith.constant 0 : index
    %c0_430 = arith.constant 0 : index
    %c4_431 = arith.constant 4 : index
    %c0_432 = arith.constant 0 : index
    %360 = vector.load %arg4[%c0_429, %c0_430, %c4_431, %c0_432] : memref<4x2x16x16xf32, #tpu.memory_space<vmem>>, vector<1x2x1x16xf32>
    %361 = vector.shape_cast %360 : vector<1x2x1x16xf32> to vector<2x16xf32>
    %c0_433 = arith.constant 0 : index
    %c2_434 = arith.constant 2 : index
    %c64_435 = arith.constant 64 : index
    %362 = vector.load %arg3[%c0_433, %c2_434, %c64_435] : memref<1x4x1024xf32, #tpu.memory_space<vmem>>, vector<1x2x16xf32>
    %363 = vector.shape_cast %362 : vector<1x2x16xf32> to vector<2x16xf32>
    %364 = vector.shape_cast %361 : vector<2x16xf32> to vector<1x2x16xf32>
    tpu.vector_store %arg3[%c0_433, %c2_434, %c64_435], %364 {strides = array<i32>} : memref<1x4x1024xf32, #tpu.memory_space<vmem>>, vector<1x2x16xf32>,
    %c0_436 = arith.constant 0 : index
    %c0_437 = arith.constant 0 : index
    %c5_438 = arith.constant 5 : index
    %c0_439 = arith.constant 0 : index
    %365 = vector.load %arg4[%c0_436, %c0_437, %c5_438, %c0_439] : memref<4x2x16x16xf32, #tpu.memory_space<vmem>>, vector<1x2x1x16xf32>
    %366 = vector.shape_cast %365 : vector<1x2x1x16xf32> to vector<2x16xf32>
    %c0_440 = arith.constant 0 : index
    %c2_441 = arith.constant 2 : index
    %c80_442 = arith.constant 80 : index
    %367 = vector.load %arg3[%c0_440, %c2_441, %c80_442] : memref<1x4x1024xf32, #tpu.memory_space<vmem>>, vector<1x2x16xf32>
    %368 = vector.shape_cast %367 : vector<1x2x16xf32> to vector<2x16xf32>
    %369 = vector.shape_cast %366 : vector<2x16xf32> to vector<1x2x16xf32>
    tpu.vector_store %arg3[%c0_440, %c2_441, %c80_442], %369 {strides = array<i32>} : memref<1x4x1024xf32, #tpu.memory_space<vmem>>, vector<1x2x16xf32>,
    %c0_443 = arith.constant 0 : index
    %c0_444 = arith.constant 0 : index
    %c6_445 = arith.constant 6 : index
    %c0_446 = arith.constant 0 : index
    %370 = vector.load %arg4[%c0_443, %c0_444, %c6_445, %c0_446] : memref<4x2x16x16xf32, #tpu.memory_space<vmem>>, vector<1x2x1x16xf32>
    %371 = vector.shape_cast %370 : vector<1x2x1x16xf32> to vector<2x16xf32>
    %c0_447 = arith.constant 0 : index
    %c2_448 = arith.constant 2 : index
    %c96_449 = arith.constant 96 : index
    %372 = vector.load %arg3[%c0_447, %c2_448, %c96_449] : memref<1x4x1024xf32, #tpu.memory_space<vmem>>, vector<1x2x16xf32>
    %373 = vector.shape_cast %372 : vector<1x2x16xf32> to vector<2x16xf32>
    %374 = vector.shape_cast %371 : vector<2x16xf32> to vector<1x2x16xf32>
    tpu.vector_store %arg3[%c0_447, %c2_448, %c96_449], %374 {strides = array<i32>} : memref<1x4x1024xf32, #tpu.memory_space<vmem>>, vector<1x2x16xf32>,
    %c0_450 = arith.constant 0 : index
    %c0_451 = arith.constant 0 : index
    %c7_452 = arith.constant 7 : index
    %c0_453 = arith.constant 0 : index
    %375 = vector.load %arg4[%c0_450, %c0_451, %c7_452, %c0_453] : memref<4x2x16x16xf32, #tpu.memory_space<vmem>>, vector<1x2x1x16xf32>
    %376 = vector.shape_cast %375 : vector<1x2x1x16xf32> to vector<2x16xf32>
    %c0_454 = arith.constant 0 : index
    %c2_455 = arith.constant 2 : index
    %c112_456 = arith.constant 112 : index
    %377 = vector.load %arg3[%c0_454, %c2_455, %c112_456] : memref<1x4x1024xf32, #tpu.memory_space<vmem>>, vector<1x2x16xf32>
    %378 = vector.shape_cast %377 : vector<1x2x16xf32> to vector<2x16xf32>
    %379 = vector.shape_cast %376 : vector<2x16xf32> to vector<1x2x16xf32>
    tpu.vector_store %arg3[%c0_454, %c2_455, %c112_456], %379 {strides = array<i32>} : memref<1x4x1024xf32, #tpu.memory_space<vmem>>, vector<1x2x16xf32>,
    %c0_457 = arith.constant 0 : index
    %c0_458 = arith.constant 0 : index
    %c8_459 = arith.constant 8 : index
    %c0_460 = arith.constant 0 : index
    %380 = vector.load %arg4[%c0_457, %c0_458, %c8_459, %c0_460] : memref<4x2x16x16xf32, #tpu.memory_space<vmem>>, vector<1x2x1x16xf32>
    %381 = vector.shape_cast %380 : vector<1x2x1x16xf32> to vector<2x16xf32>
    %c0_461 = arith.constant 0 : index
    %c2_462 = arith.constant 2 : index
    %c128_463 = arith.constant 128 : index
    %382 = vector.load %arg3[%c0_461, %c2_462, %c128_463] : memref<1x4x1024xf32, #tpu.memory_space<vmem>>, vector<1x2x16xf32>
    %383 = vector.shape_cast %382 : vector<1x2x16xf32> to vector<2x16xf32>
    %384 = vector.shape_cast %381 : vector<2x16xf32> to vector<1x2x16xf32>
    tpu.vector_store %arg3[%c0_461, %c2_462, %c128_463], %384 {strides = array<i32>} : memref<1x4x1024xf32, #tpu.memory_space<vmem>>, vector<1x2x16xf32>,
    %c0_464 = arith.constant 0 : index
    %c0_465 = arith.constant 0 : index
    %c9_466 = arith.constant 9 : index
    %c0_467 = arith.constant 0 : index
    %385 = vector.load %arg4[%c0_464, %c0_465, %c9_466, %c0_467] : memref<4x2x16x16xf32, #tpu.memory_space<vmem>>, vector<1x2x1x16xf32>
    %386 = vector.shape_cast %385 : vector<1x2x1x16xf32> to vector<2x16xf32>
    %c0_468 = arith.constant 0 : index
    %c2_469 = arith.constant 2 : index
    %c144_470 = arith.constant 144 : index
    %387 = vector.load %arg3[%c0_468, %c2_469, %c144_470] : memref<1x4x1024xf32, #tpu.memory_space<vmem>>, vector<1x2x16xf32>
    %388 = vector.shape_cast %387 : vector<1x2x16xf32> to vector<2x16xf32>
    %389 = vector.shape_cast %386 : vector<2x16xf32> to vector<1x2x16xf32>
    tpu.vector_store %arg3[%c0_468, %c2_469, %c144_470], %389 {strides = array<i32>} : memref<1x4x1024xf32, #tpu.memory_space<vmem>>, vector<1x2x16xf32>,
    %c0_471 = arith.constant 0 : index
    %c0_472 = arith.constant 0 : index
    %c10_473 = arith.constant 10 : index
    %c0_474 = arith.constant 0 : index
    %390 = vector.load %arg4[%c0_471, %c0_472, %c10_473, %c0_474] : memref<4x2x16x16xf32, #tpu.memory_space<vmem>>, vector<1x2x1x16xf32>
    %391 = vector.shape_cast %390 : vector<1x2x1x16xf32> to vector<2x16xf32>
    %c0_475 = arith.constant 0 : index
    %c2_476 = arith.constant 2 : index
    %c160_477 = arith.constant 160 : index
    %392 = vector.load %arg3[%c0_475, %c2_476, %c160_477] : memref<1x4x1024xf32, #tpu.memory_space<vmem>>, vector<1x2x16xf32>
    %393 = vector.shape_cast %392 : vector<1x2x16xf32> to vector<2x16xf32>
    %394 = vector.shape_cast %391 : vector<2x16xf32> to vector<1x2x16xf32>
    tpu.vector_store %arg3[%c0_475, %c2_476, %c160_477], %394 {strides = array<i32>} : memref<1x4x1024xf32, #tpu.memory_space<vmem>>, vector<1x2x16xf32>,
    %c0_478 = arith.constant 0 : index
    %c0_479 = arith.constant 0 : index
    %c11_480 = arith.constant 11 : index
    %c0_481 = arith.constant 0 : index
    %395 = vector.load %arg4[%c0_478, %c0_479, %c11_480, %c0_481] : memref<4x2x16x16xf32, #tpu.memory_space<vmem>>, vector<1x2x1x16xf32>
    %396 = vector.shape_cast %395 : vector<1x2x1x16xf32> to vector<2x16xf32>
    %c0_482 = arith.constant 0 : index
    %c2_483 = arith.constant 2 : index
    %c176_484 = arith.constant 176 : index
    %397 = vector.load %arg3[%c0_482, %c2_483, %c176_484] : memref<1x4x1024xf32, #tpu.memory_space<vmem>>, vector<1x2x16xf32>
    %398 = vector.shape_cast %397 : vector<1x2x16xf32> to vector<2x16xf32>
    %399 = vector.shape_cast %396 : vector<2x16xf32> to vector<1x2x16xf32>
    tpu.vector_store %arg3[%c0_482, %c2_483, %c176_484], %399 {strides = array<i32>} : memref<1x4x1024xf32, #tpu.memory_space<vmem>>, vector<1x2x16xf32>,
    %c0_485 = arith.constant 0 : index
    %c0_486 = arith.constant 0 : index
    %c12_487 = arith.constant 12 : index
    %c0_488 = arith.constant 0 : index
    %400 = vector.load %arg4[%c0_485, %c0_486, %c12_487, %c0_488] : memref<4x2x16x16xf32, #tpu.memory_space<vmem>>, vector<1x2x1x16xf32>
    %401 = vector.shape_cast %400 : vector<1x2x1x16xf32> to vector<2x16xf32>
    %c0_489 = arith.constant 0 : index
    %c2_490 = arith.constant 2 : index
    %c192_491 = arith.constant 192 : index
    %402 = vector.load %arg3[%c0_489, %c2_490, %c192_491] : memref<1x4x1024xf32, #tpu.memory_space<vmem>>, vector<1x2x16xf32>
    %403 = vector.shape_cast %402 : vector<1x2x16xf32> to vector<2x16xf32>
    %404 = vector.shape_cast %401 : vector<2x16xf32> to vector<1x2x16xf32>
    tpu.vector_store %arg3[%c0_489, %c2_490, %c192_491], %404 {strides = array<i32>} : memref<1x4x1024xf32, #tpu.memory_space<vmem>>, vector<1x2x16xf32>,
    %c0_492 = arith.constant 0 : index
    %c0_493 = arith.constant 0 : index
    %c13_494 = arith.constant 13 : index
    %c0_495 = arith.constant 0 : index
    %405 = vector.load %arg4[%c0_492, %c0_493, %c13_494, %c0_495] : memref<4x2x16x16xf32, #tpu.memory_space<vmem>>, vector<1x2x1x16xf32>
    %406 = vector.shape_cast %405 : vector<1x2x1x16xf32> to vector<2x16xf32>
    %c0_496 = arith.constant 0 : index
    %c2_497 = arith.constant 2 : index
    %c208_498 = arith.constant 208 : index
    %407 = vector.load %arg3[%c0_496, %c2_497, %c208_498] : memref<1x4x1024xf32, #tpu.memory_space<vmem>>, vector<1x2x16xf32>
    %408 = vector.shape_cast %407 : vector<1x2x16xf32> to vector<2x16xf32>
    %409 = vector.shape_cast %406 : vector<2x16xf32> to vector<1x2x16xf32>
    tpu.vector_store %arg3[%c0_496, %c2_497, %c208_498], %409 {strides = array<i32>} : memref<1x4x1024xf32, #tpu.memory_space<vmem>>, vector<1x2x16xf32>,
    %c0_499 = arith.constant 0 : index
    %c0_500 = arith.constant 0 : index
    %c14_501 = arith.constant 14 : index
    %c0_502 = arith.constant 0 : index
    %410 = vector.load %arg4[%c0_499, %c0_500, %c14_501, %c0_502] : memref<4x2x16x16xf32, #tpu.memory_space<vmem>>, vector<1x2x1x16xf32>
    %411 = vector.shape_cast %410 : vector<1x2x1x16xf32> to vector<2x16xf32>
    %c0_503 = arith.constant 0 : index
    %c2_504 = arith.constant 2 : index
    %c224_505 = arith.constant 224 : index
    %412 = vector.load %arg3[%c0_503, %c2_504, %c224_505] : memref<1x4x1024xf32, #tpu.memory_space<vmem>>, vector<1x2x16xf32>
    %413 = vector.shape_cast %412 : vector<1x2x16xf32> to vector<2x16xf32>
    %414 = vector.shape_cast %411 : vector<2x16xf32> to vector<1x2x16xf32>
    tpu.vector_store %arg3[%c0_503, %c2_504, %c224_505], %414 {strides = array<i32>} : memref<1x4x1024xf32, #tpu.memory_space<vmem>>, vector<1x2x16xf32>,
    %c0_506 = arith.constant 0 : index
    %c0_507 = arith.constant 0 : index
    %c15_508 = arith.constant 15 : index
    %c0_509 = arith.constant 0 : index
    %415 = vector.load %arg4[%c0_506, %c0_507, %c15_508, %c0_509] : memref<4x2x16x16xf32, #tpu.memory_space<vmem>>, vector<1x2x1x16xf32>
    %416 = vector.shape_cast %415 : vector<1x2x1x16xf32> to vector<2x16xf32>
    %c0_510 = arith.constant 0 : index
    %c2_511 = arith.constant 2 : index
    %c240_512 = arith.constant 240 : index
    %417 = vector.load %arg3[%c0_510, %c2_511, %c240_512] : memref<1x4x1024xf32, #tpu.memory_space<vmem>>, vector<1x2x16xf32>
    %418 = vector.shape_cast %417 : vector<1x2x16xf32> to vector<2x16xf32>
    %419 = vector.shape_cast %416 : vector<2x16xf32> to vector<1x2x16xf32>
    tpu.vector_store %arg3[%c0_510, %c2_511, %c240_512], %419 {strides = array<i32>} : memref<1x4x1024xf32, #tpu.memory_space<vmem>>, vector<1x2x16xf32>,
    %c1_513 = arith.constant 1 : index
    %c0_514 = arith.constant 0 : index
    %c0_515 = arith.constant 0 : index
    %c0_516 = arith.constant 0 : index
    %420 = vector.load %arg4[%c1_513, %c0_514, %c0_515, %c0_516] : memref<4x2x16x16xf32, #tpu.memory_space<vmem>>, vector<1x2x1x16xf32>
    %421 = vector.shape_cast %420 : vector<1x2x1x16xf32> to vector<2x16xf32>
    %c0_517 = arith.constant 0 : index
    %c2_518 = arith.constant 2 : index
    %c256_519 = arith.constant 256 : index
    %422 = vector.load %arg3[%c0_517, %c2_518, %c256_519] : memref<1x4x1024xf32, #tpu.memory_space<vmem>>, vector<1x2x16xf32>
    %423 = vector.shape_cast %422 : vector<1x2x16xf32> to vector<2x16xf32>
    %424 = vector.shape_cast %421 : vector<2x16xf32> to vector<1x2x16xf32>
    tpu.vector_store %arg3[%c0_517, %c2_518, %c256_519], %424 {strides = array<i32>} : memref<1x4x1024xf32, #tpu.memory_space<vmem>>, vector<1x2x16xf32>,
    %c1_520 = arith.constant 1 : index
    %c0_521 = arith.constant 0 : index
    %c1_522 = arith.constant 1 : index
    %c0_523 = arith.constant 0 : index
    %425 = vector.load %arg4[%c1_520, %c0_521, %c1_522, %c0_523] : memref<4x2x16x16xf32, #tpu.memory_space<vmem>>, vector<1x2x1x16xf32>
    %426 = vector.shape_cast %425 : vector<1x2x1x16xf32> to vector<2x16xf32>
    %c0_524 = arith.constant 0 : index
    %c2_525 = arith.constant 2 : index
    %c272_526 = arith.constant 272 : index
    %427 = vector.load %arg3[%c0_524, %c2_525, %c272_526] : memref<1x4x1024xf32, #tpu.memory_space<vmem>>, vector<1x2x16xf32>
    %428 = vector.shape_cast %427 : vector<1x2x16xf32> to vector<2x16xf32>
    %429 = vector.shape_cast %426 : vector<2x16xf32> to vector<1x2x16xf32>
    tpu.vector_store %arg3[%c0_524, %c2_525, %c272_526], %429 {strides = array<i32>} : memref<1x4x1024xf32, #tpu.memory_space<vmem>>, vector<1x2x16xf32>,
    %c1_527 = arith.constant 1 : index
    %c0_528 = arith.constant 0 : index
    %c2_529 = arith.constant 2 : index
    %c0_530 = arith.constant 0 : index
    %430 = vector.load %arg4[%c1_527, %c0_528, %c2_529, %c0_530] : memref<4x2x16x16xf32, #tpu.memory_space<vmem>>, vector<1x2x1x16xf32>
    %431 = vector.shape_cast %430 : vector<1x2x1x16xf32> to vector<2x16xf32>
    %c0_531 = arith.constant 0 : index
    %c2_532 = arith.constant 2 : index
    %c288_533 = arith.constant 288 : index
    %432 = vector.load %arg3[%c0_531, %c2_532, %c288_533] : memref<1x4x1024xf32, #tpu.memory_space<vmem>>, vector<1x2x16xf32>
    %433 = vector.shape_cast %432 : vector<1x2x16xf32> to vector<2x16xf32>
    %434 = vector.shape_cast %431 : vector<2x16xf32> to vector<1x2x16xf32>
    tpu.vector_store %arg3[%c0_531, %c2_532, %c288_533], %434 {strides = array<i32>} : memref<1x4x1024xf32, #tpu.memory_space<vmem>>, vector<1x2x16xf32>,
    %c1_534 = arith.constant 1 : index
    %c0_535 = arith.constant 0 : index
    %c3_536 = arith.constant 3 : index
    %c0_537 = arith.constant 0 : index
    %435 = vector.load %arg4[%c1_534, %c0_535, %c3_536, %c0_537] : memref<4x2x16x16xf32, #tpu.memory_space<vmem>>, vector<1x2x1x16xf32>
    %436 = vector.shape_cast %435 : vector<1x2x1x16xf32> to vector<2x16xf32>
    %c0_538 = arith.constant 0 : index
    %c2_539 = arith.constant 2 : index
    %c304_540 = arith.constant 304 : index
    %437 = vector.load %arg3[%c0_538, %c2_539, %c304_540] : memref<1x4x1024xf32, #tpu.memory_space<vmem>>, vector<1x2x16xf32>
    %438 = vector.shape_cast %437 : vector<1x2x16xf32> to vector<2x16xf32>
    %439 = vector.shape_cast %436 : vector<2x16xf32> to vector<1x2x16xf32>
    tpu.vector_store %arg3[%c0_538, %c2_539, %c304_540], %439 {strides = array<i32>} : memref<1x4x1024xf32, #tpu.memory_space<vmem>>, vector<1x2x16xf32>,
    %c1_541 = arith.constant 1 : index
    %c0_542 = arith.constant 0 : index
    %c4_543 = arith.constant 4 : index
    %c0_544 = arith.constant 0 : index
    %440 = vector.load %arg4[%c1_541, %c0_542, %c4_543, %c0_544] : memref<4x2x16x16xf32, #tpu.memory_space<vmem>>, vector<1x2x1x16xf32>
    %441 = vector.shape_cast %440 : vector<1x2x1x16xf32> to vector<2x16xf32>
    %c0_545 = arith.constant 0 : index
    %c2_546 = arith.constant 2 : index
    %c320_547 = arith.constant 320 : index
    %442 = vector.load %arg3[%c0_545, %c2_546, %c320_547] : memref<1x4x1024xf32, #tpu.memory_space<vmem>>, vector<1x2x16xf32>
    %443 = vector.shape_cast %442 : vector<1x2x16xf32> to vector<2x16xf32>
    %444 = vector.shape_cast %441 : vector<2x16xf32> to vector<1x2x16xf32>
    tpu.vector_store %arg3[%c0_545, %c2_546, %c320_547], %444 {strides = array<i32>} : memref<1x4x1024xf32, #tpu.memory_space<vmem>>, vector<1x2x16xf32>,
    %c1_548 = arith.constant 1 : index
    %c0_549 = arith.constant 0 : index
    %c5_550 = arith.constant 5 : index
    %c0_551 = arith.constant 0 : index
    %445 = vector.load %arg4[%c1_548, %c0_549, %c5_550, %c0_551] : memref<4x2x16x16xf32, #tpu.memory_space<vmem>>, vector<1x2x1x16xf32>
    %446 = vector.shape_cast %445 : vector<1x2x1x16xf32> to vector<2x16xf32>
    %c0_552 = arith.constant 0 : index
    %c2_553 = arith.constant 2 : index
    %c336_554 = arith.constant 336 : index
    %447 = vector.load %arg3[%c0_552, %c2_553, %c336_554] : memref<1x4x1024xf32, #tpu.memory_space<vmem>>, vector<1x2x16xf32>
    %448 = vector.shape_cast %447 : vector<1x2x16xf32> to vector<2x16xf32>
    %449 = vector.shape_cast %446 : vector<2x16xf32> to vector<1x2x16xf32>
    tpu.vector_store %arg3[%c0_552, %c2_553, %c336_554], %449 {strides = array<i32>} : memref<1x4x1024xf32, #tpu.memory_space<vmem>>, vector<1x2x16xf32>,
    %c1_555 = arith.constant 1 : index
    %c0_556 = arith.constant 0 : index
    %c6_557 = arith.constant 6 : index
    %c0_558 = arith.constant 0 : index
    %450 = vector.load %arg4[%c1_555, %c0_556, %c6_557, %c0_558] : memref<4x2x16x16xf32, #tpu.memory_space<vmem>>, vector<1x2x1x16xf32>
    %451 = vector.shape_cast %450 : vector<1x2x1x16xf32> to vector<2x16xf32>
    %c0_559 = arith.constant 0 : index
    %c2_560 = arith.constant 2 : index
    %c352_561 = arith.constant 352 : index
    %452 = vector.load %arg3[%c0_559, %c2_560, %c352_561] : memref<1x4x1024xf32, #tpu.memory_space<vmem>>, vector<1x2x16xf32>
    %453 = vector.shape_cast %452 : vector<1x2x16xf32> to vector<2x16xf32>
    %454 = vector.shape_cast %451 : vector<2x16xf32> to vector<1x2x16xf32>
    tpu.vector_store %arg3[%c0_559, %c2_560, %c352_561], %454 {strides = array<i32>} : memref<1x4x1024xf32, #tpu.memory_space<vmem>>, vector<1x2x16xf32>,
    %c1_562 = arith.constant 1 : index
    %c0_563 = arith.constant 0 : index
    %c7_564 = arith.constant 7 : index
    %c0_565 = arith.constant 0 : index
    %455 = vector.load %arg4[%c1_562, %c0_563, %c7_564, %c0_565] : memref<4x2x16x16xf32, #tpu.memory_space<vmem>>, vector<1x2x1x16xf32>
    %456 = vector.shape_cast %455 : vector<1x2x1x16xf32> to vector<2x16xf32>
    %c0_566 = arith.constant 0 : index
    %c2_567 = arith.constant 2 : index
    %c368_568 = arith.constant 368 : index
    %457 = vector.load %arg3[%c0_566, %c2_567, %c368_568] : memref<1x4x1024xf32, #tpu.memory_space<vmem>>, vector<1x2x16xf32>
    %458 = vector.shape_cast %457 : vector<1x2x16xf32> to vector<2x16xf32>
    %459 = vector.shape_cast %456 : vector<2x16xf32> to vector<1x2x16xf32>
    tpu.vector_store %arg3[%c0_566, %c2_567, %c368_568], %459 {strides = array<i32>} : memref<1x4x1024xf32, #tpu.memory_space<vmem>>, vector<1x2x16xf32>,
    %c1_569 = arith.constant 1 : index
    %c0_570 = arith.constant 0 : index
    %c8_571 = arith.constant 8 : index
    %c0_572 = arith.constant 0 : index
    %460 = vector.load %arg4[%c1_569, %c0_570, %c8_571, %c0_572] : memref<4x2x16x16xf32, #tpu.memory_space<vmem>>, vector<1x2x1x16xf32>
    %461 = vector.shape_cast %460 : vector<1x2x1x16xf32> to vector<2x16xf32>
    %c0_573 = arith.constant 0 : index
    %c2_574 = arith.constant 2 : index
    %c384_575 = arith.constant 384 : index
    %462 = vector.load %arg3[%c0_573, %c2_574, %c384_575] : memref<1x4x1024xf32, #tpu.memory_space<vmem>>, vector<1x2x16xf32>
    %463 = vector.shape_cast %462 : vector<1x2x16xf32> to vector<2x16xf32>
    %464 = vector.shape_cast %461 : vector<2x16xf32> to vector<1x2x16xf32>
    tpu.vector_store %arg3[%c0_573, %c2_574, %c384_575], %464 {strides = array<i32>} : memref<1x4x1024xf32, #tpu.memory_space<vmem>>, vector<1x2x16xf32>,
    %c1_576 = arith.constant 1 : index
    %c0_577 = arith.constant 0 : index
    %c9_578 = arith.constant 9 : index
    %c0_579 = arith.constant 0 : index
    %465 = vector.load %arg4[%c1_576, %c0_577, %c9_578, %c0_579] : memref<4x2x16x16xf32, #tpu.memory_space<vmem>>, vector<1x2x1x16xf32>
    %466 = vector.shape_cast %465 : vector<1x2x1x16xf32> to vector<2x16xf32>
    %c0_580 = arith.constant 0 : index
    %c2_581 = arith.constant 2 : index
    %c400_582 = arith.constant 400 : index
    %467 = vector.load %arg3[%c0_580, %c2_581, %c400_582] : memref<1x4x1024xf32, #tpu.memory_space<vmem>>, vector<1x2x16xf32>
    %468 = vector.shape_cast %467 : vector<1x2x16xf32> to vector<2x16xf32>
    %469 = vector.shape_cast %466 : vector<2x16xf32> to vector<1x2x16xf32>
    tpu.vector_store %arg3[%c0_580, %c2_581, %c400_582], %469 {strides = array<i32>} : memref<1x4x1024xf32, #tpu.memory_space<vmem>>, vector<1x2x16xf32>,
    %c1_583 = arith.constant 1 : index
    %c0_584 = arith.constant 0 : index
    %c10_585 = arith.constant 10 : index
    %c0_586 = arith.constant 0 : index
    %470 = vector.load %arg4[%c1_583, %c0_584, %c10_585, %c0_586] : memref<4x2x16x16xf32, #tpu.memory_space<vmem>>, vector<1x2x1x16xf32>
    %471 = vector.shape_cast %470 : vector<1x2x1x16xf32> to vector<2x16xf32>
    %c0_587 = arith.constant 0 : index
    %c2_588 = arith.constant 2 : index
    %c416_589 = arith.constant 416 : index
    %472 = vector.load %arg3[%c0_587, %c2_588, %c416_589] : memref<1x4x1024xf32, #tpu.memory_space<vmem>>, vector<1x2x16xf32>
    %473 = vector.shape_cast %472 : vector<1x2x16xf32> to vector<2x16xf32>
    %474 = vector.shape_cast %471 : vector<2x16xf32> to vector<1x2x16xf32>
    tpu.vector_store %arg3[%c0_587, %c2_588, %c416_589], %474 {strides = array<i32>} : memref<1x4x1024xf32, #tpu.memory_space<vmem>>, vector<1x2x16xf32>,
    %c1_590 = arith.constant 1 : index
    %c0_591 = arith.constant 0 : index
    %c11_592 = arith.constant 11 : index
    %c0_593 = arith.constant 0 : index
    %475 = vector.load %arg4[%c1_590, %c0_591, %c11_592, %c0_593] : memref<4x2x16x16xf32, #tpu.memory_space<vmem>>, vector<1x2x1x16xf32>
    %476 = vector.shape_cast %475 : vector<1x2x1x16xf32> to vector<2x16xf32>
    %c0_594 = arith.constant 0 : index
    %c2_595 = arith.constant 2 : index
    %c432_596 = arith.constant 432 : index
    %477 = vector.load %arg3[%c0_594, %c2_595, %c432_596] : memref<1x4x1024xf32, #tpu.memory_space<vmem>>, vector<1x2x16xf32>
    %478 = vector.shape_cast %477 : vector<1x2x16xf32> to vector<2x16xf32>
    %479 = vector.shape_cast %476 : vector<2x16xf32> to vector<1x2x16xf32>
    tpu.vector_store %arg3[%c0_594, %c2_595, %c432_596], %479 {strides = array<i32>} : memref<1x4x1024xf32, #tpu.memory_space<vmem>>, vector<1x2x16xf32>,
    %c1_597 = arith.constant 1 : index
    %c0_598 = arith.constant 0 : index
    %c12_599 = arith.constant 12 : index
    %c0_600 = arith.constant 0 : index
    %480 = vector.load %arg4[%c1_597, %c0_598, %c12_599, %c0_600] : memref<4x2x16x16xf32, #tpu.memory_space<vmem>>, vector<1x2x1x16xf32>
    %481 = vector.shape_cast %480 : vector<1x2x1x16xf32> to vector<2x16xf32>
    %c0_601 = arith.constant 0 : index
    %c2_602 = arith.constant 2 : index
    %c448_603 = arith.constant 448 : index
    %482 = vector.load %arg3[%c0_601, %c2_602, %c448_603] : memref<1x4x1024xf32, #tpu.memory_space<vmem>>, vector<1x2x16xf32>
    %483 = vector.shape_cast %482 : vector<1x2x16xf32> to vector<2x16xf32>
    %484 = vector.shape_cast %481 : vector<2x16xf32> to vector<1x2x16xf32>
    tpu.vector_store %arg3[%c0_601, %c2_602, %c448_603], %484 {strides = array<i32>} : memref<1x4x1024xf32, #tpu.memory_space<vmem>>, vector<1x2x16xf32>,
    %c1_604 = arith.constant 1 : index
    %c0_605 = arith.constant 0 : index
    %c13_606 = arith.constant 13 : index
    %c0_607 = arith.constant 0 : index
    %485 = vector.load %arg4[%c1_604, %c0_605, %c13_606, %c0_607] : memref<4x2x16x16xf32, #tpu.memory_space<vmem>>, vector<1x2x1x16xf32>
    %486 = vector.shape_cast %485 : vector<1x2x1x16xf32> to vector<2x16xf32>
    %c0_608 = arith.constant 0 : index
    %c2_609 = arith.constant 2 : index
    %c464_610 = arith.constant 464 : index
    %487 = vector.load %arg3[%c0_608, %c2_609, %c464_610] : memref<1x4x1024xf32, #tpu.memory_space<vmem>>, vector<1x2x16xf32>
    %488 = vector.shape_cast %487 : vector<1x2x16xf32> to vector<2x16xf32>
    %489 = vector.shape_cast %486 : vector<2x16xf32> to vector<1x2x16xf32>
    tpu.vector_store %arg3[%c0_608, %c2_609, %c464_610], %489 {strides = array<i32>} : memref<1x4x1024xf32, #tpu.memory_space<vmem>>, vector<1x2x16xf32>,
    %c1_611 = arith.constant 1 : index
    %c0_612 = arith.constant 0 : index
    %c14_613 = arith.constant 14 : index
    %c0_614 = arith.constant 0 : index
    %490 = vector.load %arg4[%c1_611, %c0_612, %c14_613, %c0_614] : memref<4x2x16x16xf32, #tpu.memory_space<vmem>>, vector<1x2x1x16xf32>
    %491 = vector.shape_cast %490 : vector<1x2x1x16xf32> to vector<2x16xf32>
    %c0_615 = arith.constant 0 : index
    %c2_616 = arith.constant 2 : index
    %c480_617 = arith.constant 480 : index
    %492 = vector.load %arg3[%c0_615, %c2_616, %c480_617] : memref<1x4x1024xf32, #tpu.memory_space<vmem>>, vector<1x2x16xf32>
    %493 = vector.shape_cast %492 : vector<1x2x16xf32> to vector<2x16xf32>
    %494 = vector.shape_cast %491 : vector<2x16xf32> to vector<1x2x16xf32>
    tpu.vector_store %arg3[%c0_615, %c2_616, %c480_617], %494 {strides = array<i32>} : memref<1x4x1024xf32, #tpu.memory_space<vmem>>, vector<1x2x16xf32>,
    %c1_618 = arith.constant 1 : index
    %c0_619 = arith.constant 0 : index
    %c15_620 = arith.constant 15 : index
    %c0_621 = arith.constant 0 : index
    %495 = vector.load %arg4[%c1_618, %c0_619, %c15_620, %c0_621] : memref<4x2x16x16xf32, #tpu.memory_space<vmem>>, vector<1x2x1x16xf32>
    %496 = vector.shape_cast %495 : vector<1x2x1x16xf32> to vector<2x16xf32>
    %c0_622 = arith.constant 0 : index
    %c2_623 = arith.constant 2 : index
    %c496_624 = arith.constant 496 : index
    %497 = vector.load %arg3[%c0_622, %c2_623, %c496_624] : memref<1x4x1024xf32, #tpu.memory_space<vmem>>, vector<1x2x16xf32>
    %498 = vector.shape_cast %497 : vector<1x2x16xf32> to vector<2x16xf32>
    %499 = vector.shape_cast %496 : vector<2x16xf32> to vector<1x2x16xf32>
    tpu.vector_store %arg3[%c0_622, %c2_623, %c496_624], %499 {strides = array<i32>} : memref<1x4x1024xf32, #tpu.memory_space<vmem>>, vector<1x2x16xf32>,
    %c2_625 = arith.constant 2 : index
    %c0_626 = arith.constant 0 : index
    %c0_627 = arith.constant 0 : index
    %c0_628 = arith.constant 0 : index
    %500 = vector.load %arg4[%c2_625, %c0_626, %c0_627, %c0_628] : memref<4x2x16x16xf32, #tpu.memory_space<vmem>>, vector<1x2x1x16xf32>
    %501 = vector.shape_cast %500 : vector<1x2x1x16xf32> to vector<2x16xf32>
    %c0_629 = arith.constant 0 : index
    %c2_630 = arith.constant 2 : index
    %c512_631 = arith.constant 512 : index
    %502 = vector.load %arg3[%c0_629, %c2_630, %c512_631] : memref<1x4x1024xf32, #tpu.memory_space<vmem>>, vector<1x2x16xf32>
    %503 = vector.shape_cast %502 : vector<1x2x16xf32> to vector<2x16xf32>
    %504 = vector.shape_cast %501 : vector<2x16xf32> to vector<1x2x16xf32>
    tpu.vector_store %arg3[%c0_629, %c2_630, %c512_631], %504 {strides = array<i32>} : memref<1x4x1024xf32, #tpu.memory_space<vmem>>, vector<1x2x16xf32>,
    %c2_632 = arith.constant 2 : index
    %c0_633 = arith.constant 0 : index
    %c1_634 = arith.constant 1 : index
    %c0_635 = arith.constant 0 : index
    %505 = vector.load %arg4[%c2_632, %c0_633, %c1_634, %c0_635] : memref<4x2x16x16xf32, #tpu.memory_space<vmem>>, vector<1x2x1x16xf32>
    %506 = vector.shape_cast %505 : vector<1x2x1x16xf32> to vector<2x16xf32>
    %c0_636 = arith.constant 0 : index
    %c2_637 = arith.constant 2 : index
    %c528_638 = arith.constant 528 : index
    %507 = vector.load %arg3[%c0_636, %c2_637, %c528_638] : memref<1x4x1024xf32, #tpu.memory_space<vmem>>, vector<1x2x16xf32>
    %508 = vector.shape_cast %507 : vector<1x2x16xf32> to vector<2x16xf32>
    %509 = vector.shape_cast %506 : vector<2x16xf32> to vector<1x2x16xf32>
    tpu.vector_store %arg3[%c0_636, %c2_637, %c528_638], %509 {strides = array<i32>} : memref<1x4x1024xf32, #tpu.memory_space<vmem>>, vector<1x2x16xf32>,
    %c2_639 = arith.constant 2 : index
    %c0_640 = arith.constant 0 : index
    %c2_641 = arith.constant 2 : index
    %c0_642 = arith.constant 0 : index
    %510 = vector.load %arg4[%c2_639, %c0_640, %c2_641, %c0_642] : memref<4x2x16x16xf32, #tpu.memory_space<vmem>>, vector<1x2x1x16xf32>
    %511 = vector.shape_cast %510 : vector<1x2x1x16xf32> to vector<2x16xf32>
    %c0_643 = arith.constant 0 : index
    %c2_644 = arith.constant 2 : index
    %c544_645 = arith.constant 544 : index
    %512 = vector.load %arg3[%c0_643, %c2_644, %c544_645] : memref<1x4x1024xf32, #tpu.memory_space<vmem>>, vector<1x2x16xf32>
    %513 = vector.shape_cast %512 : vector<1x2x16xf32> to vector<2x16xf32>
    %514 = vector.shape_cast %511 : vector<2x16xf32> to vector<1x2x16xf32>
    tpu.vector_store %arg3[%c0_643, %c2_644, %c544_645], %514 {strides = array<i32>} : memref<1x4x1024xf32, #tpu.memory_space<vmem>>, vector<1x2x16xf32>,
    %c2_646 = arith.constant 2 : index
    %c0_647 = arith.constant 0 : index
    %c3_648 = arith.constant 3 : index
    %c0_649 = arith.constant 0 : index
    %515 = vector.load %arg4[%c2_646, %c0_647, %c3_648, %c0_649] : memref<4x2x16x16xf32, #tpu.memory_space<vmem>>, vector<1x2x1x16xf32>
    %516 = vector.shape_cast %515 : vector<1x2x1x16xf32> to vector<2x16xf32>
    %c0_650 = arith.constant 0 : index
    %c2_651 = arith.constant 2 : index
    %c560_652 = arith.constant 560 : index
    %517 = vector.load %arg3[%c0_650, %c2_651, %c560_652] : memref<1x4x1024xf32, #tpu.memory_space<vmem>>, vector<1x2x16xf32>
    %518 = vector.shape_cast %517 : vector<1x2x16xf32> to vector<2x16xf32>
    %519 = vector.shape_cast %516 : vector<2x16xf32> to vector<1x2x16xf32>
    tpu.vector_store %arg3[%c0_650, %c2_651, %c560_652], %519 {strides = array<i32>} : memref<1x4x1024xf32, #tpu.memory_space<vmem>>, vector<1x2x16xf32>,
    %c2_653 = arith.constant 2 : index
    %c0_654 = arith.constant 0 : index
    %c4_655 = arith.constant 4 : index
    %c0_656 = arith.constant 0 : index
    %520 = vector.load %arg4[%c2_653, %c0_654, %c4_655, %c0_656] : memref<4x2x16x16xf32, #tpu.memory_space<vmem>>, vector<1x2x1x16xf32>
    %521 = vector.shape_cast %520 : vector<1x2x1x16xf32> to vector<2x16xf32>
    %c0_657 = arith.constant 0 : index
    %c2_658 = arith.constant 2 : index
    %c576_659 = arith.constant 576 : index
    %522 = vector.load %arg3[%c0_657, %c2_658, %c576_659] : memref<1x4x1024xf32, #tpu.memory_space<vmem>>, vector<1x2x16xf32>
    %523 = vector.shape_cast %522 : vector<1x2x16xf32> to vector<2x16xf32>
    %524 = vector.shape_cast %521 : vector<2x16xf32> to vector<1x2x16xf32>
    tpu.vector_store %arg3[%c0_657, %c2_658, %c576_659], %524 {strides = array<i32>} : memref<1x4x1024xf32, #tpu.memory_space<vmem>>, vector<1x2x16xf32>,
    %c2_660 = arith.constant 2 : index
    %c0_661 = arith.constant 0 : index
    %c5_662 = arith.constant 5 : index
    %c0_663 = arith.constant 0 : index
    %525 = vector.load %arg4[%c2_660, %c0_661, %c5_662, %c0_663] : memref<4x2x16x16xf32, #tpu.memory_space<vmem>>, vector<1x2x1x16xf32>
    %526 = vector.shape_cast %525 : vector<1x2x1x16xf32> to vector<2x16xf32>
    %c0_664 = arith.constant 0 : index
    %c2_665 = arith.constant 2 : index
    %c592_666 = arith.constant 592 : index
    %527 = vector.load %arg3[%c0_664, %c2_665, %c592_666] : memref<1x4x1024xf32, #tpu.memory_space<vmem>>, vector<1x2x16xf32>
    %528 = vector.shape_cast %527 : vector<1x2x16xf32> to vector<2x16xf32>
    %529 = vector.shape_cast %526 : vector<2x16xf32> to vector<1x2x16xf32>
    tpu.vector_store %arg3[%c0_664, %c2_665, %c592_666], %529 {strides = array<i32>} : memref<1x4x1024xf32, #tpu.memory_space<vmem>>, vector<1x2x16xf32>,
    %c2_667 = arith.constant 2 : index
    %c0_668 = arith.constant 0 : index
    %c6_669 = arith.constant 6 : index
    %c0_670 = arith.constant 0 : index
    %530 = vector.load %arg4[%c2_667, %c0_668, %c6_669, %c0_670] : memref<4x2x16x16xf32, #tpu.memory_space<vmem>>, vector<1x2x1x16xf32>
    %531 = vector.shape_cast %530 : vector<1x2x1x16xf32> to vector<2x16xf32>
    %c0_671 = arith.constant 0 : index
    %c2_672 = arith.constant 2 : index
    %c608_673 = arith.constant 608 : index
    %532 = vector.load %arg3[%c0_671, %c2_672, %c608_673] : memref<1x4x1024xf32, #tpu.memory_space<vmem>>, vector<1x2x16xf32>
    %533 = vector.shape_cast %532 : vector<1x2x16xf32> to vector<2x16xf32>
    %534 = vector.shape_cast %531 : vector<2x16xf32> to vector<1x2x16xf32>
    tpu.vector_store %arg3[%c0_671, %c2_672, %c608_673], %534 {strides = array<i32>} : memref<1x4x1024xf32, #tpu.memory_space<vmem>>, vector<1x2x16xf32>,
    %c2_674 = arith.constant 2 : index
    %c0_675 = arith.constant 0 : index
    %c7_676 = arith.constant 7 : index
    %c0_677 = arith.constant 0 : index
    %535 = vector.load %arg4[%c2_674, %c0_675, %c7_676, %c0_677] : memref<4x2x16x16xf32, #tpu.memory_space<vmem>>, vector<1x2x1x16xf32>
    %536 = vector.shape_cast %535 : vector<1x2x1x16xf32> to vector<2x16xf32>
    %c0_678 = arith.constant 0 : index
    %c2_679 = arith.constant 2 : index
    %c624_680 = arith.constant 624 : index
    %537 = vector.load %arg3[%c0_678, %c2_679, %c624_680] : memref<1x4x1024xf32, #tpu.memory_space<vmem>>, vector<1x2x16xf32>
    %538 = vector.shape_cast %537 : vector<1x2x16xf32> to vector<2x16xf32>
    %539 = vector.shape_cast %536 : vector<2x16xf32> to vector<1x2x16xf32>
    tpu.vector_store %arg3[%c0_678, %c2_679, %c624_680], %539 {strides = array<i32>} : memref<1x4x1024xf32, #tpu.memory_space<vmem>>, vector<1x2x16xf32>,
    %c2_681 = arith.constant 2 : index
    %c0_682 = arith.constant 0 : index
    %c8_683 = arith.constant 8 : index
    %c0_684 = arith.constant 0 : index
    %540 = vector.load %arg4[%c2_681, %c0_682, %c8_683, %c0_684] : memref<4x2x16x16xf32, #tpu.memory_space<vmem>>, vector<1x2x1x16xf32>
    %541 = vector.shape_cast %540 : vector<1x2x1x16xf32> to vector<2x16xf32>
    %c0_685 = arith.constant 0 : index
    %c2_686 = arith.constant 2 : index
    %c640_687 = arith.constant 640 : index
    %542 = vector.load %arg3[%c0_685, %c2_686, %c640_687] : memref<1x4x1024xf32, #tpu.memory_space<vmem>>, vector<1x2x16xf32>
    %543 = vector.shape_cast %542 : vector<1x2x16xf32> to vector<2x16xf32>
    %544 = vector.shape_cast %541 : vector<2x16xf32> to vector<1x2x16xf32>
    tpu.vector_store %arg3[%c0_685, %c2_686, %c640_687], %544 {strides = array<i32>} : memref<1x4x1024xf32, #tpu.memory_space<vmem>>, vector<1x2x16xf32>,
    %c2_688 = arith.constant 2 : index
    %c0_689 = arith.constant 0 : index
    %c9_690 = arith.constant 9 : index
    %c0_691 = arith.constant 0 : index
    %545 = vector.load %arg4[%c2_688, %c0_689, %c9_690, %c0_691] : memref<4x2x16x16xf32, #tpu.memory_space<vmem>>, vector<1x2x1x16xf32>
    %546 = vector.shape_cast %545 : vector<1x2x1x16xf32> to vector<2x16xf32>
    %c0_692 = arith.constant 0 : index
    %c2_693 = arith.constant 2 : index
    %c656_694 = arith.constant 656 : index
    %547 = vector.load %arg3[%c0_692, %c2_693, %c656_694] : memref<1x4x1024xf32, #tpu.memory_space<vmem>>, vector<1x2x16xf32>
    %548 = vector.shape_cast %547 : vector<1x2x16xf32> to vector<2x16xf32>
    %549 = vector.shape_cast %546 : vector<2x16xf32> to vector<1x2x16xf32>
    tpu.vector_store %arg3[%c0_692, %c2_693, %c656_694], %549 {strides = array<i32>} : memref<1x4x1024xf32, #tpu.memory_space<vmem>>, vector<1x2x16xf32>,
    %c2_695 = arith.constant 2 : index
    %c0_696 = arith.constant 0 : index
    %c10_697 = arith.constant 10 : index
    %c0_698 = arith.constant 0 : index
    %550 = vector.load %arg4[%c2_695, %c0_696, %c10_697, %c0_698] : memref<4x2x16x16xf32, #tpu.memory_space<vmem>>, vector<1x2x1x16xf32>
    %551 = vector.shape_cast %550 : vector<1x2x1x16xf32> to vector<2x16xf32>
    %c0_699 = arith.constant 0 : index
    %c2_700 = arith.constant 2 : index
    %c672_701 = arith.constant 672 : index
    %552 = vector.load %arg3[%c0_699, %c2_700, %c672_701] : memref<1x4x1024xf32, #tpu.memory_space<vmem>>, vector<1x2x16xf32>
    %553 = vector.shape_cast %552 : vector<1x2x16xf32> to vector<2x16xf32>
    %554 = vector.shape_cast %551 : vector<2x16xf32> to vector<1x2x16xf32>
    tpu.vector_store %arg3[%c0_699, %c2_700, %c672_701], %554 {strides = array<i32>} : memref<1x4x1024xf32, #tpu.memory_space<vmem>>, vector<1x2x16xf32>,
    %c2_702 = arith.constant 2 : index
    %c0_703 = arith.constant 0 : index
    %c11_704 = arith.constant 11 : index
    %c0_705 = arith.constant 0 : index
    %555 = vector.load %arg4[%c2_702, %c0_703, %c11_704, %c0_705] : memref<4x2x16x16xf32, #tpu.memory_space<vmem>>, vector<1x2x1x16xf32>
    %556 = vector.shape_cast %555 : vector<1x2x1x16xf32> to vector<2x16xf32>
    %c0_706 = arith.constant 0 : index
    %c2_707 = arith.constant 2 : index
    %c688_708 = arith.constant 688 : index
    %557 = vector.load %arg3[%c0_706, %c2_707, %c688_708] : memref<1x4x1024xf32, #tpu.memory_space<vmem>>, vector<1x2x16xf32>
    %558 = vector.shape_cast %557 : vector<1x2x16xf32> to vector<2x16xf32>
    %559 = vector.shape_cast %556 : vector<2x16xf32> to vector<1x2x16xf32>
    tpu.vector_store %arg3[%c0_706, %c2_707, %c688_708], %559 {strides = array<i32>} : memref<1x4x1024xf32, #tpu.memory_space<vmem>>, vector<1x2x16xf32>,
    %c2_709 = arith.constant 2 : index
    %c0_710 = arith.constant 0 : index
    %c12_711 = arith.constant 12 : index
    %c0_712 = arith.constant 0 : index
    %560 = vector.load %arg4[%c2_709, %c0_710, %c12_711, %c0_712] : memref<4x2x16x16xf32, #tpu.memory_space<vmem>>, vector<1x2x1x16xf32>
    %561 = vector.shape_cast %560 : vector<1x2x1x16xf32> to vector<2x16xf32>
    %c0_713 = arith.constant 0 : index
    %c2_714 = arith.constant 2 : index
    %c704_715 = arith.constant 704 : index
    %562 = vector.load %arg3[%c0_713, %c2_714, %c704_715] : memref<1x4x1024xf32, #tpu.memory_space<vmem>>, vector<1x2x16xf32>
    %563 = vector.shape_cast %562 : vector<1x2x16xf32> to vector<2x16xf32>
    %564 = vector.shape_cast %561 : vector<2x16xf32> to vector<1x2x16xf32>
    tpu.vector_store %arg3[%c0_713, %c2_714, %c704_715], %564 {strides = array<i32>} : memref<1x4x1024xf32, #tpu.memory_space<vmem>>, vector<1x2x16xf32>,
    %c2_716 = arith.constant 2 : index
    %c0_717 = arith.constant 0 : index
    %c13_718 = arith.constant 13 : index
    %c0_719 = arith.constant 0 : index
    %565 = vector.load %arg4[%c2_716, %c0_717, %c13_718, %c0_719] : memref<4x2x16x16xf32, #tpu.memory_space<vmem>>, vector<1x2x1x16xf32>
    %566 = vector.shape_cast %565 : vector<1x2x1x16xf32> to vector<2x16xf32>
    %c0_720 = arith.constant 0 : index
    %c2_721 = arith.constant 2 : index
    %c720_722 = arith.constant 720 : index
    %567 = vector.load %arg3[%c0_720, %c2_721, %c720_722] : memref<1x4x1024xf32, #tpu.memory_space<vmem>>, vector<1x2x16xf32>
    %568 = vector.shape_cast %567 : vector<1x2x16xf32> to vector<2x16xf32>
    %569 = vector.shape_cast %566 : vector<2x16xf32> to vector<1x2x16xf32>
    tpu.vector_store %arg3[%c0_720, %c2_721, %c720_722], %569 {strides = array<i32>} : memref<1x4x1024xf32, #tpu.memory_space<vmem>>, vector<1x2x16xf32>,
    %c2_723 = arith.constant 2 : index
    %c0_724 = arith.constant 0 : index
    %c14_725 = arith.constant 14 : index
    %c0_726 = arith.constant 0 : index
    %570 = vector.load %arg4[%c2_723, %c0_724, %c14_725, %c0_726] : memref<4x2x16x16xf32, #tpu.memory_space<vmem>>, vector<1x2x1x16xf32>
    %571 = vector.shape_cast %570 : vector<1x2x1x16xf32> to vector<2x16xf32>
    %c0_727 = arith.constant 0 : index
    %c2_728 = arith.constant 2 : index
    %c736_729 = arith.constant 736 : index
    %572 = vector.load %arg3[%c0_727, %c2_728, %c736_729] : memref<1x4x1024xf32, #tpu.memory_space<vmem>>, vector<1x2x16xf32>
    %573 = vector.shape_cast %572 : vector<1x2x16xf32> to vector<2x16xf32>
    %574 = vector.shape_cast %571 : vector<2x16xf32> to vector<1x2x16xf32>
    tpu.vector_store %arg3[%c0_727, %c2_728, %c736_729], %574 {strides = array<i32>} : memref<1x4x1024xf32, #tpu.memory_space<vmem>>, vector<1x2x16xf32>,
    %c2_730 = arith.constant 2 : index
    %c0_731 = arith.constant 0 : index
    %c15_732 = arith.constant 15 : index
    %c0_733 = arith.constant 0 : index
    %575 = vector.load %arg4[%c2_730, %c0_731, %c15_732, %c0_733] : memref<4x2x16x16xf32, #tpu.memory_space<vmem>>, vector<1x2x1x16xf32>
    %576 = vector.shape_cast %575 : vector<1x2x1x16xf32> to vector<2x16xf32>
    %c0_734 = arith.constant 0 : index
    %c2_735 = arith.constant 2 : index
    %c752_736 = arith.constant 752 : index
    %577 = vector.load %arg3[%c0_734, %c2_735, %c752_736] : memref<1x4x1024xf32, #tpu.memory_space<vmem>>, vector<1x2x16xf32>
    %578 = vector.shape_cast %577 : vector<1x2x16xf32> to vector<2x16xf32>
    %579 = vector.shape_cast %576 : vector<2x16xf32> to vector<1x2x16xf32>
    tpu.vector_store %arg3[%c0_734, %c2_735, %c752_736], %579 {strides = array<i32>} : memref<1x4x1024xf32, #tpu.memory_space<vmem>>, vector<1x2x16xf32>,
    %c3_737 = arith.constant 3 : index
    %c0_738 = arith.constant 0 : index
    %c0_739 = arith.constant 0 : index
    %c0_740 = arith.constant 0 : index
    %580 = vector.load %arg4[%c3_737, %c0_738, %c0_739, %c0_740] : memref<4x2x16x16xf32, #tpu.memory_space<vmem>>, vector<1x2x1x16xf32>
    %581 = vector.shape_cast %580 : vector<1x2x1x16xf32> to vector<2x16xf32>
    %c0_741 = arith.constant 0 : index
    %c2_742 = arith.constant 2 : index
    %c768_743 = arith.constant 768 : index
    %582 = vector.load %arg3[%c0_741, %c2_742, %c768_743] : memref<1x4x1024xf32, #tpu.memory_space<vmem>>, vector<1x2x16xf32>
    %583 = vector.shape_cast %582 : vector<1x2x16xf32> to vector<2x16xf32>
    %584 = vector.shape_cast %581 : vector<2x16xf32> to vector<1x2x16xf32>
    tpu.vector_store %arg3[%c0_741, %c2_742, %c768_743], %584 {strides = array<i32>} : memref<1x4x1024xf32, #tpu.memory_space<vmem>>, vector<1x2x16xf32>,
    %c3_744 = arith.constant 3 : index
    %c0_745 = arith.constant 0 : index
    %c1_746 = arith.constant 1 : index
    %c0_747 = arith.constant 0 : index
    %585 = vector.load %arg4[%c3_744, %c0_745, %c1_746, %c0_747] : memref<4x2x16x16xf32, #tpu.memory_space<vmem>>, vector<1x2x1x16xf32>
    %586 = vector.shape_cast %585 : vector<1x2x1x16xf32> to vector<2x16xf32>
    %c0_748 = arith.constant 0 : index
    %c2_749 = arith.constant 2 : index
    %c784_750 = arith.constant 784 : index
    %587 = vector.load %arg3[%c0_748, %c2_749, %c784_750] : memref<1x4x1024xf32, #tpu.memory_space<vmem>>, vector<1x2x16xf32>
    %588 = vector.shape_cast %587 : vector<1x2x16xf32> to vector<2x16xf32>
    %589 = vector.shape_cast %586 : vector<2x16xf32> to vector<1x2x16xf32>
    tpu.vector_store %arg3[%c0_748, %c2_749, %c784_750], %589 {strides = array<i32>} : memref<1x4x1024xf32, #tpu.memory_space<vmem>>, vector<1x2x16xf32>,
    %c3_751 = arith.constant 3 : index
    %c0_752 = arith.constant 0 : index
    %c2_753 = arith.constant 2 : index
    %c0_754 = arith.constant 0 : index
    %590 = vector.load %arg4[%c3_751, %c0_752, %c2_753, %c0_754] : memref<4x2x16x16xf32, #tpu.memory_space<vmem>>, vector<1x2x1x16xf32>
    %591 = vector.shape_cast %590 : vector<1x2x1x16xf32> to vector<2x16xf32>
    %c0_755 = arith.constant 0 : index
    %c2_756 = arith.constant 2 : index
    %c800_757 = arith.constant 800 : index
    %592 = vector.load %arg3[%c0_755, %c2_756, %c800_757] : memref<1x4x1024xf32, #tpu.memory_space<vmem>>, vector<1x2x16xf32>
    %593 = vector.shape_cast %592 : vector<1x2x16xf32> to vector<2x16xf32>
    %594 = vector.shape_cast %591 : vector<2x16xf32> to vector<1x2x16xf32>
    tpu.vector_store %arg3[%c0_755, %c2_756, %c800_757], %594 {strides = array<i32>} : memref<1x4x1024xf32, #tpu.memory_space<vmem>>, vector<1x2x16xf32>,
    %c3_758 = arith.constant 3 : index
    %c0_759 = arith.constant 0 : index
    %c3_760 = arith.constant 3 : index
    %c0_761 = arith.constant 0 : index
    %595 = vector.load %arg4[%c3_758, %c0_759, %c3_760, %c0_761] : memref<4x2x16x16xf32, #tpu.memory_space<vmem>>, vector<1x2x1x16xf32>
    %596 = vector.shape_cast %595 : vector<1x2x1x16xf32> to vector<2x16xf32>
    %c0_762 = arith.constant 0 : index
    %c2_763 = arith.constant 2 : index
    %c816_764 = arith.constant 816 : index
    %597 = vector.load %arg3[%c0_762, %c2_763, %c816_764] : memref<1x4x1024xf32, #tpu.memory_space<vmem>>, vector<1x2x16xf32>
    %598 = vector.shape_cast %597 : vector<1x2x16xf32> to vector<2x16xf32>
    %599 = vector.shape_cast %596 : vector<2x16xf32> to vector<1x2x16xf32>
    tpu.vector_store %arg3[%c0_762, %c2_763, %c816_764], %599 {strides = array<i32>} : memref<1x4x1024xf32, #tpu.memory_space<vmem>>, vector<1x2x16xf32>,
    %c3_765 = arith.constant 3 : index
    %c0_766 = arith.constant 0 : index
    %c4_767 = arith.constant 4 : index
    %c0_768 = arith.constant 0 : index
    %600 = vector.load %arg4[%c3_765, %c0_766, %c4_767, %c0_768] : memref<4x2x16x16xf32, #tpu.memory_space<vmem>>, vector<1x2x1x16xf32>
    %601 = vector.shape_cast %600 : vector<1x2x1x16xf32> to vector<2x16xf32>
    %c0_769 = arith.constant 0 : index
    %c2_770 = arith.constant 2 : index
    %c832_771 = arith.constant 832 : index
    %602 = vector.load %arg3[%c0_769, %c2_770, %c832_771] : memref<1x4x1024xf32, #tpu.memory_space<vmem>>, vector<1x2x16xf32>
    %603 = vector.shape_cast %602 : vector<1x2x16xf32> to vector<2x16xf32>
    %604 = vector.shape_cast %601 : vector<2x16xf32> to vector<1x2x16xf32>
    tpu.vector_store %arg3[%c0_769, %c2_770, %c832_771], %604 {strides = array<i32>} : memref<1x4x1024xf32, #tpu.memory_space<vmem>>, vector<1x2x16xf32>,
    %c3_772 = arith.constant 3 : index
    %c0_773 = arith.constant 0 : index
    %c5_774 = arith.constant 5 : index
    %c0_775 = arith.constant 0 : index
    %605 = vector.load %arg4[%c3_772, %c0_773, %c5_774, %c0_775] : memref<4x2x16x16xf32, #tpu.memory_space<vmem>>, vector<1x2x1x16xf32>
    %606 = vector.shape_cast %605 : vector<1x2x1x16xf32> to vector<2x16xf32>
    %c0_776 = arith.constant 0 : index
    %c2_777 = arith.constant 2 : index
    %c848_778 = arith.constant 848 : index
    %607 = vector.load %arg3[%c0_776, %c2_777, %c848_778] : memref<1x4x1024xf32, #tpu.memory_space<vmem>>, vector<1x2x16xf32>
    %608 = vector.shape_cast %607 : vector<1x2x16xf32> to vector<2x16xf32>
    %609 = vector.shape_cast %606 : vector<2x16xf32> to vector<1x2x16xf32>
    tpu.vector_store %arg3[%c0_776, %c2_777, %c848_778], %609 {strides = array<i32>} : memref<1x4x1024xf32, #tpu.memory_space<vmem>>, vector<1x2x16xf32>,
    %c3_779 = arith.constant 3 : index
    %c0_780 = arith.constant 0 : index
    %c6_781 = arith.constant 6 : index
    %c0_782 = arith.constant 0 : index
    %610 = vector.load %arg4[%c3_779, %c0_780, %c6_781, %c0_782] : memref<4x2x16x16xf32, #tpu.memory_space<vmem>>, vector<1x2x1x16xf32>
    %611 = vector.shape_cast %610 : vector<1x2x1x16xf32> to vector<2x16xf32>
    %c0_783 = arith.constant 0 : index
    %c2_784 = arith.constant 2 : index
    %c864_785 = arith.constant 864 : index
    %612 = vector.load %arg3[%c0_783, %c2_784, %c864_785] : memref<1x4x1024xf32, #tpu.memory_space<vmem>>, vector<1x2x16xf32>
    %613 = vector.shape_cast %612 : vector<1x2x16xf32> to vector<2x16xf32>
    %614 = vector.shape_cast %611 : vector<2x16xf32> to vector<1x2x16xf32>
    tpu.vector_store %arg3[%c0_783, %c2_784, %c864_785], %614 {strides = array<i32>} : memref<1x4x1024xf32, #tpu.memory_space<vmem>>, vector<1x2x16xf32>,
    %c3_786 = arith.constant 3 : index
    %c0_787 = arith.constant 0 : index
    %c7_788 = arith.constant 7 : index
    %c0_789 = arith.constant 0 : index
    %615 = vector.load %arg4[%c3_786, %c0_787, %c7_788, %c0_789] : memref<4x2x16x16xf32, #tpu.memory_space<vmem>>, vector<1x2x1x16xf32>
    %616 = vector.shape_cast %615 : vector<1x2x1x16xf32> to vector<2x16xf32>
    %c0_790 = arith.constant 0 : index
    %c2_791 = arith.constant 2 : index
    %c880_792 = arith.constant 880 : index
    %617 = vector.load %arg3[%c0_790, %c2_791, %c880_792] : memref<1x4x1024xf32, #tpu.memory_space<vmem>>, vector<1x2x16xf32>
    %618 = vector.shape_cast %617 : vector<1x2x16xf32> to vector<2x16xf32>
    %619 = vector.shape_cast %616 : vector<2x16xf32> to vector<1x2x16xf32>
    tpu.vector_store %arg3[%c0_790, %c2_791, %c880_792], %619 {strides = array<i32>} : memref<1x4x1024xf32, #tpu.memory_space<vmem>>, vector<1x2x16xf32>,
    %c3_793 = arith.constant 3 : index
    %c0_794 = arith.constant 0 : index
    %c8_795 = arith.constant 8 : index
    %c0_796 = arith.constant 0 : index
    %620 = vector.load %arg4[%c3_793, %c0_794, %c8_795, %c0_796] : memref<4x2x16x16xf32, #tpu.memory_space<vmem>>, vector<1x2x1x16xf32>
    %621 = vector.shape_cast %620 : vector<1x2x1x16xf32> to vector<2x16xf32>
    %c0_797 = arith.constant 0 : index
    %c2_798 = arith.constant 2 : index
    %c896_799 = arith.constant 896 : index
    %622 = vector.load %arg3[%c0_797, %c2_798, %c896_799] : memref<1x4x1024xf32, #tpu.memory_space<vmem>>, vector<1x2x16xf32>
    %623 = vector.shape_cast %622 : vector<1x2x16xf32> to vector<2x16xf32>
    %624 = vector.shape_cast %621 : vector<2x16xf32> to vector<1x2x16xf32>
    tpu.vector_store %arg3[%c0_797, %c2_798, %c896_799], %624 {strides = array<i32>} : memref<1x4x1024xf32, #tpu.memory_space<vmem>>, vector<1x2x16xf32>,
    %c3_800 = arith.constant 3 : index
    %c0_801 = arith.constant 0 : index
    %c9_802 = arith.constant 9 : index
    %c0_803 = arith.constant 0 : index
    %625 = vector.load %arg4[%c3_800, %c0_801, %c9_802, %c0_803] : memref<4x2x16x16xf32, #tpu.memory_space<vmem>>, vector<1x2x1x16xf32>
    %626 = vector.shape_cast %625 : vector<1x2x1x16xf32> to vector<2x16xf32>
    %c0_804 = arith.constant 0 : index
    %c2_805 = arith.constant 2 : index
    %c912_806 = arith.constant 912 : index
    %627 = vector.load %arg3[%c0_804, %c2_805, %c912_806] : memref<1x4x1024xf32, #tpu.memory_space<vmem>>, vector<1x2x16xf32>
    %628 = vector.shape_cast %627 : vector<1x2x16xf32> to vector<2x16xf32>
    %629 = vector.shape_cast %626 : vector<2x16xf32> to vector<1x2x16xf32>
    tpu.vector_store %arg3[%c0_804, %c2_805, %c912_806], %629 {strides = array<i32>} : memref<1x4x1024xf32, #tpu.memory_space<vmem>>, vector<1x2x16xf32>,
    %c3_807 = arith.constant 3 : index
    %c0_808 = arith.constant 0 : index
    %c10_809 = arith.constant 10 : index
    %c0_810 = arith.constant 0 : index
    %630 = vector.load %arg4[%c3_807, %c0_808, %c10_809, %c0_810] : memref<4x2x16x16xf32, #tpu.memory_space<vmem>>, vector<1x2x1x16xf32>
    %631 = vector.shape_cast %630 : vector<1x2x1x16xf32> to vector<2x16xf32>
    %c0_811 = arith.constant 0 : index
    %c2_812 = arith.constant 2 : index
    %c928_813 = arith.constant 928 : index
    %632 = vector.load %arg3[%c0_811, %c2_812, %c928_813] : memref<1x4x1024xf32, #tpu.memory_space<vmem>>, vector<1x2x16xf32>
    %633 = vector.shape_cast %632 : vector<1x2x16xf32> to vector<2x16xf32>
    %634 = vector.shape_cast %631 : vector<2x16xf32> to vector<1x2x16xf32>
    tpu.vector_store %arg3[%c0_811, %c2_812, %c928_813], %634 {strides = array<i32>} : memref<1x4x1024xf32, #tpu.memory_space<vmem>>, vector<1x2x16xf32>,
    %c3_814 = arith.constant 3 : index
    %c0_815 = arith.constant 0 : index
    %c11_816 = arith.constant 11 : index
    %c0_817 = arith.constant 0 : index
    %635 = vector.load %arg4[%c3_814, %c0_815, %c11_816, %c0_817] : memref<4x2x16x16xf32, #tpu.memory_space<vmem>>, vector<1x2x1x16xf32>
    %636 = vector.shape_cast %635 : vector<1x2x1x16xf32> to vector<2x16xf32>
    %c0_818 = arith.constant 0 : index
    %c2_819 = arith.constant 2 : index
    %c944_820 = arith.constant 944 : index
    %637 = vector.load %arg3[%c0_818, %c2_819, %c944_820] : memref<1x4x1024xf32, #tpu.memory_space<vmem>>, vector<1x2x16xf32>
    %638 = vector.shape_cast %637 : vector<1x2x16xf32> to vector<2x16xf32>
    %639 = vector.shape_cast %636 : vector<2x16xf32> to vector<1x2x16xf32>
    tpu.vector_store %arg3[%c0_818, %c2_819, %c944_820], %639 {strides = array<i32>} : memref<1x4x1024xf32, #tpu.memory_space<vmem>>, vector<1x2x16xf32>,
    %c3_821 = arith.constant 3 : index
    %c0_822 = arith.constant 0 : index
    %c12_823 = arith.constant 12 : index
    %c0_824 = arith.constant 0 : index
    %640 = vector.load %arg4[%c3_821, %c0_822, %c12_823, %c0_824] : memref<4x2x16x16xf32, #tpu.memory_space<vmem>>, vector<1x2x1x16xf32>
    %641 = vector.shape_cast %640 : vector<1x2x1x16xf32> to vector<2x16xf32>
    %c0_825 = arith.constant 0 : index
    %c2_826 = arith.constant 2 : index
    %c960_827 = arith.constant 960 : index
    %642 = vector.load %arg3[%c0_825, %c2_826, %c960_827] : memref<1x4x1024xf32, #tpu.memory_space<vmem>>, vector<1x2x16xf32>
    %643 = vector.shape_cast %642 : vector<1x2x16xf32> to vector<2x16xf32>
    %644 = vector.shape_cast %641 : vector<2x16xf32> to vector<1x2x16xf32>
    tpu.vector_store %arg3[%c0_825, %c2_826, %c960_827], %644 {strides = array<i32>} : memref<1x4x1024xf32, #tpu.memory_space<vmem>>, vector<1x2x16xf32>,
    %c3_828 = arith.constant 3 : index
    %c0_829 = arith.constant 0 : index
    %c13_830 = arith.constant 13 : index
    %c0_831 = arith.constant 0 : index
    %645 = vector.load %arg4[%c3_828, %c0_829, %c13_830, %c0_831] : memref<4x2x16x16xf32, #tpu.memory_space<vmem>>, vector<1x2x1x16xf32>
    %646 = vector.shape_cast %645 : vector<1x2x1x16xf32> to vector<2x16xf32>
    %c0_832 = arith.constant 0 : index
    %c2_833 = arith.constant 2 : index
    %c976_834 = arith.constant 976 : index
    %647 = vector.load %arg3[%c0_832, %c2_833, %c976_834] : memref<1x4x1024xf32, #tpu.memory_space<vmem>>, vector<1x2x16xf32>
    %648 = vector.shape_cast %647 : vector<1x2x16xf32> to vector<2x16xf32>
    %649 = vector.shape_cast %646 : vector<2x16xf32> to vector<1x2x16xf32>
    tpu.vector_store %arg3[%c0_832, %c2_833, %c976_834], %649 {strides = array<i32>} : memref<1x4x1024xf32, #tpu.memory_space<vmem>>, vector<1x2x16xf32>,
    %c3_835 = arith.constant 3 : index
    %c0_836 = arith.constant 0 : index
    %c14_837 = arith.constant 14 : index
    %c0_838 = arith.constant 0 : index
    %650 = vector.load %arg4[%c3_835, %c0_836, %c14_837, %c0_838] : memref<4x2x16x16xf32, #tpu.memory_space<vmem>>, vector<1x2x1x16xf32>
    %651 = vector.shape_cast %650 : vector<1x2x1x16xf32> to vector<2x16xf32>
    %c0_839 = arith.constant 0 : index
    %c2_840 = arith.constant 2 : index
    %c992_841 = arith.constant 992 : index
    %652 = vector.load %arg3[%c0_839, %c2_840, %c992_841] : memref<1x4x1024xf32, #tpu.memory_space<vmem>>, vector<1x2x16xf32>
    %653 = vector.shape_cast %652 : vector<1x2x16xf32> to vector<2x16xf32>
    %654 = vector.shape_cast %651 : vector<2x16xf32> to vector<1x2x16xf32>
    tpu.vector_store %arg3[%c0_839, %c2_840, %c992_841], %654 {strides = array<i32>} : memref<1x4x1024xf32, #tpu.memory_space<vmem>>, vector<1x2x16xf32>,
    %c3_842 = arith.constant 3 : index
    %c0_843 = arith.constant 0 : index
    %c15_844 = arith.constant 15 : index
    %c0_845 = arith.constant 0 : index
    %655 = vector.load %arg4[%c3_842, %c0_843, %c15_844, %c0_845] : memref<4x2x16x16xf32, #tpu.memory_space<vmem>>, vector<1x2x1x16xf32>
    %656 = vector.shape_cast %655 : vector<1x2x1x16xf32> to vector<2x16xf32>
    %c0_846 = arith.constant 0 : index
    %c2_847 = arith.constant 2 : index
    %c1008_848 = arith.constant 1008 : index
    %657 = vector.load %arg3[%c0_846, %c2_847, %c1008_848] : memref<1x4x1024xf32, #tpu.memory_space<vmem>>, vector<1x2x16xf32>
    %658 = vector.shape_cast %657 : vector<1x2x16xf32> to vector<2x16xf32>
    %659 = vector.shape_cast %656 : vector<2x16xf32> to vector<1x2x16xf32>
    tpu.vector_store %arg3[%c0_846, %c2_847, %c1008_848], %659 {strides = array<i32>} : memref<1x4x1024xf32, #tpu.memory_space<vmem>>, vector<1x2x16xf32>,
    return
  }
  func.func @transform_0(%arg0: i32, %arg1: i32) -> (i32, i32, i32, i32) {
    %c0_i32 = arith.constant 0 : i32
    %c0_i32_0 = arith.constant 0 : i32
    %c0_i32_1 = arith.constant 0 : i32
    return %arg0, %c0_i32, %arg1, %c0_i32_0 : i32, i32, i32, i32
  }
  func.func @transform_1(%arg0: i32, %arg1: i32) -> (i32, i32, i32) {
    %c0_i32 = arith.constant 0 : i32
    %c0_i32_0 = arith.constant 0 : i32
    return %arg0, %arg1, %c0_i32 : i32, i32, i32
  }
}

</mosaic_0001>

<bundles_post_ra>
// kernel: tpu_custom_call.1
= control target key start
LH: loop header
LB: loop body
LE: loop exit
PB: predicated region body
PF: predicated region fallthrough
CT: control target
= control target key end

     0   :  { %6 = vsyncpa [#allocation4], 0  ;;  %s2903_s0 = inlined_call_operand.hbm [shape: f32[2,4,32,32], index: 0, kind: input, shape index: {}]   ;;  %s2904_s1 = inlined_call_operand.hbm [shape: f32[2,4,1024], index: 1, kind: output, shape index: {}]  }
   0x1   :  { %8 = vsyncpa [#allocation4 + $0x1], 0 }
   0x2   :  { %9 = vsyncpa [#allocation5], 0 }
   0x3   :  { %11 = vsyncpa [#allocation5 + $0x1], 0  ;;  %s2073_s6 = smov 0   ;;  %s2075_s7 = smov 0  }
   0x4   :  { %s2077_s8 = smov 0   ;;  %s2079_s9 = smov 0  }
   0x5   :  { %s2081_s10 = smov 0   ;;  %s2083_s11 = smov 0  }
   0x6 LB: > { %s1852_s12 = sadd.s32 4294967295, %s2052_s11   ;;  %s1853_s13 = sadd.s32 4294967294, %s2052_s11   ;;  %s2052_s11 = sphi %s2083_s11, %s17_s11   ;;  %s2048_s10 = sphi %s2081_s10, %s2913_s10   ;;  %s2044_s9 = sphi %s2079_s9, %s2912_s9   ;;  %s2040_s8 = sphi %s2077_s8, %s2911_s8   ;;  %s2036_s7 = sphi %s2075_s7, %s2910_s7   ;;  %s2032_s6 = sphi %s2073_s6, %s2909_s6  }
   0x7   : > { %s29_s14 = sadd.s32 1, %s2048_s10  ;;  %s38_s15 = sadd.s32 1, %s2040_s8 }
   0x8   : > { %p31_p0 = scmp.ge.s32.totalorder %s29_s14, 2  ;;  %p45_p1 = scmp.ne.s32.totalorder %s2040_s8, %s2036_s7 }
   0x9   : > { %p46_p2 = scmp.eq.s32.totalorder %s2052_s11, 0  ;;  %p51_p3 = scmp.ne.s32.totalorder %s2036_s7, %s2032_s6 }
   0xa   : > { %s2915_s14 = smov (%p31_p0, %s29_s14), 0  ;;  %p52_p5 = scmp.eq.s32.totalorder %s1852_s12, 0 }
   0xb   : > { %p2114_p4 = por %p46_p2, %p45_p1  ;;  %s33_s17 = ssub.s32 %s2048_s10, %s2915_s14 }
   0xc   : > { %p77_p6 = scmp.eq.s32.totalorder %s1852_s12, 1  ;;  %p36_p7 = scmp.eq.s32.totalorder %s33_s17, 0 }
   0xd   : > { %p2120_p8 = por %p52_p5, %p51_p3  ;;  %p83_p10 = scmp.eq.s32.totalorder %s1853_s13, 1 }
   0xe   : > { %p2124_p9 = por %p77_p6, %p45_p1  ;;  %p1855_p12 = scmp.ge.s32.totalorder %s2052_s11, 2 }
   0xf   : > { %s2129_s20 = scalar_select %p36_p7, %s2040_s8, %s38_s15  }
  0x10   : > { %p2131_p11 = por %p83_p10, %p51_p3  ;;  %p1881_p13 = scmp.lt.s32.totalorder %s2052_s11, 2 }
  0x11   : > { %s103_s22 = sand.u32 1, %s2040_s8   ;;  %s1867_s24 = sshll.u32 %s2048_s10, 7 }
  0x12   : > { %s1856_s23 = sshll.u32 %s103_s22, 7  ;;  %s114_s27 = scalar_lea.hbm %s2903_s0, %s1867_s24 }
  0x13   : > { %s107_s28 = scalar_lea.vmem [#allocation3], %s1856_s23  ;;  %s115_s30 = sshll.u32 %s114_s27, 4  ;;  %s116_s30 = int_to_ptr.hbm [resolvable:$true] %s115_s30 }
  0x14   : > { %s117_s29 = sshll.u32 %s107_s28, 4  ;;  %p1874_p0 = pnand %p1881_p13, %p2114_p4  ;;  %s118_s29 = int_to_ptr.vmem [resolvable:$true] %s117_s29 }
  0x15   : > { %p1859_p1 = scmp.ge.s32.totalorder %s2052_s11, 1  ;;  %s104_s2 = scalar_lea.sflag [#allocation4], %s103_s22 }
  0x16   : > { %s2054_s3 = smov 128   ;;  %s2055_s4 = smov 8  }
  0x17   : > { %1876 = dma.hbm_to_vmem [thread:$0]  (!%p1874_p0), %s116_s30, 2048, %s118_s29, %s104_s2, %s2054_s3, %s2054_s3, %s2055_s4  }
  0x18   : > { %p125_p2 = scmp.lt.s32.totalorder %s2052_s11, 3 }
  0x1a   : > { %p126_p3 = pnand %p1859_p1, %p125_p2 }
  0x1b   : > { %s2147_s5 = sand.u32 (!%p126_p3), 1, %s2036_s7  }
  0x1c   : > { %129 = sbr.rel (%p126_p3) target bundleno = 696 (0x2b8), region = 24  ;;  %s1860_s12 = sshll.u32 (!%p126_p3), %s2147_s5, 7 }
  0x1d   : > { %s132_s13 = scalar_lea.sflag (!%p126_p3), [#allocation4], %s2147_s5  ;;  %s2151_s15 = scalar_lea.vmem (!%p126_p3), [#allocation3], %s1860_s12 }
  0x21   : > { %2023 = dma.done.wait (%p2120_p8), %s132_s13, 2048  }
  0x22   : > { %2025 = vsyncadd (%p2120_p8), %s132_s13, 4294965248  ;;  %v173_v0 = vld [vmem:[%s2151_s15] sm:$0xff]  ;;  %vm164_vm0 = vcmask 130048   ;;  %s2056_s16 = smov 112   ;;  %v174_v2 = vld [vmem:[%s2151_s15 + $0x8] sm:$0xff]  ;;  %vm227_vm1 = vcmask 1041409  }
  0x23   : > { %v175_v1 = vld [vmem:[%s2151_s15 + $0x20] sm:$0xff]  ;;  %189 = vrot.lane.b32.xlu0 %v173_v0, %s2056_s16  ;;  %165 = vst.msk [vmem:[#allocation2] sm:$0xff] %vm164_vm0, %v173_v0  ;;  %v176_v4 = vld [vmem:[%s2151_s15 + $0x28] sm:$0xff]  ;;  %vm229_vm2 = vcmask 1045509   ;;  %s2057_s17 = smov 48   ;;  %s2058_s18 = smov 32  }
  0x24   : > { %193 = vrot.lane.b32.xlu1 %v175_v1, %s2056_s16  ;;  %v177_v3 = vld [vmem:[%s2151_s15 + $0x40] sm:$0xff]  ;;  %166 = vst.msk [vmem:[#allocation2 + $0x8] sm:$0xff] %vm164_vm0, %v174_v2  ;;  %v178_v5 = vld [vmem:[%s2151_s15 + $0x48] sm:$0xff]  ;;  %s2059_s22 = smov 16   ;;  %s2060_s23 = smov 96   ;;  %vm232_vm3 = vcmask 123904  }
  0x25   : > { %197 = vrot.lane.b32.xlu2 %v177_v3, %s2056_s16  ;;  %167 = vst.msk [vmem:[#allocation2 + $0x20] sm:$0xff] %vm164_vm0, %v175_v1  ;;  %v179_v6 = vld [vmem:[%s2151_s15 + $0x60] sm:$0xff]  ;;  %v180_v7 = vld [vmem:[%s2151_s15 + $0x68] sm:$0xff]  ;;  %s2061_s24 = smov 80   ;;  %s2062_s25 = smov 64   ;;  %vm244_vm4 = vcmask 255104  }
  0x26   : > { %168 = vst.msk [vmem:[#allocation2 + $0x28] sm:$0xff] %vm164_vm0, %v176_v4  ;;  %s1861_s26 = sshll.u32 %s2147_s5, 5  ;;  %vm256_vm5 = vcmask 386304   ;;  %vm268_vm6 = vcmask 517504   ;;  %vm280_vm7 = vcmask 648704   ;;  %vm292_vm8 = vcmask 779904  }
  0x27   : > { %169 = vst.msk [vmem:[#allocation2 + $0x40] sm:$0xff] %vm164_vm0, %v177_v3  ;;  %s2212_s27 = scalar_lea.vmem [#allocation6], %s1861_s26  ;;  %vm304_vm9 = vcmask 911104   ;;  %vm316_vm10 = vcmask 1042304   ;;  %vm993_vm11 = vcmask 1043459   ;;  %vm995_vm12 = vcmask 1047559  }
  0x28   : > { %170 = vst.msk [vmem:[#allocation2 + $0x48] sm:$0xff] %vm164_vm0, %v178_v5  ;;  %vm998_vm13 = vcmask 125954   ;;  %vm1011_vm14 = vcmask 257154   ;;  %vm1024_vm15 = vcmask 388354   ;;  %s1868_s28 = sshll.u32 %s2044_s9, 5  ;;  %s1765_s3 = sshll.u32 %s2212_s27, 4  ;;  %s1766_s3 = int_to_ptr.vmem [resolvable:$true] %s1765_s3 }
  0x29   : > { %171 = vst.msk [vmem:[#allocation2 + $0x60] sm:$0xff] %vm164_vm0, %v179_v6  ;;  %s1763_s2 = scalar_lea.hbm %s2904_s1, %s1868_s28  ;;  %s1750_s9 = scalar_lea.sflag [#allocation5], %s2147_s5 }
  0x2a   : > { %172 = vst.msk [vmem:[#allocation2 + $0x68] sm:$0xff] %vm164_vm0, %v180_v7  ;;  %v258_v10 = vld [vmem:[#allocation2 + $0x3] sm:$0x1]  ;;  %v246_v11 = vld [vmem:[#allocation2 + $0x2] sm:$0x1]  ;;  %s1767_s4 = sshll.u32 %s1763_s2, 4  ;;  %s1768_s4 = int_to_ptr.hbm [resolvable:$true] %s1767_s4 }
  0x2b   : > { %191 = vrot.lane.b32.xlu0 %v174_v2, %s2056_s16  ;;  %v234_v12 = vld [vmem:[#allocation2 + $0x1] sm:$0x1]  ;;  %v294_v31 = vld [vmem:[#allocation2 + $0x6] sm:$0x1]  ;;  %v282_v32 = vld [vmem:[#allocation2 + $0x5] sm:$0x1] }
  0x2c   : > { %195 = vrot.lane.b32.xlu1 %v176_v4, %s2056_s16  ;;  %v270_v34 = vld [vmem:[#allocation2 + $0x4] sm:$0x1]  ;;  %v338_v45 = vld [vmem:[#allocation2 + $0xa] sm:$0x1]  ;;  %v327_v46 = vld [vmem:[#allocation2 + $0x9] sm:$0x1] }
  0x2d   : > { %199 = vrot.lane.b32.xlu2 %v178_v5, %s2056_s16  ;;  %v306_v50 = vld [vmem:[#allocation2 + $0x7] sm:$0x1]  ;;  %v222_v55 = vld [vmem:[#allocation2] sm:$0x1]  ;;  %v318_v58 = vld [vmem:[#allocation2 + $0x8] sm:$0x1] }
  0x2e   : > { %v405_v61 = vld [vmem:[#allocation2 + $0x20] sm:$0x1]  ;;  %s1984_s12 = sshra.s32 %s1768_s4, 4  ;;  %s1985_s12 = int_to_ptr.hbm [resolvable:$true] %s1984_s12 }
  0x2f   : > { %s1986_s13 = scalar_lea.hbm %s1985_s12, 32  ;;  %p1991_p7 = scmp.lt.s32.totalorder %s1985_s12, %s2904_s1 }
  0x30   : > { %p1987_p4 = scmp.ne.s32.totalorder %s1985_s12, %s1986_s13 }
  0x32   : > { %p1988_p5 = pnand %p1987_p4, %p2124_p9 }
  0x33   : > { %201 = vrot.lane.b32.xlu0 %v179_v6, %s2056_s16 }
  0x34   : > { %203 = vrot.lane.b32.xlu1 %v180_v7, %s2056_s16  ;;  %p1989_p6 = pneg %p1988_p5 }
  0x95   : > { %v190_v8 = vpop.permute.xlu0 %189 }
  0x96   : > { %v194_v9 = vpop.permute.xlu1 %193  ;;  %214 = vst.msk [vmem:[#allocation2 + $0x10] sm:$0xff] %vm164_vm0, %v190_v8 }
  0x97   : > { %216 = vst.msk [vmem:[#allocation2 + $0x30] sm:$0xff] %vm164_vm0, %v194_v9 }
  0x9d   : > { %v259_v13 = vld [vmem:[#allocation2 + $0x13] sm:$0x1]  ;;  %v247_v14 = vld [vmem:[#allocation2 + $0x12] sm:$0x1]  ;;  %v235_v15 = vld [vmem:[#allocation2 + $0x11] sm:$0x1]  ;;  %v192_v16 = vpop.permute.xlu0 %191 }
  0x9e   : > { %v262_v17 = vrot.slane %v259_v13, 7  ;;  %v250_v18 = vrot.slane %v247_v14, 7  ;;  %v238_v19 = vrot.slane %v235_v15, 7  ;;  %215 = vst.msk [vmem:[#allocation2 + $0x18] sm:$0xff] %vm164_vm0, %v192_v16  ;;  %v295_v20 = vld [vmem:[#allocation2 + $0x16] sm:$0x1]  ;;  %v196_v51 = vpop.permute.xlu1 %195 }
  0x9f   : > { %v283_v21 = vld [vmem:[#allocation2 + $0x15] sm:$0x1]  ;;  %v271_v25 = vld [vmem:[#allocation2 + $0x14] sm:$0x1]  ;;  %v298_v29 = vrot.slane %v295_v20, 7  ;;  %217 = vst.msk [vmem:[#allocation2 + $0x38] sm:$0xff] %vm164_vm0, %v196_v51 }
  0xa0   : > { %v263_v22 = vsel %vm227_vm1, %v262_v17, %v258_v10  ;;  %v251_v23 = vsel %vm227_vm1, %v250_v18, %v246_v11  ;;  %v239_v24 = vsel %vm227_vm1, %v238_v19, %v234_v12  ;;  %v286_v30 = vrot.slane %v283_v21, 7  ;;  %v307_v40 = vld [vmem:[#allocation2 + $0x17] sm:$0x1]  ;;  %v223_v49 = vld [vmem:[#allocation2 + $0x10] sm:$0x1] }
  0xa1   : > { %v264_v26 = vsel %vm229_vm2, %v262_v17, %v263_v22  ;;  %v252_v27 = vsel %vm229_vm2, %v250_v18, %v251_v23  ;;  %v240_v28 = vsel %vm229_vm2, %v238_v19, %v239_v24  ;;  %v274_v33 = vrot.slane %v271_v25, 7  ;;  %v406_v56 = vld [vmem:[#allocation2 + $0x30] sm:$0x1]  ;;  %v371_v10 = vld [vmem:[#allocation2 + $0xd] sm:$0x1] }
  0xa2   : > { %265 = vrot.lane.b32.xlu1 %v264_v26, %s2057_s17  ;;  %253 = vrot.lane.b32.xlu0 %v252_v27, %s2058_s18  ;;  %v299_v37 = vsel %vm227_vm1, %v298_v29, %v294_v31  ;;  %v287_v38 = vsel %vm227_vm1, %v286_v30, %v282_v32  ;;  %v310_v48 = vrot.slane %v307_v40, 7  ;;  %v226_v57 = vrot.slane %v223_v49, 7  ;;  %v360_v14 = vld [vmem:[#allocation2 + $0xc] sm:$0x1]  ;;  %v349_v16 = vld [vmem:[#allocation2 + $0xb] sm:$0x1]  ;;  %v198_v31 = vpop.permute.xlu2 %197 }
  0xa3   : > { %241 = vrot.lane.b32.xlu2 %v240_v28, %s2059_s22  ;;  %v275_v39 = vsel %vm227_vm1, %v274_v33, %v270_v34  ;;  %v300_v43 = vsel %vm229_vm2, %v298_v29, %v299_v37  ;;  %v288_v44 = vsel %vm229_vm2, %v286_v30, %v287_v38  ;;  %v409_v3 = vrot.slane %v406_v56, 7  ;;  %v415_v17 = vld [vmem:[#allocation2 + $0x31] sm:$0x1]  ;;  %v414_v26 = vld [vmem:[#allocation2 + $0x21] sm:$0x1]  ;;  %218 = vst.msk [vmem:[#allocation2 + $0x50] sm:$0xff] %vm164_vm0, %v198_v31 }
  0xa4   : > { %v276_v47 = vsel %vm229_vm2, %v274_v33, %v275_v39  ;;  %v311_v59 = vsel %vm227_vm1, %v310_v48, %v306_v50  ;;  %v228_v2 = vsel %vm227_vm1, %v226_v57, %v222_v55  ;;  %v418_v22 = vrot.slane %v415_v17, 7  ;;  %v393_v29 = vld [vmem:[#allocation2 + $0xf] sm:$0x1]  ;;  %v382_v33 = vld [vmem:[#allocation2 + $0xe] sm:$0x1] }
  0xa5   : > { %v339_v35 = vld [vmem:[#allocation2 + $0x1a] sm:$0x1]  ;;  %v328_v36 = vld [vmem:[#allocation2 + $0x19] sm:$0x1]  ;;  %v319_v52 = vld [vmem:[#allocation2 + $0x18] sm:$0x1]  ;;  %v230_v5 = vsel %vm229_vm2, %v226_v57, %v228_v2  ;;  %v410_v8 = vsel %vm227_vm1, %v409_v3, %v405_v61  ;;  %v312_v9 = vsel %vm229_vm2, %v310_v48, %v311_v59 }
  0xa6   : > { %v342_v41 = vrot.slane %v339_v35, 7  ;;  %v331_v42 = vrot.slane %v328_v36, 7  ;;  %v322_v60 = vrot.slane %v319_v52, 7  ;;  %v372_v0 = vld [vmem:[#allocation2 + $0x1d] sm:$0x1]  ;;  %v411_v13 = vsel %vm229_vm2, %v409_v3, %v410_v8 }
  0xa7   : > { %v361_v1 = vld [vmem:[#allocation2 + $0x1c] sm:$0x1]  ;;  %v350_v4 = vld [vmem:[#allocation2 + $0x1b] sm:$0x1]  ;;  %233 = vst.msk [vmem:[%s2212_s27] sm:$0x3] %vm232_vm3, %v230_v5  ;;  %v419_v32 = vsel %vm227_vm1, %v418_v22, %v414_v26 }
  0xa8   : > { %v343_v53 = vsel %vm227_vm1, %v342_v41, %v338_v45  ;;  %v332_v54 = vsel %vm227_vm1, %v331_v42, %v327_v46  ;;  %v323_v6 = vsel %vm227_vm1, %v322_v60, %v318_v58  ;;  %v375_v11 = vrot.slane %v372_v0, 7  ;;  %413 = vst.msk [vmem:[%s2212_s27 + $0x8] sm:$0x3] %vm232_vm3, %v411_v13  ;;  %v394_v21 = vld [vmem:[#allocation2 + $0x1f] sm:$0x1] }
  0xa9   : > { %v344_v62 = vsel %vm229_vm2, %v342_v41, %v343_v53  ;;  %v333_v63 = vsel %vm229_vm2, %v331_v42, %v332_v54  ;;  %v324_v7 = vsel %vm229_vm2, %v322_v60, %v323_v6  ;;  %v364_v12 = vrot.slane %v361_v1, 7  ;;  %v383_v23 = vld [vmem:[#allocation2 + $0x1e] sm:$0x1]  ;;  %v448_v37 = vld [vmem:[#allocation2 + $0x34] sm:$0x1] }
  0xaa   : > { %301 = vrot.lane.b32.xlu1 %v300_v43, %s2060_s23  ;;  %289 = vrot.lane.b32.xlu0 %v288_v44, %s2061_s24  ;;  %326 = vst.msk [vmem:[%s2212_s27 + $0x4] sm:$0x3] %vm232_vm3, %v324_v7  ;;  %v353_v15 = vrot.slane %v350_v4, 7  ;;  %v376_v18 = vsel %vm227_vm1, %v375_v11, %v371_v10  ;;  %v397_v28 = vrot.slane %v394_v21, 7  ;;  %v386_v30 = vrot.slane %v383_v23, 7  ;;  %v200_v3 = vpop.permute.xlu2 %199 }
  0xab   : > { %277 = vrot.lane.b32.xlu2 %v276_v47, %s2062_s25  ;;  %v365_v19 = vsel %vm227_vm1, %v364_v12, %v360_v14  ;;  %v377_v24 = vsel %vm229_vm2, %v375_v11, %v376_v18  ;;  %v420_v35 = vsel %vm229_vm2, %v418_v22, %v419_v32  ;;  %v437_v38 = vld [vmem:[#allocation2 + $0x33] sm:$0x1]  ;;  %v426_v39 = vld [vmem:[#allocation2 + $0x32] sm:$0x1]  ;;  %v447_v42 = vld [vmem:[#allocation2 + $0x24] sm:$0x1] }
  0xac   : > { %v354_v20 = vsel %vm227_vm1, %v353_v15, %v349_v16  ;;  %v366_v25 = vsel %vm229_vm2, %v364_v12, %v365_v19  ;;  %v398_v34 = vsel %vm227_vm1, %v397_v28, %v393_v29  ;;  %v387_v36 = vsel %vm227_vm1, %v386_v30, %v382_v33  ;;  %v436_v45 = vld [vmem:[#allocation2 + $0x23] sm:$0x1]  ;;  %v492_v47 = vld [vmem:[#allocation2 + $0x38] sm:$0x1]  ;;  %v425_v48 = vld [vmem:[#allocation2 + $0x22] sm:$0x1] }
  0xad   : > { %v355_v27 = vsel %vm229_vm2, %v353_v15, %v354_v20  ;;  %v399_v40 = vsel %vm229_vm2, %v397_v28, %v398_v34  ;;  %v388_v41 = vsel %vm229_vm2, %v386_v30, %v387_v36  ;;  %v451_v43 = vrot.slane %v448_v37, 7  ;;  %v491_v50 = vld [vmem:[#allocation2 + $0x28] sm:$0x1]  ;;  %v481_v54 = vld [vmem:[#allocation2 + $0x37] sm:$0x1]  ;;  %219 = vst.msk [vmem:[#allocation2 + $0x58] sm:$0xff] %vm164_vm0, %v200_v3 }
  0xae   : > { %v440_v44 = vrot.slane %v437_v38, 7  ;;  %v429_v46 = vrot.slane %v426_v39, 7  ;;  %v495_v49 = vrot.slane %v492_v47, 7  ;;  %v470_v55 = vld [vmem:[#allocation2 + $0x36] sm:$0x1]  ;;  %v484_v61 = vrot.slane %v481_v54, 7  ;;  %v202_v54 = vpop.permute.xlu0 %201 }
  0xaf   : > { %v452_v51 = vsel %vm227_vm1, %v451_v43, %v447_v42  ;;  %v459_v57 = vld [vmem:[#allocation2 + $0x35] sm:$0x1]  ;;  %v480_v0 = vld [vmem:[#allocation2 + $0x27] sm:$0x1]  ;;  %v469_v1 = vld [vmem:[#allocation2 + $0x26] sm:$0x1] }
  0xb0   : > { %v441_v52 = vsel %vm227_vm1, %v440_v44, %v436_v45  ;;  %v430_v53 = vsel %vm227_vm1, %v429_v46, %v425_v48  ;;  %v496_v56 = vsel %vm227_vm1, %v495_v49, %v491_v50  ;;  %v453_v58 = vsel %vm229_vm2, %v451_v43, %v452_v51  ;;  %v458_v4 = vld [vmem:[#allocation2 + $0x25] sm:$0x1]  ;;  %v523_v5 = vld [vmem:[#allocation2 + $0x3b] sm:$0x1]  ;;  %v512_v6 = vld [vmem:[#allocation2 + $0x3a] sm:$0x1] }
  0xb1   : > { %v442_v59 = vsel %vm229_vm2, %v440_v44, %v441_v52  ;;  %v431_v60 = vsel %vm229_vm2, %v429_v46, %v430_v53  ;;  %v462_v2 = vrot.slane %v459_v57, 7  ;;  %v485_v7 = vsel %vm227_vm1, %v484_v61, %v480_v0  ;;  %v522_v15 = vld [vmem:[#allocation2 + $0x2b] sm:$0x1]  ;;  %v511_v16 = vld [vmem:[#allocation2 + $0x2a] sm:$0x1]  ;;  %220 = vst.msk [vmem:[#allocation2 + $0x70] sm:$0xff] %vm164_vm0, %v202_v54 }
  0xb2   : > { %345 = vrot.lane.b32.xlu1 %v344_v62, %s2058_s18  ;;  %334 = vrot.lane.b32.xlu0 %v333_v63, %s2059_s22  ;;  %v473_v62 = vrot.slane %v470_v55, 7  ;;  %v497_v63 = vsel %vm229_vm2, %v495_v49, %v496_v56  ;;  %v526_v11 = vrot.slane %v523_v5, 7  ;;  %v515_v12 = vrot.slane %v512_v6, 7  ;;  %v500_v19 = vld [vmem:[#allocation2 + $0x29] sm:$0x1] }
  0xb3   : > { %313 = vrot.lane.b32.xlu2 %v312_v9, %s2056_s16  ;;  %499 = vst.msk [vmem:[%s2212_s27 + $0xc] sm:$0x3] %vm232_vm3, %v497_v63  ;;  %v501_v9 = vld [vmem:[#allocation2 + $0x39] sm:$0x1]  ;;  %v463_v10 = vsel %vm227_vm1, %v462_v2, %v458_v4  ;;  %v486_v13 = vsel %vm229_vm2, %v484_v61, %v485_v7  ;;  %v579_v20 = vld [vmem:[#allocation2 + $0x50] sm:$0x1] }
  0xb4   : > { %v474_v8 = vsel %vm227_vm1, %v473_v62, %v469_v1  ;;  %v504_v17 = vrot.slane %v501_v9, 7  ;;  %v464_v18 = vsel %vm229_vm2, %v462_v2, %v463_v10  ;;  %v527_v21 = vsel %vm227_vm1, %v526_v11, %v522_v15  ;;  %v556_v29 = vld [vmem:[#allocation2 + $0x3e] sm:$0x1]  ;;  %v545_v30 = vld [vmem:[#allocation2 + $0x3d] sm:$0x1]  ;;  %v204_v10 = vpop.permute.xlu1 %203 }
  0xb5   : > { %v475_v14 = vsel %vm229_vm2, %v473_v62, %v474_v8  ;;  %v516_v22 = vsel %vm227_vm1, %v515_v12, %v511_v16  ;;  %v582_v23 = vrot.slane %v579_v20, 7  ;;  %v534_v33 = vld [vmem:[#allocation2 + $0x3c] sm:$0x1]  ;;  %v559_v34 = vrot.slane %v556_v29, 7  ;;  %v555_v36 = vld [vmem:[#allocation2 + $0x2e] sm:$0x1] }
  0xb6   : > { %v517_v28 = vsel %vm229_vm2, %v515_v12, %v516_v22  ;;  %v544_v37 = vld [vmem:[#allocation2 + $0x2d] sm:$0x1]  ;;  %v537_v38 = vrot.slane %v534_v33, 7  ;;  %v533_v39 = vld [vmem:[#allocation2 + $0x2c] sm:$0x1]  ;;  %221 = vst.msk [vmem:[#allocation2 + $0x78] sm:$0xff] %vm164_vm0, %v204_v10 }
  0xb7   : > { %v560_v42 = vsel %vm227_vm1, %v559_v34, %v555_v36  ;;  %v567_v47 = vld [vmem:[#allocation2 + $0x3f] sm:$0x1]  ;;  %v598_v50 = vld [vmem:[#allocation2 + $0x42] sm:$0x1]  ;;  %v587_v51 = vld [vmem:[#allocation2 + $0x41] sm:$0x1] }
  0xb8   : > { %v538_v44 = vsel %vm227_vm1, %v537_v38, %v533_v39  ;;  %v561_v48 = vsel %vm229_vm2, %v559_v34, %v560_v42  ;;  %v570_v53 = vrot.slane %v567_v47, 7  ;;  %v566_v57 = vld [vmem:[#allocation2 + $0x2f] sm:$0x1]  ;;  %v621_v62 = vld [vmem:[#allocation2 + $0x54] sm:$0x1] }
  0xb9   : > { %v539_v52 = vsel %vm229_vm2, %v537_v38, %v538_v44  ;;  %v664_v63 = vld [vmem:[#allocation2 + $0x48] sm:$0x1]  ;;  %v665_v0 = vld [vmem:[#allocation2 + $0x58] sm:$0x1]  ;;  %v610_v1 = vld [vmem:[#allocation2 + $0x53] sm:$0x1] }
  0xba   : > { %378 = vrot.lane.b32.xlu1 %v377_v24, %s2061_s24  ;;  %367 = vrot.lane.b32.xlu0 %v366_v25, %s2062_s25  ;;  %v505_v24 = vsel %vm227_vm1, %v504_v17, %v500_v19  ;;  %v578_v25 = vld [vmem:[#allocation2 + $0x40] sm:$0x1]  ;;  %v571_v61 = vsel %vm227_vm1, %v570_v53, %v566_v57  ;;  %v668_v2 = vrot.slane %v665_v0, 7  ;;  %v624_v5 = vrot.slane %v621_v62, 7  ;;  %v631_v7 = vld [vmem:[#allocation2 + $0x45] sm:$0x1] }
  0xbb   : > { %356 = vrot.lane.b32.xlu2 %v355_v27, %s2057_s17  ;;  %v583_v26 = vsel %vm227_vm1, %v582_v23, %v578_v25  ;;  %v528_v27 = vsel %vm229_vm2, %v526_v11, %v527_v21  ;;  %v506_v32 = vsel %vm229_vm2, %v504_v17, %v505_v24  ;;  %v572_v3 = vsel %vm229_vm2, %v570_v53, %v571_v61  ;;  %v620_v8 = vld [vmem:[#allocation2 + $0x44] sm:$0x1]  ;;  %v609_v12 = vld [vmem:[#allocation2 + $0x43] sm:$0x1]  ;;  %v654_v17 = vld [vmem:[#allocation2 + $0x57] sm:$0x1] }
  0xbc   : > { %v584_v31 = vsel %vm229_vm2, %v582_v23, %v583_v26  ;;  %v669_v6 = vsel %vm227_vm1, %v668_v2, %v664_v63  ;;  %v613_v9 = vrot.slane %v610_v1, 7  ;;  %v625_v15 = vsel %vm227_vm1, %v624_v5, %v620_v8  ;;  %v643_v19 = vld [vmem:[#allocation2 + $0x56] sm:$0x1]  ;;  %v673_v22 = vld [vmem:[#allocation2 + $0x49] sm:$0x1] }
  0xbd   : > { %586 = vst.msk [vmem:[%s2212_s27 + $0x10] sm:$0x3] %vm232_vm3, %v584_v31  ;;  %v670_v11 = vsel %vm229_vm2, %v668_v2, %v669_v6  ;;  %v626_v21 = vsel %vm229_vm2, %v624_v5, %v625_v15  ;;  %v657_v24 = vrot.slane %v654_v17, 7  ;;  %v653_v25 = vld [vmem:[#allocation2 + $0x47] sm:$0x1]  ;;  %v646_v26 = vrot.slane %v643_v19, 7 }
  0xbe   : > { %672 = vst.msk [vmem:[%s2212_s27 + $0x14] sm:$0x3] %vm232_vm3, %v670_v11  ;;  %v614_v16 = vsel %vm227_vm1, %v613_v9, %v609_v12  ;;  %v696_v33 = vld [vmem:[#allocation2 + $0x5b] sm:$0x1]  ;;  %v685_v34 = vld [vmem:[#allocation2 + $0x5a] sm:$0x1] }
  0xbf   : > { %v615_v23 = vsel %vm229_vm2, %v613_v9, %v614_v16  ;;  %v658_v29 = vsel %vm227_vm1, %v657_v24, %v653_v25  ;;  %v699_v38 = vrot.slane %v696_v33, 7  ;;  %v706_v39 = vld [vmem:[#allocation2 + $0x4c] sm:$0x1]  ;;  %v684_v42 = vld [vmem:[#allocation2 + $0x4a] sm:$0x1] }
  0xc0   : > { %v717_v63 = vld [vmem:[#allocation2 + $0x4d] sm:$0x1]  ;;  %v783_v1 = vld [vmem:[#allocation2 + $0x73] sm:$0x1]  ;;  %v772_v2 = vld [vmem:[#allocation2 + $0x72] sm:$0x1] }
  0xc1   : > { %v761_v5 = vld [vmem:[#allocation2 + $0x71] sm:$0x1]  ;;  %v838_v8 = vld [vmem:[#allocation2 + $0x78] sm:$0x1]  ;;  %v786_v9 = vrot.slane %v783_v1, 7  ;;  %v775_v10 = vrot.slane %v772_v2, 7 }
  0xc2   : > { %421 = vrot.lane.b32.xlu1 %v420_v35, %s2059_s22  ;;  %400 = vrot.lane.b32.xlu0 %v399_v40, %s2056_s16  ;;  %v548_v35 = vrot.slane %v545_v30, 7  ;;  %v599_v40 = vld [vmem:[#allocation2 + $0x52] sm:$0x1]  ;;  %v841_v11 = vrot.slane %v838_v8, 7  ;;  %v771_v15 = vld [vmem:[#allocation2 + $0x62] sm:$0x1] }
  0xc3   : > { %389 = vrot.lane.b32.xlu2 %v388_v41, %s2060_s23  ;;  %v588_v41 = vld [vmem:[#allocation2 + $0x51] sm:$0x1]  ;;  %v602_v45 = vrot.slane %v599_v40, 7  ;;  %v695_v40 = vld [vmem:[#allocation2 + $0x4b] sm:$0x1]  ;;  %v764_v16 = vrot.slane %v761_v5, 7 }
  0xc4   : > { %v549_v43 = vsel %vm227_vm1, %v548_v35, %v544_v37  ;;  %v591_v46 = vrot.slane %v588_v41, 7  ;;  %v688_v41 = vrot.slane %v685_v34, 7  ;;  %v700_v47 = vsel %vm227_vm1, %v699_v38, %v695_v40  ;;  %v815_v34 = vld [vmem:[#allocation2 + $0x66] sm:$0x1] }
  0xc5   : > { %v550_v49 = vsel %vm229_vm2, %v548_v35, %v549_v43  ;;  %v603_v55 = vsel %vm227_vm1, %v602_v45, %v598_v50  ;;  %v659_v35 = vsel %vm229_vm2, %v657_v24, %v658_v29  ;;  %v752_v43 = vld [vmem:[#allocation2 + $0x70] sm:$0x1]  ;;  %v740_v50 = vld [vmem:[#allocation2 + $0x5f] sm:$0x1] }
  0xc6   : > { %v592_v56 = vsel %vm227_vm1, %v591_v46, %v587_v51  ;;  %v729_v51 = vld [vmem:[#allocation2 + $0x5e] sm:$0x1]  ;;  %v743_v57 = vrot.slane %v740_v50, 7  ;;  %v2358_v29 = vld [vmem:[%s2151_s15 + $0x10] sm:$0xff] }
  0xc7   : > { %931 = vst.msk [vmem:[#allocation2] sm:$0xff] %vm164_vm0, %v2358_v29 }
  0xca   : > { %454 = vrot.lane.b32.xlu1 %v453_v58, %s2062_s25  ;;  %443 = vrot.lane.b32.xlu0 %v442_v59, %s2057_s17  ;;  %v632_v58 = vld [vmem:[#allocation2 + $0x55] sm:$0x1]  ;;  %v604_v59 = vsel %vm229_vm2, %v602_v45, %v603_v55  ;;  %v751_v45 = vld [vmem:[#allocation2 + $0x60] sm:$0x1]  ;;  %v701_v55 = vsel %vm229_vm2, %v699_v38, %v700_v47 }
  0xcb   : > { %432 = vrot.lane.b32.xlu2 %v431_v60, %s2058_s18  ;;  %v593_v60 = vsel %vm229_vm2, %v591_v46, %v592_v56  ;;  %v635_v4 = vrot.slane %v632_v58, 7  ;;  %v732_v58 = vrot.slane %v729_v51, 7 }
  0xd2   : > { %487 = vrot.lane.b32.xlu1 %v486_v13, %s2056_s16  ;;  %476 = vrot.lane.b32.xlu0 %v475_v14, %s2060_s23  ;;  %v674_v13 = vld [vmem:[#allocation2 + $0x59] sm:$0x1]  ;;  %v636_v14 = vsel %vm227_vm1, %v635_v4, %v631_v7  ;;  %v837_v7 = vld [vmem:[#allocation2 + $0x68] sm:$0x1] }
  0xd3   : > { %465 = vrot.lane.b32.xlu2 %v464_v18, %s2061_s24  ;;  %v677_v18 = vrot.slane %v674_v13, 7  ;;  %v637_v20 = vsel %vm229_vm2, %v635_v4, %v636_v14  ;;  %v782_v14 = vld [vmem:[#allocation2 + $0x63] sm:$0x1]  ;;  %v842_v19 = vsel %vm227_vm1, %v841_v11, %v837_v7  ;;  %v879_v7 = vld [vmem:[#allocation2 + $0x6c] sm:$0x1] }
  0xda   : > { %529 = vrot.lane.b32.xlu1 %v528_v27, %s2057_s17  ;;  %518 = vrot.lane.b32.xlu0 %v517_v28, %s2058_s18  ;;  %v678_v27 = vsel %vm227_vm1, %v677_v18, %v673_v22  ;;  %v642_v28 = vld [vmem:[#allocation2 + $0x46] sm:$0x1]  ;;  %v776_v22 = vsel %vm227_vm1, %v775_v10, %v771_v15 }
  0xdb   : > { %507 = vrot.lane.b32.xlu2 %v506_v32, %s2059_s22  ;;  %v679_v30 = vsel %vm229_vm2, %v677_v18, %v678_v27  ;;  %v647_v31 = vsel %vm227_vm1, %v646_v26, %v642_v28  ;;  %v707_v32 = vld [vmem:[#allocation2 + $0x5c] sm:$0x1]  ;;  %v760_v18 = vld [vmem:[#allocation2 + $0x61] sm:$0x1]  ;;  %v816_v27 = vld [vmem:[#allocation2 + $0x76] sm:$0x1] }
  0xdc   : > { %v648_v36 = vsel %vm229_vm2, %v646_v26, %v647_v31  ;;  %v710_v37 = vrot.slane %v707_v32, 7  ;;  %v765_v24 = vsel %vm227_vm1, %v764_v16, %v760_v18  ;;  %v777_v26 = vsel %vm229_vm2, %v775_v10, %v776_v22  ;;  %v805_v28 = vld [vmem:[#allocation2 + $0x75] sm:$0x1]  ;;  %v794_v31 = vld [vmem:[#allocation2 + $0x74] sm:$0x1] }
  0xdd   : > { %v819_v32 = vrot.slane %v816_v27, 7  ;;  %v808_v33 = vrot.slane %v805_v28, 7  ;;  %v912_v22 = vld [vmem:[#allocation2 + $0x6f] sm:$0x1] }
  0xde   : > { %v711_v46 = vsel %vm227_vm1, %v710_v37, %v706_v39  ;;  %v793_v39 = vld [vmem:[#allocation2 + $0x64] sm:$0x1] }
  0xdf   : > { %v712_v54 = vsel %vm229_vm2, %v710_v37, %v711_v46  ;;  %v827_v46 = vld [vmem:[#allocation2 + $0x77] sm:$0x1] }
  0xe2   : > { %562 = vrot.lane.b32.xlu1 %v561_v48, %s2060_s23  ;;  %551 = vrot.lane.b32.xlu0 %v550_v49, %s2061_s24  ;;  %v755_v48 = vrot.slane %v752_v43, 7  ;;  %v689_v49 = vsel %vm227_vm1, %v688_v41, %v684_v42 }
  0xe3   : > { %540 = vrot.lane.b32.xlu2 %v539_v52, %s2062_s25  ;;  %v718_v52 = vld [vmem:[#allocation2 + $0x5d] sm:$0x1]  ;;  %v690_v56 = vsel %vm229_vm2, %v688_v41, %v689_v49  ;;  %v820_v41 = vsel %vm227_vm1, %v819_v32, %v815_v34 }
  0xe4   : > { %v756_v53 = vsel %vm227_vm1, %v755_v48, %v751_v45  ;;  %v721_v61 = vrot.slane %v718_v52, 7  ;;  %v847_v45 = vld [vmem:[#allocation2 + $0x79] sm:$0x1]  ;;  %v821_v47 = vsel %vm229_vm2, %v819_v32, %v820_v41  ;;  %v857_v52 = vld [vmem:[#allocation2 + $0x6a] sm:$0x1] }
  0xe5   : > { %v757_v62 = vsel %vm229_vm2, %v755_v48, %v756_v53  ;;  %v850_v51 = vrot.slane %v847_v45, 7  ;;  %v846_v53 = vld [vmem:[#allocation2 + $0x69] sm:$0x1] }
  0xe6   : > { %759 = vst.msk [vmem:[%s2212_s27 + $0x18] sm:$0x3] %vm232_vm3, %v757_v62  ;;  %v722_v6 = vsel %vm227_vm1, %v721_v61, %v717_v63  ;;  %v891_v62 = vld [vmem:[#allocation2 + $0x7d] sm:$0x1]  ;;  %v880_v63 = vld [vmem:[#allocation2 + $0x7c] sm:$0x1] }
  0xe7   : > { %v723_v17 = vsel %vm229_vm2, %v721_v61, %v722_v6  ;;  %v883_v5 = vrot.slane %v880_v63, 7  ;;  %v890_v6 = vld [vmem:[#allocation2 + $0x6d] sm:$0x1] }
  0xea   : > { %605 = vrot.lane.b32.xlu1 %v604_v59, %s2058_s18  ;;  %594 = vrot.lane.b32.xlu0 %v593_v60, %s2059_s22  ;;  %v739_v59 = vld [vmem:[#allocation2 + $0x4f] sm:$0x1]  ;;  %v728_v60 = vld [vmem:[#allocation2 + $0x4e] sm:$0x1] }
  0xeb   : > { %573 = vrot.lane.b32.xlu2 %v572_v3, %s2056_s16  ;;  %v744_v3 = vsel %vm227_vm1, %v743_v57, %v739_v59  ;;  %v733_v4 = vsel %vm227_vm1, %v732_v58, %v728_v60  ;;  %v851_v60 = vsel %vm227_vm1, %v850_v51, %v846_v53 }
  0xec   : > { %v745_v12 = vsel %vm229_vm2, %v743_v57, %v744_v3  ;;  %v734_v13 = vsel %vm229_vm2, %v732_v58, %v733_v4  ;;  %v826_v57 = vld [vmem:[#allocation2 + $0x67] sm:$0x1]  ;;  %v852_v2 = vsel %vm229_vm2, %v850_v51, %v851_v60  ;;  %v894_v4 = vrot.slane %v891_v62, 7  ;;  %v943_v60 = vld [vmem:[%s2151_s15 + $0x50] sm:$0xff] }
  0xed   : > { %935 = vst.msk [vmem:[#allocation2 + $0x40] sm:$0xff] %vm164_vm0, %v943_v60 }
  0xf2   : > { %638 = vrot.lane.b32.xlu1 %v637_v20, %s2061_s24  ;;  %627 = vrot.lane.b32.xlu0 %v626_v21, %s2062_s25  ;;  %v843_v20 = vsel %vm229_vm2, %v841_v11, %v842_v19  ;;  %v787_v21 = vsel %vm227_vm1, %v786_v9, %v782_v14  ;;  %v868_v11 = vld [vmem:[#allocation2 + $0x6b] sm:$0x1]  ;;  %v884_v14 = vsel %vm227_vm1, %v883_v5, %v879_v7  ;;  %v946_v7 = vld [vmem:[%s2151_s15 + $0x78] sm:$0xff] }
  0xf3   : > { %616 = vrot.lane.b32.xlu2 %v615_v23, %s2057_s17  ;;  %845 = vst.msk [vmem:[%s2212_s27 + $0x1c] sm:$0x3] %vm232_vm3, %v843_v20  ;;  %v788_v25 = vsel %vm229_vm2, %v786_v9, %v787_v21  ;;  %v885_v19 = vsel %vm229_vm2, %v883_v5, %v884_v14  ;;  %vm1076_vm3 = vcmask 913154  }
  0xfa   : > { %680 = vrot.lane.b32.xlu1 %v679_v30, %s2059_s22  ;;  %660 = vrot.lane.b32.xlu0 %v659_v35, %s2056_s16  ;;  %v766_v30 = vsel %vm229_vm2, %v764_v16, %v765_v24  ;;  %v804_v35 = vld [vmem:[#allocation2 + $0x65] sm:$0x1]  ;;  %v913_v16 = vld [vmem:[#allocation2 + $0x7f] sm:$0x1] }
  0xfb   : > { %649 = vrot.lane.b32.xlu2 %v648_v36, %s2060_s23  ;;  %v797_v36 = vrot.slane %v794_v31, 7  ;;  %v809_v42 = vsel %vm227_vm1, %v808_v33, %v804_v35  ;;  %v916_v21 = vrot.slane %v913_v16, 7  ;;  %v941_v31 = vld [vmem:[%s2151_s15 + $0x30] sm:$0xff] }
  0xfc   : > { %v810_v48 = vsel %vm229_vm2, %v808_v33, %v809_v42  ;;  %933 = vst.msk [vmem:[#allocation2 + $0x20] sm:$0xff] %vm164_vm0, %v941_v31 }
  0xfd   : > { %v242_v44 = vpop.permute.xlu2 %241  ;;  %v798_v43 = vsel %vm227_vm1, %v797_v36, %v793_v39  ;;  %v917_v28 = vsel %vm227_vm1, %v916_v21, %v912_v22 }
  0xfe   : > { %245 = vst.msk [vmem:[%s2212_s27] sm:$0x3] %vm244_vm4, %v242_v44  ;;  %v858_v44 = vld [vmem:[#allocation2 + $0x7a] sm:$0x1]  ;;  %v799_v49 = vsel %vm229_vm2, %v797_v36, %v798_v43  ;;  %v918_v32 = vsel %vm229_vm2, %v916_v21, %v917_v28 }
  0xff   : > { %v861_v50 = vrot.slane %v858_v44, 7  ;;  %v942_v43 = vld [vmem:[%s2151_s15 + $0x38] sm:$0xff] }
 0x100   : > { %934 = vst.msk [vmem:[#allocation2 + $0x28] sm:$0xff] %vm164_vm0, %v942_v43 }
 0x101   : > { %v862_v59 = vsel %vm227_vm1, %v861_v50, %v857_v52 }
 0x102   : > { %713 = vrot.lane.b32.xlu1 %v712_v54, %s2062_s25  ;;  %702 = vrot.lane.b32.xlu0 %v701_v55, %s2057_s17  ;;  %v830_v54 = vrot.slane %v827_v46, 7  ;;  %v863_v1 = vsel %vm229_vm2, %v861_v50, %v862_v59 }
 0x103   : > { %691 = vrot.lane.b32.xlu2 %v690_v56, %s2058_s18 }
 0x104   : > { %v831_v61 = vsel %vm227_vm1, %v830_v54, %v826_v57 }
 0x105   : > { %v278_v0 = vpop.permute.xlu2 %277  ;;  %v832_v3 = vsel %vm229_vm2, %v830_v54, %v831_v61 }
 0x10a   : > { %746 = vrot.lane.b32.xlu1 %v745_v12, %s2056_s16  ;;  %735 = vrot.lane.b32.xlu0 %v734_v13, %s2060_s23  ;;  %v895_v13 = vsel %vm227_vm1, %v894_v4, %v890_v6 }
 0x10b   : > { %724 = vrot.lane.b32.xlu2 %v723_v17, %s2061_s24  ;;  %v902_v17 = vld [vmem:[#allocation2 + $0x7e] sm:$0x1]  ;;  %v896_v18 = vsel %vm229_vm2, %v894_v4, %v895_v13 }
 0x10d   : > { %v314_v23 = vpop.permute.xlu2 %313 }
 0x112   : > { %789 = vrot.lane.b32.xlu1 %v788_v25, %s2057_s17  ;;  %778 = vrot.lane.b32.xlu0 %v777_v26, %s2058_s18  ;;  %v901_v26 = vld [vmem:[#allocation2 + $0x6e] sm:$0x1] }
 0x113   : > { %767 = vrot.lane.b32.xlu2 %v766_v30, %s2059_s22  ;;  %938 = vst.msk [vmem:[#allocation2 + $0x68] sm:$0xff] %vm164_vm0, %v946_v7 }
 0x114   : > { %v266_v37 = vpop.permute.xlu1 %265  ;;  %v254_v38 = vpop.permute.xlu0 %253 }
 0x115   : > { %257 = vst.msk [vmem:[%s2212_s27] sm:$0x3] %vm256_vm5, %v254_v38  ;;  %v357_v40 = vpop.permute.xlu2 %356 }
 0x116   : > { %269 = vst.msk [vmem:[%s2212_s27] sm:$0x3] %vm268_vm6, %v266_v37 }
 0x117   : > { %281 = vst.msk [vmem:[%s2212_s27] sm:$0x3] %vm280_vm7, %v278_v0  ;;  %v869_v0 = vld [vmem:[#allocation2 + $0x7b] sm:$0x1] }
 0x118   : > { %v872_v8 = vrot.slane %v869_v0, 7  ;;  %v945_v0 = vld [vmem:[%s2151_s15 + $0x70] sm:$0xff] }
 0x119   : > { %937 = vst.msk [vmem:[#allocation2 + $0x60] sm:$0xff] %vm164_vm0, %v945_v0 }
 0x11a   : > { %822 = vrot.lane.b32.xlu1 %v821_v47, %s2060_s23  ;;  %811 = vrot.lane.b32.xlu0 %v810_v48, %s2061_s24  ;;  %v873_v15 = vsel %vm227_vm1, %v872_v8, %v868_v11 }
 0x11b   : > { %800 = vrot.lane.b32.xlu2 %v799_v49, %s2062_s25  ;;  %v874_v20 = vsel %vm229_vm2, %v872_v8, %v873_v15 }
 0x11c   : > { %v302_v55 = vpop.permute.xlu1 %301  ;;  %v290_v56 = vpop.permute.xlu0 %289 }
 0x11d   : > { %293 = vst.msk [vmem:[%s2212_s27] sm:$0x3] %vm292_vm8, %v290_v56  ;;  %v390_v58 = vpop.permute.xlu2 %389  ;;  %v944_v56 = vld [vmem:[%s2151_s15 + $0x58] sm:$0xff] }
 0x11e   : > { %305 = vst.msk [vmem:[%s2212_s27] sm:$0x3] %vm304_vm9, %v302_v55 }
 0x11f   : > { %317 = vst.msk [vmem:[%s2212_s27] sm:$0x3] %vm316_vm10, %v314_v23  ;;  %v905_v23 = vrot.slane %v902_v17, 7 }
 0x120   : > { %936 = vst.msk [vmem:[#allocation2 + $0x48] sm:$0xff] %vm164_vm0, %v944_v56 }
 0x121   : > { %v906_v30 = vsel %vm227_vm1, %v905_v23, %v901_v26  ;;  %vm1050_vm1 = vcmask 650754  }
 0x122   : > { %864 = vrot.lane.b32.xlu1 %v863_v1, %s2058_s18  ;;  %853 = vrot.lane.b32.xlu0 %v852_v2, %s2059_s22  ;;  %v907_v33 = vsel %vm229_vm2, %v905_v23, %v906_v30  ;;  %vm1063_vm2 = vcmask 781954  }
 0x123   : > { %833 = vrot.lane.b32.xlu2 %v832_v3, %s2056_s16 }
 0x124   : > { %v346_v9 = vpop.permute.xlu1 %345  ;;  %v335_v10 = vpop.permute.xlu0 %334 }
 0x125   : > { %337 = vst.msk [vmem:[%s2212_s27 + $0x4] sm:$0x3] %vm244_vm4, %v335_v10  ;;  %v433_v12 = vpop.permute.xlu2 %432 }
 0x126   : > { %348 = vst.msk [vmem:[%s2212_s27 + $0x4] sm:$0x3] %vm256_vm5, %v346_v9 }
 0x127   : > { %359 = vst.msk [vmem:[%s2212_s27 + $0x4] sm:$0x3] %vm268_vm6, %v357_v40 }
 0x12a   : > { %897 = vrot.lane.b32.xlu1 %v896_v18, %s2061_s24  ;;  %886 = vrot.lane.b32.xlu0 %v885_v19, %s2062_s25  ;;  %v1026_v18 = vld [vmem:[#allocation2 + $0x3] sm:$0x1]  ;;  %v1013_v19 = vld [vmem:[#allocation2 + $0x2] sm:$0x1] }
 0x12b   : > { %875 = vrot.lane.b32.xlu2 %v874_v20, %s2057_s17  ;;  %v1000_v20 = vld [vmem:[#allocation2 + $0x1] sm:$0x1]  ;;  %v1030_v21 = vrot.slane %v1026_v18, 6  ;;  %v1017_v22 = vrot.slane %v1013_v19, 6 }
 0x12c   : > { %v379_v24 = vpop.permute.xlu1 %378  ;;  %v368_v25 = vpop.permute.xlu0 %367  ;;  %v1004_v23 = vrot.slane %v1000_v20, 6 }
 0x12d   : > { %370 = vst.msk [vmem:[%s2212_s27 + $0x4] sm:$0x3] %vm280_vm7, %v368_v25  ;;  %v466_v27 = vpop.permute.xlu2 %465 }
 0x12e   : > { %381 = vst.msk [vmem:[%s2212_s27 + $0x4] sm:$0x3] %vm292_vm8, %v379_v24 }
 0x12f   : > { %392 = vst.msk [vmem:[%s2212_s27 + $0x4] sm:$0x3] %vm304_vm9, %v390_v58 }
 0x132   : > { %955 = vrot.lane.b32.xlu1 %v2358_v29, %s2056_s16  ;;  %919 = vrot.lane.b32.xlu0 %v918_v32, %s2056_s16  ;;  %v940_v29 = vld [vmem:[%s2151_s15 + $0x18] sm:$0xff]  ;;  %v1065_v32 = vld [vmem:[#allocation2 + $0x6] sm:$0x1] }
 0x133   : > { %908 = vrot.lane.b32.xlu2 %v907_v33, %s2060_s23  ;;  %932 = vst.msk [vmem:[#allocation2 + $0x8] sm:$0xff] %vm164_vm0, %v940_v29 }
 0x134   : > { %v422_v34 = vpop.permute.xlu1 %421  ;;  %v401_v35 = vpop.permute.xlu0 %400 }
 0x135   : > { %424 = vst.msk [vmem:[%s2212_s27 + $0x8] sm:$0x3] %vm244_vm4, %v422_v34  ;;  %v508_v36 = vpop.permute.xlu2 %507  ;;  %v1052_v34 = vld [vmem:[#allocation2 + $0x5] sm:$0x1] }
 0x136   : > { %435 = vst.msk [vmem:[%s2212_s27 + $0x8] sm:$0x3] %vm256_vm5, %v433_v12 }
 0x137   : > { %403 = vst.msk [vmem:[%s2212_s27 + $0x4] sm:$0x3] %vm316_vm10, %v401_v35 }
 0x138   : > { %510 = vst.msk [vmem:[%s2212_s27 + $0xc] sm:$0x3] %vm244_vm4, %v508_v36 }
 0x13a   : > { %959 = vrot.lane.b32.xlu0 %v941_v31, %s2056_s16  ;;  %961 = vrot.lane.b32.xlu1 %v942_v43, %s2056_s16  ;;  %v1149_v18 = vld [vmem:[#allocation2 + $0xd] sm:$0x1] }
 0x13b   : > { %957 = vrot.lane.b32.xlu2 %v940_v29, %s2056_s16 }
 0x13c   : > { %v455_v37 = vpop.permute.xlu1 %454  ;;  %v444_v38 = vpop.permute.xlu0 %443 }
 0x13d   : > { %446 = vst.msk [vmem:[%s2212_s27 + $0x8] sm:$0x3] %vm268_vm6, %v444_v38  ;;  %v541_v39 = vpop.permute.xlu2 %540  ;;  %v1039_v38 = vld [vmem:[#allocation2 + $0x4] sm:$0x1] }
 0x13e   : > { %457 = vst.msk [vmem:[%s2212_s27 + $0x8] sm:$0x3] %vm280_vm7, %v455_v37 }
 0x13f   : > { %468 = vst.msk [vmem:[%s2212_s27 + $0x8] sm:$0x3] %vm292_vm8, %v466_v27 }
 0x142   : > { %965 = vrot.lane.b32.xlu0 %v944_v56, %s2056_s16  ;;  %967 = vrot.lane.b32.xlu1 %v945_v0, %s2056_s16  ;;  %v1101_v56 = vld [vmem:[#allocation2 + $0x9] sm:$0x1] }
 0x143   : > { %963 = vrot.lane.b32.xlu2 %v943_v60, %s2056_s16 }
 0x144   : > { %v488_v40 = vpop.permute.xlu1 %487  ;;  %v477_v41 = vpop.permute.xlu0 %476 }
 0x145   : > { %479 = vst.msk [vmem:[%s2212_s27 + $0x8] sm:$0x3] %vm304_vm9, %v477_v41  ;;  %v574_v42 = vpop.permute.xlu2 %573 }
 0x146   : > { %490 = vst.msk [vmem:[%s2212_s27 + $0x8] sm:$0x3] %vm316_vm10, %v488_v40  ;;  %v987_v40 = vld [vmem:[#allocation2] sm:$0x1] }
 0x14b   : > { %969 = vrot.lane.b32.xlu2 %v946_v7, %s2056_s16 }
 0x14c   : > { %v530_v44 = vpop.permute.xlu1 %529  ;;  %v519_v45 = vpop.permute.xlu0 %518 }
 0x14d   : > { %521 = vst.msk [vmem:[%s2212_s27 + $0xc] sm:$0x3] %vm256_vm5, %v519_v45  ;;  %v617_v46 = vpop.permute.xlu2 %616 }
 0x14e   : > { %532 = vst.msk [vmem:[%s2212_s27 + $0xc] sm:$0x3] %vm268_vm6, %v530_v44  ;;  %v1069_v44 = vrot.slane %v1065_v32, 6 }
 0x14f   : > { %543 = vst.msk [vmem:[%s2212_s27 + $0xc] sm:$0x3] %vm280_vm7, %v541_v39 }
 0x154   : > { %v563_v47 = vpop.permute.xlu1 %562  ;;  %v552_v48 = vpop.permute.xlu0 %551 }
 0x155   : > { %554 = vst.msk [vmem:[%s2212_s27 + $0xc] sm:$0x3] %vm292_vm8, %v552_v48  ;;  %v650_v49 = vpop.permute.xlu2 %649  ;;  %v1043_v48 = vrot.slane %v1039_v38, 6 }
 0x156   : > { %565 = vst.msk [vmem:[%s2212_s27 + $0xc] sm:$0x3] %vm304_vm9, %v563_v47 }
 0x157   : > { %576 = vst.msk [vmem:[%s2212_s27 + $0xc] sm:$0x3] %vm316_vm10, %v574_v42 }
 0x15c   : > { %v606_v50 = vpop.permute.xlu1 %605  ;;  %v595_v51 = vpop.permute.xlu0 %594 }
 0x15d   : > { %597 = vst.msk [vmem:[%s2212_s27 + $0x10] sm:$0x3] %vm244_vm4, %v595_v51  ;;  %v692_v52 = vpop.permute.xlu2 %691  ;;  %v991_v51 = vrot.slane %v987_v40, 6 }
 0x15e   : > { %608 = vst.msk [vmem:[%s2212_s27 + $0x10] sm:$0x3] %vm256_vm5, %v606_v50  ;;  %v1113_v50 = vld [vmem:[#allocation2 + $0xa] sm:$0x1] }
 0x15f   : > { %619 = vst.msk [vmem:[%s2212_s27 + $0x10] sm:$0x3] %vm268_vm6, %v617_v46  ;;  %v1056_v46 = vrot.slane %v1052_v34, 6 }
 0x164   : > { %v639_v53 = vpop.permute.xlu1 %638  ;;  %v628_v54 = vpop.permute.xlu0 %627 }
 0x165   : > { %630 = vst.msk [vmem:[%s2212_s27 + $0x10] sm:$0x3] %vm280_vm7, %v628_v54  ;;  %v725_v55 = vpop.permute.xlu2 %724 }
 0x166   : > { %641 = vst.msk [vmem:[%s2212_s27 + $0x10] sm:$0x3] %vm292_vm8, %v639_v53  ;;  %v1091_v53 = vld [vmem:[#allocation2 + $0x8] sm:$0x1] }
 0x167   : > { %652 = vst.msk [vmem:[%s2212_s27 + $0x10] sm:$0x3] %vm304_vm9, %v650_v49 }
 0x16c   : > { %v681_v57 = vpop.permute.xlu1 %680  ;;  %v661_v58 = vpop.permute.xlu0 %660 }
 0x16d   : > { %683 = vst.msk [vmem:[%s2212_s27 + $0x14] sm:$0x3] %vm244_vm4, %v681_v57  ;;  %v768_v59 = vpop.permute.xlu2 %767 }
 0x16e   : > { %694 = vst.msk [vmem:[%s2212_s27 + $0x14] sm:$0x3] %vm256_vm5, %v692_v52 }
 0x16f   : > { %663 = vst.msk [vmem:[%s2212_s27 + $0x10] sm:$0x3] %vm316_vm10, %v661_v58 }
 0x170   : > { %770 = vst.msk [vmem:[%s2212_s27 + $0x18] sm:$0x3] %vm244_vm4, %v768_v59 }
 0x174   : > { %v714_v61 = vpop.permute.xlu1 %713  ;;  %v703_v62 = vpop.permute.xlu0 %702 }
 0x175   : > { %705 = vst.msk [vmem:[%s2212_s27 + $0x14] sm:$0x3] %vm268_vm6, %v703_v62  ;;  %v801_v63 = vpop.permute.xlu2 %800 }
 0x176   : > { %716 = vst.msk [vmem:[%s2212_s27 + $0x14] sm:$0x3] %vm280_vm7, %v714_v61  ;;  %v1078_v61 = vld [vmem:[#allocation2 + $0x7] sm:$0x1] }
 0x177   : > { %727 = vst.msk [vmem:[%s2212_s27 + $0x14] sm:$0x3] %vm292_vm8, %v725_v55 }
 0x17c   : > { %v747_v1 = vpop.permute.xlu1 %746  ;;  %v736_v2 = vpop.permute.xlu0 %735 }
 0x17d   : > { %738 = vst.msk [vmem:[%s2212_s27 + $0x14] sm:$0x3] %vm304_vm9, %v736_v2  ;;  %v834_v3 = vpop.permute.xlu2 %833 }
 0x17e   : > { %749 = vst.msk [vmem:[%s2212_s27 + $0x14] sm:$0x3] %vm316_vm10, %v747_v1  ;;  %v1117_v1 = vrot.slane %v1113_v50, 6 }
 0x184   : > { %v790_v4 = vpop.permute.xlu1 %789  ;;  %v779_v5 = vpop.permute.xlu0 %778 }
 0x185   : > { %781 = vst.msk [vmem:[%s2212_s27 + $0x18] sm:$0x3] %vm256_vm5, %v779_v5  ;;  %v876_v6 = vpop.permute.xlu2 %875 }
 0x186   : > { %792 = vst.msk [vmem:[%s2212_s27 + $0x18] sm:$0x3] %vm268_vm6, %v790_v4 }
 0x187   : > { %803 = vst.msk [vmem:[%s2212_s27 + $0x18] sm:$0x3] %vm280_vm7, %v801_v63  ;;  %v1095_v63 = vrot.slane %v1091_v53, 6 }
 0x18c   : > { %v823_v8 = vpop.permute.xlu1 %822  ;;  %v812_v9 = vpop.permute.xlu0 %811 }
 0x18d   : > { %814 = vst.msk [vmem:[%s2212_s27 + $0x18] sm:$0x3] %vm292_vm8, %v812_v9  ;;  %v909_v10 = vpop.permute.xlu2 %908 }
 0x18e   : > { %825 = vst.msk [vmem:[%s2212_s27 + $0x18] sm:$0x3] %vm304_vm9, %v823_v8 }
 0x18f   : > { %836 = vst.msk [vmem:[%s2212_s27 + $0x18] sm:$0x3] %vm316_vm10, %v834_v3  ;;  %v1105_v3 = vrot.slane %v1101_v56, 6 }
 0x194   : > { %v865_v11 = vpop.permute.xlu1 %864  ;;  %v854_v12 = vpop.permute.xlu0 %853 }
 0x195   : > { %856 = vst.msk [vmem:[%s2212_s27 + $0x1c] sm:$0x3] %vm244_vm4, %v854_v12  ;;  %v958_v13 = vpop.permute.xlu2 %957  ;;  %v1082_v12 = vrot.slane %v1078_v61, 6  ;;  %vm1089_vm4 = vcmask 1044354  }
 0x196   : > { %867 = vst.msk [vmem:[%s2212_s27 + $0x1c] sm:$0x3] %vm256_vm5, %v865_v11 }
 0x197   : > { %878 = vst.msk [vmem:[%s2212_s27 + $0x1c] sm:$0x3] %vm268_vm6, %v876_v6 }
 0x198   : > { %980 = vst.msk [vmem:[#allocation2 + $0x18] sm:$0xff] %vm164_vm0, %v958_v13 }
 0x19c   : > { %v898_v14 = vpop.permute.xlu1 %897  ;;  %v887_v15 = vpop.permute.xlu0 %886 }
 0x19d   : > { %889 = vst.msk [vmem:[%s2212_s27 + $0x1c] sm:$0x3] %vm280_vm7, %v887_v15 }
 0x19e   : > { %900 = vst.msk [vmem:[%s2212_s27 + $0x1c] sm:$0x3] %vm292_vm8, %v898_v14 }
 0x19f   : > { %911 = vst.msk [vmem:[%s2212_s27 + $0x1c] sm:$0x3] %vm304_vm9, %v909_v10  ;;  %v1092_v54 = vld [vmem:[#allocation2 + $0x18] sm:$0x1]  ;;  %v1114_v55 = vld [vmem:[#allocation2 + $0x1a] sm:$0x1] }
 0x1a0   : > { %v1102_v57 = vld [vmem:[#allocation2 + $0x19] sm:$0x1]  ;;  %v1096_v0 = vrot.slane %v1092_v54, 5  ;;  %v1118_v2 = vrot.slane %v1114_v55, 5 }
 0x1a1   : > { %v1106_v4 = vrot.slane %v1102_v57, 5 }
 0x1a2   : > { %v1097_v9 = vsel %vm993_vm11, %v1096_v0, %v1095_v63 }
 0x1a3   : > { %v1098_v15 = vsel %vm995_vm12, %v1096_v0, %v1097_v9 }
 0x1a4   : > { %v956_v16 = vpop.permute.xlu1 %955  ;;  %v920_v17 = vpop.permute.xlu0 %919  ;;  %1100 = vst.msk [vmem:[%s2212_s27 + $0x4] sm:$0xc] %vm998_vm13, %v1098_v15 }
 0x1a5   : > { %979 = vst.msk [vmem:[#allocation2 + $0x10] sm:$0xff] %vm164_vm0, %v956_v16  ;;  %v1119_v16 = vsel %vm993_vm11, %v1118_v2, %v1117_v1  ;;  %v1207_v1 = vld [vmem:[#allocation2 + $0x22] sm:$0x1] }
 0x1a6   : > { %922 = vst.msk [vmem:[%s2212_s27 + $0x1c] sm:$0x3] %vm316_vm10, %v920_v17  ;;  %v1107_v17 = vsel %vm993_vm11, %v1106_v4, %v1105_v3  ;;  %v1120_v19 = vsel %vm995_vm12, %v1118_v2, %v1119_v16  ;;  %v1267_v16 = vld [vmem:[#allocation2 + $0x27] sm:$0x1] }
 0x1a7   : > { %v1108_v20 = vsel %vm995_vm12, %v1106_v4, %v1107_v17 }
 0x1ac   : > { %v1027_v24 = vld [vmem:[#allocation2 + $0x13] sm:$0x1]  ;;  %v1014_v25 = vld [vmem:[#allocation2 + $0x12] sm:$0x1]  ;;  %v1001_v26 = vld [vmem:[#allocation2 + $0x11] sm:$0x1]  ;;  %v960_v27 = vpop.permute.xlu0 %959  ;;  %v962_v14 = vpop.permute.xlu1 %961 }
 0x1ad   : > { %v1031_v28 = vrot.slane %v1027_v24, 5  ;;  %v1018_v30 = vrot.slane %v1014_v25, 5  ;;  %v1005_v31 = vrot.slane %v1001_v26, 5  ;;  %981 = vst.msk [vmem:[#allocation2 + $0x30] sm:$0xff] %vm164_vm0, %v960_v27  ;;  %v1066_v33 = vld [vmem:[#allocation2 + $0x16] sm:$0x1] }
 0x1ae   : > { %v1053_v35 = vld [vmem:[#allocation2 + $0x15] sm:$0x1]  ;;  %v1040_v39 = vld [vmem:[#allocation2 + $0x14] sm:$0x1]  ;;  %v1070_v45 = vrot.slane %v1066_v33, 5  ;;  %982 = vst.msk [vmem:[#allocation2 + $0x38] sm:$0xff] %vm164_vm0, %v962_v14 }
 0x1af   : > { %v1032_v36 = vsel %vm993_vm11, %v1031_v28, %v1030_v21  ;;  %v1019_v29 = vsel %vm993_vm11, %v1018_v30, %v1017_v22  ;;  %v1006_v37 = vsel %vm993_vm11, %v1005_v31, %v1004_v23  ;;  %v1057_v47 = vrot.slane %v1053_v35, 5  ;;  %v988_v52 = vld [vmem:[#allocation2 + $0x10] sm:$0x1]  ;;  %v1079_v5 = vld [vmem:[#allocation2 + $0x17] sm:$0x1] }
 0x1b0   : > { %v1033_v41 = vsel %vm995_vm12, %v1031_v28, %v1032_v36  ;;  %v1020_v42 = vsel %vm995_vm12, %v1018_v30, %v1019_v29  ;;  %v1007_v43 = vsel %vm995_vm12, %v1005_v31, %v1006_v37  ;;  %v1044_v49 = vrot.slane %v1040_v39, 5  ;;  %v1150_v22 = vld [vmem:[#allocation2 + $0x1d] sm:$0x1]  ;;  %v1137_v23 = vld [vmem:[#allocation2 + $0xc] sm:$0x1] }
 0x1b1   : > { %1034 = vrot.lane.b32.xlu2 %v1033_v41, %s2057_s17  ;;  %1021 = vrot.lane.b32.xlu1 %v1020_v42, %s2058_s18  ;;  %v1071_v58 = vsel %vm993_vm11, %v1070_v45, %v1069_v44  ;;  %v1058_v59 = vsel %vm993_vm11, %v1057_v47, %v1056_v46  ;;  %v992_v62 = vrot.slane %v988_v52, 5  ;;  %v1083_v13 = vrot.slane %v1079_v5, 5  ;;  %v1138_v24 = vld [vmem:[#allocation2 + $0x1c] sm:$0x1]  ;;  %v1125_v25 = vld [vmem:[#allocation2 + $0xb] sm:$0x1] }
 0x1b2   : > { %1008 = vrot.lane.b32.xlu0 %v1007_v43, %s2059_s22  ;;  %v1045_v60 = vsel %vm993_vm11, %v1044_v49, %v1043_v48  ;;  %v1072_v6 = vsel %vm995_vm12, %v1070_v45, %v1071_v58  ;;  %v1059_v7 = vsel %vm995_vm12, %v1057_v47, %v1058_v59  ;;  %v1126_v26 = vld [vmem:[#allocation2 + $0x1b] sm:$0x1]  ;;  %v1153_v27 = vrot.slane %v1149_v18, 6  ;;  %v1195_v35 = vld [vmem:[#allocation2 + $0x21] sm:$0x1]  ;;  %v964_v58 = vpop.permute.xlu2 %963 }
 0x1b3   : > { %v994_v8 = vsel %vm993_vm11, %v992_v62, %v991_v51  ;;  %v1046_v10 = vsel %vm995_vm12, %v1044_v49, %v1045_v60  ;;  %v1084_v21 = vsel %vm993_vm11, %v1083_v13, %v1082_v12  ;;  %v1154_v30 = vrot.slane %v1150_v22, 5  ;;  %v1185_v29 = vld [vmem:[#allocation2 + $0x20] sm:$0x1]  ;;  %v1173_v43 = vld [vmem:[#allocation2 + $0xf] sm:$0x1]  ;;  %983 = vst.msk [vmem:[#allocation2 + $0x50] sm:$0xff] %vm164_vm0, %v964_v58 }
 0x1b4   : > { %v996_v11 = vsel %vm995_vm12, %v992_v62, %v994_v8  ;;  %v1085_v28 = vsel %vm995_vm12, %v1083_v13, %v1084_v21  ;;  %v1141_v31 = vrot.slane %v1137_v23, 6  ;;  %v1142_v32 = vrot.slane %v1138_v24, 5  ;;  %v1196_v36 = vld [vmem:[#allocation2 + $0x31] sm:$0x1]  ;;  %v1186_v37 = vld [vmem:[#allocation2 + $0x30] sm:$0x1] }
 0x1b5   : > { %999 = vst.msk [vmem:[%s2212_s27] sm:$0xc] %vm998_vm13, %v996_v11  ;;  %v1129_v33 = vrot.slane %v1125_v25, 6  ;;  %v1130_v34 = vrot.slane %v1126_v26, 5  ;;  %v1155_v38 = vsel %vm993_vm11, %v1154_v30, %v1153_v27  ;;  %v1189_v40 = vrot.slane %v1185_v29, 6 }
 0x1b6   : > { %v1143_v39 = vsel %vm993_vm11, %v1142_v32, %v1141_v31  ;;  %v1190_v41 = vrot.slane %v1186_v37, 5  ;;  %v1174_v44 = vld [vmem:[#allocation2 + $0x1f] sm:$0x1]  ;;  %v1199_v45 = vrot.slane %v1195_v35, 6  ;;  %v1200_v46 = vrot.slane %v1196_v36, 5  ;;  %v966_v37 = vpop.permute.xlu0 %965 }
 0x1b7   : > { %v1131_v42 = vsel %vm993_vm11, %v1130_v34, %v1129_v33  ;;  %v1161_v47 = vld [vmem:[#allocation2 + $0xe] sm:$0x1]  ;;  %v1162_v48 = vld [vmem:[#allocation2 + $0x1e] sm:$0x1]  ;;  %v1156_v50 = vsel %vm995_vm12, %v1154_v30, %v1155_v38  ;;  %v1144_v51 = vsel %vm995_vm12, %v1142_v32, %v1143_v39  ;;  %v1177_v53 = vrot.slane %v1173_v43, 6  ;;  %984 = vst.msk [vmem:[#allocation2 + $0x58] sm:$0xff] %vm164_vm0, %v966_v37 }
 0x1b8   : > { %v1191_v49 = vsel %vm993_vm11, %v1190_v41, %v1189_v40  ;;  %v1132_v52 = vsel %vm995_vm12, %v1130_v34, %v1131_v42  ;;  %v1178_v54 = vrot.slane %v1174_v44, 5  ;;  %v1165_v56 = vrot.slane %v1161_v47, 6  ;;  %v1231_v60 = vld [vmem:[#allocation2 + $0x24] sm:$0x1]  ;;  %v1232_v61 = vld [vmem:[#allocation2 + $0x34] sm:$0x1] }
 0x1b9   : > { %1073 = vrot.lane.b32.xlu2 %v1072_v6, %s2060_s23  ;;  %1060 = vrot.lane.b32.xlu1 %v1059_v7, %s2061_s24  ;;  %v1192_v55 = vsel %vm995_vm12, %v1190_v41, %v1191_v49  ;;  %v1166_v57 = vrot.slane %v1162_v48, 5  ;;  %v1201_v59 = vsel %vm993_vm11, %v1200_v46, %v1199_v45  ;;  %v1219_v62 = vld [vmem:[#allocation2 + $0x23] sm:$0x1]  ;;  %v1220_v63 = vld [vmem:[#allocation2 + $0x33] sm:$0x1]  ;;  %v1235_v5 = vrot.slane %v1231_v60, 6 }
 0x1ba   : > { %1047 = vrot.lane.b32.xlu0 %v1046_v10, %s2062_s25  ;;  %1194 = vst.msk [vmem:[%s2212_s27 + $0x8] sm:$0xc] %vm998_vm13, %v1192_v55  ;;  %v1179_v0 = vsel %vm993_vm11, %v1178_v54, %v1177_v53  ;;  %v1208_v2 = vld [vmem:[#allocation2 + $0x32] sm:$0x1]  ;;  %v1202_v3 = vsel %vm995_vm12, %v1200_v46, %v1201_v59  ;;  %v1236_v6 = vrot.slane %v1232_v61, 5  ;;  %v1223_v7 = vrot.slane %v1219_v62, 6 }
 0x1bb   : > { %v1167_v4 = vsel %vm993_vm11, %v1166_v57, %v1165_v56  ;;  %v1224_v8 = vrot.slane %v1220_v63, 5  ;;  %v1180_v9 = vsel %vm995_vm12, %v1178_v54, %v1179_v0  ;;  %v1211_v10 = vrot.slane %v1207_v1, 6  ;;  %v1268_v17 = vld [vmem:[#allocation2 + $0x37] sm:$0x1]  ;;  %v1279_v18 = vld [vmem:[#allocation2 + $0x28] sm:$0x1]  ;;  %v970_v56 = vpop.permute.xlu2 %969 }
 0x1bc   : > { %v1212_v11 = vrot.slane %v1208_v2, 5  ;;  %v1168_v12 = vsel %vm995_vm12, %v1166_v57, %v1167_v4  ;;  %v1237_v13 = vsel %vm993_vm11, %v1236_v6, %v1235_v5  ;;  %v1255_v22 = vld [vmem:[#allocation2 + $0x26] sm:$0x1]  ;;  %v1256_v23 = vld [vmem:[#allocation2 + $0x36] sm:$0x1]  ;;  %v1283_v24 = vrot.slane %v1279_v18, 6 }
 0x1bd   : > { %v1225_v14 = vsel %vm993_vm11, %v1224_v8, %v1223_v7  ;;  %v1243_v27 = vld [vmem:[#allocation2 + $0x25] sm:$0x1]  ;;  %v1271_v30 = vrot.slane %v1267_v16, 6  ;;  %v1272_v32 = vrot.slane %v1268_v17, 5  ;;  %v1259_v33 = vrot.slane %v1255_v22, 6  ;;  %986 = vst.msk [vmem:[#allocation2 + $0x78] sm:$0xff] %vm164_vm0, %v970_v56 }
 0x1be   : > { %v1213_v15 = vsel %vm993_vm11, %v1212_v11, %v1211_v10  ;;  %v1226_v21 = vsel %vm995_vm12, %v1224_v8, %v1225_v14  ;;  %v1260_v34 = vrot.slane %v1256_v23, 5  ;;  %v1247_v36 = vrot.slane %v1243_v27, 6  ;;  %v1313_v38 = vld [vmem:[#allocation2 + $0x2b] sm:$0x1]  ;;  %v1314_v39 = vld [vmem:[#allocation2 + $0x3b] sm:$0x1] }
 0x1bf   : > { %v1214_v26 = vsel %vm995_vm12, %v1212_v11, %v1213_v15  ;;  %v1301_v40 = vld [vmem:[#allocation2 + $0x2a] sm:$0x1]  ;;  %v1302_v41 = vld [vmem:[#allocation2 + $0x3a] sm:$0x1]  ;;  %v1273_v42 = vsel %vm993_vm11, %v1272_v32, %v1271_v30  ;;  %v1289_v44 = vld [vmem:[#allocation2 + $0x29] sm:$0x1] }
 0x1c0   : > { %v1261_v43 = vsel %vm993_vm11, %v1260_v34, %v1259_v33  ;;  %v1290_v45 = vld [vmem:[#allocation2 + $0x39] sm:$0x1]  ;;  %v1317_v47 = vrot.slane %v1313_v38, 6  ;;  %v1318_v48 = vrot.slane %v1314_v39, 5  ;;  %v1305_v49 = vrot.slane %v1301_v40, 6 }
 0x1c1   : > { %1121 = vrot.lane.b32.xlu2 %v1120_v19, %s2058_s18  ;;  %1109 = vrot.lane.b32.xlu1 %v1108_v20, %s2059_s22  ;;  %v1280_v19 = vld [vmem:[#allocation2 + $0x38] sm:$0x1]  ;;  %v1238_v20 = vsel %vm995_vm12, %v1236_v6, %v1237_v13  ;;  %v1293_v53 = vrot.slane %v1289_v44, 6  ;;  %v1294_v54 = vrot.slane %v1290_v45, 5  ;;  %v1349_v60 = vld [vmem:[#allocation2 + $0x2e] sm:$0x1] }
 0x1c2   : > { %1086 = vrot.lane.b32.xlu0 %v1085_v28, %s2056_s16  ;;  %v1284_v25 = vrot.slane %v1280_v19, 5  ;;  %v1244_v28 = vld [vmem:[#allocation2 + $0x35] sm:$0x1]  ;;  %v1319_v57 = vsel %vm993_vm11, %v1318_v48, %v1317_v47  ;;  %v1350_v61 = vld [vmem:[#allocation2 + $0x3e] sm:$0x1]  ;;  %v968_v19 = vpop.permute.xlu1 %967 }
 0x1c3   : > { %v1248_v29 = vrot.slane %v1244_v28, 5  ;;  %v1295_v59 = vsel %vm993_vm11, %v1294_v54, %v1293_v53  ;;  %v1337_v62 = vld [vmem:[#allocation2 + $0x2d] sm:$0x1]  ;;  %v1320_v63 = vsel %vm995_vm12, %v1318_v48, %v1319_v57  ;;  %v1338_v1 = vld [vmem:[#allocation2 + $0x3d] sm:$0x1]  ;;  %v1354_v10 = vrot.slane %v1350_v61, 5 }
 0x1c4   : > { %v1285_v31 = vsel %vm993_vm11, %v1284_v25, %v1283_v24  ;;  %v1373_v2 = vld [vmem:[#allocation2 + $0x40] sm:$0x1]  ;;  %v1296_v4 = vsel %vm995_vm12, %v1294_v54, %v1295_v59  ;;  %v1325_v5 = vld [vmem:[#allocation2 + $0x2c] sm:$0x1]  ;;  %v1326_v6 = vld [vmem:[#allocation2 + $0x3c] sm:$0x1] }
 0x1c5   : > { %v1286_v35 = vsel %vm995_vm12, %v1284_v25, %v1285_v31  ;;  %v1249_v46 = vsel %vm993_vm11, %v1248_v29, %v1247_v36  ;;  %v1377_v7 = vrot.slane %v1373_v2, 6  ;;  %v1341_v11 = vrot.slane %v1337_v62, 6  ;;  %v1395_v17 = vld [vmem:[#allocation2 + $0x42] sm:$0x1]  ;;  %v1396_v18 = vld [vmem:[#allocation2 + $0x52] sm:$0x1] }
 0x1c6   : > { %1288 = vst.msk [vmem:[%s2212_s27 + $0xc] sm:$0xc] %vm998_vm13, %v1286_v35  ;;  %v1250_v55 = vsel %vm995_vm12, %v1248_v29, %v1249_v46  ;;  %v1329_v14 = vrot.slane %v1325_v5, 6  ;;  %v1330_v15 = vrot.slane %v1326_v6, 5  ;;  %v1361_v25 = vld [vmem:[#allocation2 + $0x2f] sm:$0x1] }
 0x1c7   : > { %985 = vst.msk [vmem:[#allocation2 + $0x70] sm:$0xff] %vm164_vm0, %v968_v19  ;;  %v1399_v27 = vrot.slane %v1395_v17, 6  ;;  %v1400_v28 = vrot.slane %v1396_v18, 5  ;;  %v1365_v35 = vrot.slane %v1361_v25, 6  ;;  %v1431_v39 = vld [vmem:[#allocation2 + $0x45] sm:$0x1] }
 0x1c8   : > { %v1331_v24 = vsel %vm993_vm11, %v1330_v15, %v1329_v14  ;;  %v1420_v44 = vld [vmem:[#allocation2 + $0x54] sm:$0x1]  ;;  %v1407_v45 = vld [vmem:[#allocation2 + $0x43] sm:$0x1]  ;;  %v1408_v46 = vld [vmem:[#allocation2 + $0x53] sm:$0x1] }
 0x1c9   : > { %1157 = vrot.lane.b32.xlu2 %v1156_v50, %s2061_s24  ;;  %1145 = vrot.lane.b32.xlu1 %v1144_v51, %s2062_s25  ;;  %v1306_v50 = vrot.slane %v1302_v41, 5  ;;  %v1274_v51 = vsel %vm995_vm12, %v1272_v32, %v1273_v42  ;;  %v1401_v29 = vsel %vm993_vm11, %v1400_v28, %v1399_v27  ;;  %v1432_v42 = vld [vmem:[#allocation2 + $0x55] sm:$0x1]  ;;  %v1435_v48 = vrot.slane %v1431_v39, 6  ;;  %v1477_v54 = vld [vmem:[#allocation2 + $0x49] sm:$0x1] }
 0x1ca   : > { %1133 = vrot.lane.b32.xlu0 %v1132_v52, %s2057_s17  ;;  %v1262_v52 = vsel %vm995_vm12, %v1260_v34, %v1261_v43  ;;  %v1332_v34 = vsel %vm995_vm12, %v1330_v15, %v1331_v24  ;;  %v1402_v40 = vsel %vm995_vm12, %v1400_v28, %v1401_v29  ;;  %v1419_v43 = vld [vmem:[#allocation2 + $0x44] sm:$0x1]  ;;  %v1412_v53 = vrot.slane %v1408_v46, 5  ;;  %v1468_v59 = vld [vmem:[#allocation2 + $0x58] sm:$0x1] }
 0x1cb   : > { %v1307_v58 = vsel %vm993_vm11, %v1306_v50, %v1305_v49  ;;  %v1436_v49 = vrot.slane %v1432_v42, 5  ;;  %v1455_v61 = vld [vmem:[#allocation2 + $0x47] sm:$0x1]  ;;  %v1456_v62 = vld [vmem:[#allocation2 + $0x57] sm:$0x1]  ;;  %vm1037_vm0 = vcmask 519554  }
 0x1cc   : > { %v1308_v0 = vsel %vm995_vm12, %v1306_v50, %v1307_v58  ;;  %v1423_v50 = vrot.slane %v1419_v43, 6  ;;  %v1467_v58 = vld [vmem:[#allocation2 + $0x48] sm:$0x1]  ;;  %v1513_v15 = vld [vmem:[#allocation2 + $0x4c] sm:$0x1] }
 0x1cd   : > { %v1437_v56 = vsel %vm993_vm11, %v1436_v49, %v1435_v48  ;;  %v1501_v17 = vld [vmem:[#allocation2 + $0x4b] sm:$0x1]  ;;  %v1502_v18 = vld [vmem:[#allocation2 + $0x5b] sm:$0x1]  ;;  %v1517_v24 = vrot.slane %v1513_v15, 6 }
 0x1ce   : > { %v1438_v5 = vsel %vm995_vm12, %v1436_v49, %v1437_v56  ;;  %v1506_v27 = vrot.slane %v1502_v18, 5  ;;  %v1538_v43 = vld [vmem:[#allocation2 + $0x5e] sm:$0x1]  ;;  %v1584_v56 = vld [vmem:[#allocation2 + $0x72] sm:$0x1] }
 0x1cf   : > { %v1542_v48 = vrot.slane %v1538_v43, 5  ;;  %v1713_v43 = vld [vmem:[#allocation2 + $0x6d] sm:$0x1] }
 0x1d1   : > { %1203 = vrot.lane.b32.xlu2 %v1202_v3, %s2059_s22  ;;  %1181 = vrot.lane.b32.xlu1 %v1180_v9, %s2056_s16  ;;  %v1374_v3 = vld [vmem:[#allocation2 + $0x50] sm:$0x1]  ;;  %v1353_v9 = vrot.slane %v1349_v60, 6 }
 0x1d2   : > { %1169 = vrot.lane.b32.xlu0 %v1168_v12, %s2060_s23  ;;  %v1378_v8 = vrot.slane %v1374_v3, 5  ;;  %v1342_v12 = vrot.slane %v1338_v1, 5  ;;  %v1481_v1 = vrot.slane %v1477_v54, 6  ;;  %v1443_v3 = vld [vmem:[#allocation2 + $0x46] sm:$0x1] }
 0x1d3   : > { %v1355_v22 = vsel %vm993_vm11, %v1354_v10, %v1353_v9  ;;  %v1459_v9 = vrot.slane %v1455_v61, 6  ;;  %v1583_v54 = vld [vmem:[#allocation2 + $0x62] sm:$0x1]  ;;  %v1655_v61 = vld [vmem:[#allocation2 + $0x68] sm:$0x1] }
 0x1d4   : > { %v1379_v13 = vsel %vm993_vm11, %v1378_v8, %v1377_v7  ;;  %v1343_v23 = vsel %vm993_vm11, %v1342_v12, %v1341_v11  ;;  %v1356_v32 = vsel %vm995_vm12, %v1354_v10, %v1355_v22  ;;  %v1460_v10 = vrot.slane %v1456_v62, 5  ;;  %v1656_v62 = vld [vmem:[#allocation2 + $0x78] sm:$0x1] }
 0x1d5   : > { %v1380_v16 = vsel %vm995_vm12, %v1378_v8, %v1379_v13  ;;  %v1344_v33 = vsel %vm995_vm12, %v1342_v12, %v1343_v23  ;;  %v1447_v12 = vrot.slane %v1443_v3, 6  ;;  %v1666_v3 = vld [vmem:[#allocation2 + $0x79] sm:$0x1] }
 0x1d6   : > { %1382 = vst.msk [vmem:[%s2212_s27 + $0x10] sm:$0xc] %vm998_vm13, %v1380_v16  ;;  %v1514_v16 = vld [vmem:[#allocation2 + $0x5c] sm:$0x1]  ;;  %v1461_v19 = vsel %vm993_vm11, %v1460_v10, %v1459_v9  ;;  %v1587_v9 = vrot.slane %v1583_v54, 6 }
 0x1d7   : > { %v1518_v25 = vrot.slane %v1514_v16, 5  ;;  %v1462_v28 = vsel %vm995_vm12, %v1460_v10, %v1461_v19  ;;  %v1588_v10 = vrot.slane %v1584_v56, 5 }
 0x1d9   : > { %1239 = vrot.lane.b32.xlu2 %v1238_v20, %s2062_s25  ;;  %1227 = vrot.lane.b32.xlu1 %v1226_v21, %s2057_s17  ;;  %v1383_v20 = vld [vmem:[#allocation2 + $0x41] sm:$0x1]  ;;  %v1384_v21 = vld [vmem:[#allocation2 + $0x51] sm:$0x1] }
 0x1da   : > { %1215 = vrot.lane.b32.xlu0 %v1214_v26, %s2058_s18  ;;  %v1362_v26 = vld [vmem:[#allocation2 + $0x3f] sm:$0x1]  ;;  %v1387_v30 = vrot.slane %v1383_v20, 6  ;;  %v1388_v31 = vrot.slane %v1384_v21, 5  ;;  %v1489_v20 = vld [vmem:[#allocation2 + $0x4a] sm:$0x1] }
 0x1db   : > { %v1366_v36 = vrot.slane %v1362_v26, 5  ;;  %v1490_v21 = vld [vmem:[#allocation2 + $0x5a] sm:$0x1]  ;;  %v1505_v26 = vrot.slane %v1501_v17, 6 }
 0x1dc   : > { %v1389_v37 = vsel %vm993_vm11, %v1388_v31, %v1387_v30  ;;  %v1493_v30 = vrot.slane %v1489_v20, 6  ;;  %v1589_v20 = vsel %vm993_vm11, %v1588_v10, %v1587_v9 }
 0x1dd   : > { %v1367_v38 = vsel %vm993_vm11, %v1366_v36, %v1365_v35  ;;  %v1390_v41 = vsel %vm995_vm12, %v1388_v31, %v1389_v37  ;;  %v1494_v31 = vrot.slane %v1490_v21, 5  ;;  %v1507_v29 = vsel %vm993_vm11, %v1506_v27, %v1505_v26  ;;  %v1689_v26 = vld [vmem:[#allocation2 + $0x6b] sm:$0x1] }
 0x1de   : > { %v1368_v47 = vsel %vm995_vm12, %v1366_v36, %v1367_v38  ;;  %v1519_v36 = vsel %vm993_vm11, %v1518_v25, %v1517_v24  ;;  %v1508_v42 = vsel %vm995_vm12, %v1506_v27, %v1507_v29  ;;  %v1590_v24 = vsel %vm995_vm12, %v1588_v10, %v1589_v20  ;;  %v1690_v27 = vld [vmem:[#allocation2 + $0x7b] sm:$0x1] }
 0x1df   : > { %v1495_v37 = vsel %vm993_vm11, %v1494_v31, %v1493_v30  ;;  %v1595_v30 = vld [vmem:[#allocation2 + $0x63] sm:$0x1] }
 0x1e0   : > { %v1496_v46 = vsel %vm995_vm12, %v1494_v31, %v1495_v37  ;;  %v1596_v31 = vld [vmem:[#allocation2 + $0x73] sm:$0x1]  ;;  %v1599_v29 = vrot.slane %v1595_v30, 6 }
 0x1e1   : > { %1275 = vrot.lane.b32.xlu2 %v1274_v51, %s2056_s16  ;;  %1263 = vrot.lane.b32.xlu1 %v1262_v52, %s2060_s23  ;;  %v1424_v51 = vrot.slane %v1420_v44, 5  ;;  %v1411_v52 = vrot.slane %v1407_v45, 6  ;;  %v1525_v44 = vld [vmem:[#allocation2 + $0x4d] sm:$0x1]  ;;  %v1526_v45 = vld [vmem:[#allocation2 + $0x5d] sm:$0x1] }
 0x1e2   : > { %1251 = vrot.lane.b32.xlu0 %v1250_v55, %s2061_s24  ;;  %v1478_v55 = vld [vmem:[#allocation2 + $0x59] sm:$0x1]  ;;  %v1529_v49 = vrot.slane %v1525_v44, 6  ;;  %v1600_v37 = vrot.slane %v1596_v31, 5  ;;  %v1714_v44 = vld [vmem:[#allocation2 + $0x7d] sm:$0x1] }
 0x1e3   : > { %v1425_v57 = vsel %vm993_vm11, %v1424_v51, %v1423_v50  ;;  %v1413_v60 = vsel %vm993_vm11, %v1412_v53, %v1411_v52  ;;  %v1482_v2 = vrot.slane %v1478_v55, 5  ;;  %v1530_v50 = vrot.slane %v1526_v45, 5  ;;  %v1677_v52 = vld [vmem:[#allocation2 + $0x6a] sm:$0x1] }
 0x1e4   : > { %v1426_v6 = vsel %vm995_vm12, %v1424_v51, %v1425_v57  ;;  %v1414_v8 = vsel %vm995_vm12, %v1412_v53, %v1413_v60  ;;  %v1678_v53 = vld [vmem:[#allocation2 + $0x7a] sm:$0x1]  ;;  %v1561_v57 = vld [vmem:[#allocation2 + $0x60] sm:$0x1]  ;;  %v1601_v45 = vsel %vm993_vm11, %v1600_v37, %v1599_v29  ;;  %v1718_v54 = vrot.slane %v1714_v44, 5 }
 0x1e5   : > { %v1483_v14 = vsel %vm993_vm11, %v1482_v2, %v1481_v1  ;;  %v1681_v1 = vrot.slane %v1677_v52, 6  ;;  %v1717_v52 = vrot.slane %v1713_v43, 6 }
 0x1e6   : > { %v1484_v22 = vsel %vm995_vm12, %v1482_v2, %v1483_v14  ;;  %v1665_v2 = vld [vmem:[#allocation2 + $0x69] sm:$0x1]  ;;  %v1670_v14 = vrot.slane %v1666_v3, 5  ;;  %v1725_v3 = vld [vmem:[#allocation2 + $0x6e] sm:$0x1] }
 0x1e9   : > { %1321 = vrot.lane.b32.xlu2 %v1320_v63, %s2057_s17  ;;  %1309 = vrot.lane.b32.xlu1 %v1308_v0, %s2058_s18  ;;  %v1471_v63 = vrot.slane %v1467_v58, 6  ;;  %v1472_v0 = vrot.slane %v1468_v59, 5  ;;  %v1562_v58 = vld [vmem:[#allocation2 + $0x70] sm:$0x1]  ;;  %v1565_v59 = vrot.slane %v1561_v57, 6 }
 0x1ea   : > { %1297 = vrot.lane.b32.xlu0 %v1296_v4, %s2059_s22  ;;  %v1444_v4 = vld [vmem:[#allocation2 + $0x56] sm:$0x1]  ;;  %v1566_v60 = vrot.slane %v1562_v58, 5 }
 0x1eb   : > { %v1473_v7 = vsel %vm993_vm11, %v1472_v0, %v1471_v63  ;;  %v1448_v13 = vrot.slane %v1444_v4, 5  ;;  %v1531_v4 = vsel %vm993_vm11, %v1530_v50, %v1529_v49  ;;  %v1702_v49 = vld [vmem:[#allocation2 + $0x7c] sm:$0x1] }
 0x1ec   : > { %v1474_v11 = vsel %vm995_vm12, %v1472_v0, %v1473_v7  ;;  %v1660_v7 = vrot.slane %v1656_v62, 5  ;;  %v1532_v16 = vsel %vm995_vm12, %v1530_v50, %v1531_v4  ;;  %v1706_v58 = vrot.slane %v1702_v49, 5  ;;  %v1726_v4 = vld [vmem:[#allocation2 + $0x7e] sm:$0x1] }
 0x1ed   : > { %1476 = vst.msk [vmem:[%s2212_s27 + $0x14] sm:$0xc] %vm998_vm13, %v1474_v11  ;;  %v1449_v23 = vsel %vm993_vm11, %v1448_v13, %v1447_v12  ;;  %v1719_v62 = vsel %vm993_vm11, %v1718_v54, %v1717_v52 }
 0x1f1   : > { %1357 = vrot.lane.b32.xlu2 %v1356_v32, %s2060_s23  ;;  %1345 = vrot.lane.b32.xlu1 %v1344_v33, %s2061_s24  ;;  %v1450_v32 = vsel %vm995_vm12, %v1448_v13, %v1449_v23  ;;  %v1571_v33 = vld [vmem:[#allocation2 + $0x61] sm:$0x1]  ;;  %v1669_v13 = vrot.slane %v1665_v2, 6 }
 0x1f2   : > { %1333 = vrot.lane.b32.xlu0 %v1332_v34, %s2062_s25  ;;  %v1572_v34 = vld [vmem:[#allocation2 + $0x71] sm:$0x1]  ;;  %v1575_v38 = vrot.slane %v1571_v33, 6 }
 0x1f3   : > { %v1576_v39 = vrot.slane %v1572_v34, 5  ;;  %v1671_v21 = vsel %vm993_vm11, %v1670_v14, %v1669_v13  ;;  %v1693_v34 = vrot.slane %v1689_v26, 6  ;;  %v1730_v13 = vrot.slane %v1726_v4, 5 }
 0x1f5   : > { %v1577_v51 = vsel %vm993_vm11, %v1576_v39, %v1575_v38 }
 0x1f6   : > { %v1578_v63 = vsel %vm995_vm12, %v1576_v39, %v1577_v51 }
 0x1f9   : > { %1403 = vrot.lane.b32.xlu2 %v1402_v40, %s2058_s18  ;;  %1391 = vrot.lane.b32.xlu1 %v1390_v41, %s2059_s22  ;;  %v1537_v40 = vld [vmem:[#allocation2 + $0x4e] sm:$0x1]  ;;  %v1520_v41 = vsel %vm995_vm12, %v1518_v25, %v1519_v36  ;;  %v1608_v25 = vld [vmem:[#allocation2 + $0x74] sm:$0x1]  ;;  %v1694_v36 = vrot.slane %v1690_v27, 5 }
 0x1fa   : > { %1369 = vrot.lane.b32.xlu0 %v1368_v47, %s2056_s16  ;;  %v1541_v47 = vrot.slane %v1537_v40, 6  ;;  %v1612_v33 = vrot.slane %v1608_v25, 5  ;;  %v1644_v25 = vld [vmem:[#allocation2 + $0x77] sm:$0x1] }
 0x1fc   : > { %v1543_v0 = vsel %vm993_vm11, %v1542_v48, %v1541_v47  ;;  %v1620_v47 = vld [vmem:[#allocation2 + $0x75] sm:$0x1] }
 0x1fd   : > { %v1544_v12 = vsel %vm995_vm12, %v1542_v48, %v1543_v0  ;;  %v1701_v48 = vld [vmem:[#allocation2 + $0x6c] sm:$0x1]  ;;  %v1624_v57 = vrot.slane %v1620_v47, 5  ;;  %v1549_v0 = vld [vmem:[#allocation2 + $0x4f] sm:$0x1] }
 0x1fe   : > { %v1553_v9 = vrot.slane %v1549_v0, 6 }
 0x201   : > { %1439 = vrot.lane.b32.xlu2 %v1438_v5, %s2061_s24  ;;  %1427 = vrot.lane.b32.xlu1 %v1426_v6, %s2062_s25  ;;  %v1567_v5 = vsel %vm993_vm11, %v1566_v60, %v1565_v59  ;;  %v1659_v6 = vrot.slane %v1655_v61, 6 }
 0x202   : > { %1415 = vrot.lane.b32.xlu0 %v1414_v8, %s2057_s17  ;;  %v1682_v8 = vrot.slane %v1678_v53, 5  ;;  %v1568_v11 = vsel %vm995_vm12, %v1566_v60, %v1567_v5  ;;  %v1602_v53 = vsel %vm995_vm12, %v1600_v37, %v1601_v45  ;;  %v1631_v5 = vld [vmem:[#allocation2 + $0x66] sm:$0x1] }
 0x203   : > { %1570 = vst.msk [vmem:[%s2212_s27 + $0x18] sm:$0xc] %vm998_vm13, %v1568_v11  ;;  %v1661_v15 = vsel %vm993_vm11, %v1660_v7, %v1659_v6  ;;  %v1632_v6 = vld [vmem:[#allocation2 + $0x76] sm:$0x1] }
 0x204   : > { %v1662_v17 = vsel %vm995_vm12, %v1660_v7, %v1661_v15  ;;  %v1683_v19 = vsel %vm993_vm11, %v1682_v8, %v1681_v1  ;;  %v1550_v1 = vld [vmem:[#allocation2 + $0x5f] sm:$0x1]  ;;  %v1720_v7 = vsel %vm995_vm12, %v1718_v54, %v1719_v62 }
 0x205   : > { %1664 = vst.msk [vmem:[%s2212_s27 + $0x1c] sm:$0xc] %vm998_vm13, %v1662_v17  ;;  %v1684_v23 = vsel %vm995_vm12, %v1682_v8, %v1683_v19  ;;  %v1554_v11 = vrot.slane %v1550_v1, 5 }
 0x207   : > { %v1555_v19 = vsel %vm993_vm11, %v1554_v11, %v1553_v9 }
 0x208   : > { %v1556_v26 = vsel %vm995_vm12, %v1554_v11, %v1555_v19 }
 0x209   : > { %1485 = vrot.lane.b32.xlu2 %v1484_v22, %s2059_s22  ;;  %1463 = vrot.lane.b32.xlu1 %v1462_v28, %s2056_s16  ;;  %v1607_v22 = vld [vmem:[#allocation2 + $0x64] sm:$0x1]  ;;  %v1672_v28 = vsel %vm995_vm12, %v1670_v14, %v1671_v21  ;;  %v1636_v14 = vrot.slane %v1632_v6, 5 }
 0x20a   : > { %1451 = vrot.lane.b32.xlu0 %v1450_v32, %s2060_s23  ;;  %v1611_v32 = vrot.slane %v1607_v22, 6  ;;  %v1737_v22 = vld [vmem:[#allocation2 + $0x6f] sm:$0x1] }
 0x20b   : > { %v2672_v35 = vpop.permute.xlu2 %1034 }
 0x211   : > { %1521 = vrot.lane.b32.xlu2 %v1520_v41, %s2062_s25  ;;  %1509 = vrot.lane.b32.xlu1 %v1508_v42, %s2057_s17  ;;  %v1613_v41 = vsel %vm993_vm11, %v1612_v33, %v1611_v32  ;;  %v1695_v42 = vsel %vm993_vm11, %v1694_v36, %v1693_v34  ;;  %v1648_v32 = vrot.slane %v1644_v25, 5 }
 0x212   : > { %1497 = vrot.lane.b32.xlu0 %v1496_v46, %s2058_s18  ;;  %v1619_v46 = vld [vmem:[#allocation2 + $0x65] sm:$0x1]  ;;  %v1614_v50 = vsel %vm995_vm12, %v1612_v33, %v1613_v41  ;;  %v1696_v51 = vsel %vm995_vm12, %v1694_v36, %v1695_v42 }
 0x213   : > { %v2684_v55 = vpop.permute.xlu2 %1073  ;;  %v1623_v56 = vrot.slane %v1619_v46, 6 }
 0x219   : > { %1579 = vrot.lane.b32.xlu2 %v1578_v63, %s2059_s22  ;;  %1545 = vrot.lane.b32.xlu1 %v1544_v12, %s2060_s23  ;;  %v1625_v63 = vsel %vm993_vm11, %v1624_v57, %v1623_v56  ;;  %v1729_v12 = vrot.slane %v1725_v3, 6 }
 0x21a   : > { %1533 = vrot.lane.b32.xlu0 %v1532_v16, %s2061_s24  ;;  %v1626_v8 = vsel %vm995_vm12, %v1624_v57, %v1625_v63 }
 0x21b   : > { %v2702_v18 = vpop.permute.xlu2 %1121  ;;  %v1731_v20 = vsel %vm993_vm11, %v1730_v13, %v1729_v12 }
 0x21c   : > { %v1732_v27 = vsel %vm995_vm12, %v1730_v13, %v1731_v20 }
 0x221   : > { %1685 = vrot.lane.b32.xlu2 %v1684_v23, %s2058_s18  ;;  %1591 = vrot.lane.b32.xlu1 %v1590_v24, %s2058_s18  ;;  %v1738_v23 = vld [vmem:[#allocation2 + $0x7f] sm:$0x1]  ;;  %v1643_v24 = vld [vmem:[#allocation2 + $0x67] sm:$0x1] }
 0x222   : > { %1673 = vrot.lane.b32.xlu0 %v1672_v28, %s2059_s22  ;;  %v1741_v28 = vrot.slane %v1737_v22, 6  ;;  %v1742_v30 = vrot.slane %v1738_v23, 5  ;;  %v1647_v31 = vrot.slane %v1643_v24, 6 }
 0x223   : > { %v2713_v38 = vpop.permute.xlu2 %1157  ;;  %v1022_v39 = vpop.permute.xlu1 %1021 }
 0x224   : > { %v1009_v40 = vpop.permute.xlu0 %1008  ;;  %v1743_v29 = vsel %vm993_vm11, %v1742_v30, %v1741_v28  ;;  %v1649_v37 = vsel %vm993_vm11, %v1648_v32, %v1647_v31 }
 0x225   : > { %1012 = vst.msk [vmem:[%s2212_s27] sm:$0xc] %vm1011_vm14, %v1009_v40  ;;  %v1650_v40 = vsel %vm995_vm12, %v1648_v32, %v1649_v37 }
 0x226   : > { %1025 = vst.msk [vmem:[%s2212_s27] sm:$0xc] %vm1024_vm15, %v1022_v39  ;;  %v1744_v39 = vsel %vm995_vm12, %v1742_v30, %v1743_v29 }
 0x227   : > { %1038 = vst.msk [vmem:[%s2212_s27] sm:$0xc] %vm1037_vm0, %v2672_v35  ;;  %v1705_v35 = vrot.slane %v1701_v48, 6 }
 0x229   : > { %1615 = vrot.lane.b32.xlu2 %v1614_v50, %s2062_s25  ;;  %1697 = vrot.lane.b32.xlu1 %v1696_v51, %s2057_s17  ;;  %v1707_v2 = vsel %vm993_vm11, %v1706_v58, %v1705_v35 }
 0x22a   : > { %1603 = vrot.lane.b32.xlu0 %v1602_v53, %s2057_s17  ;;  %v1708_v10 = vsel %vm995_vm12, %v1706_v58, %v1707_v2  ;;  %s1990_s17 = scalar_lea.hbm %s2904_s1, 64 }
 0x22b   : > { %v1204_v59 = vpop.permute.xlu2 %1203  ;;  %v1061_v60 = vpop.permute.xlu1 %1060  ;;  %p1992_p8 = scmp.lt.s32.totalorder %s1990_s17, %s1986_s13 }
 0x22c   : > { %1206 = vst.msk [vmem:[%s2212_s27 + $0x8] sm:$0xc] %vm1011_vm14, %v1204_v59  ;;  %v1048_v61 = vpop.permute.xlu0 %1047 }
 0x22d   : > { %1051 = vst.msk [vmem:[%s2212_s27] sm:$0xc] %vm1050_vm1, %v1048_v61  ;;  %p1993_p10 = por %p1992_p8, %p1991_p7 }
 0x22e   : > { %1064 = vst.msk [vmem:[%s2212_s27] sm:$0xc] %vm1063_vm2, %v1061_v60 }
 0x22f   : > { %1077 = vst.msk [vmem:[%s2212_s27] sm:$0xc] %vm1076_vm3, %v2684_v55  ;;  %v1635_v55 = vrot.slane %v1631_v5, 6  ;;  %p1994_p13 = pnand %p1993_p10, %p1989_p6 }
 0x231   : > { %1721 = vrot.lane.b32.xlu2 %v1720_v7, %s2061_s24  ;;  %1627 = vrot.lane.b32.xlu1 %v1626_v8, %s2061_s24  ;;  %v1637_v21 = vsel %vm993_vm11, %v1636_v14, %v1635_v55 }
 0x232   : > { %1709 = vrot.lane.b32.xlu0 %v1708_v10, %s2062_s25 }
 0x233   : > { %v1240_v15 = vpop.permute.xlu2 %1239  ;;  %v1110_v16 = vpop.permute.xlu1 %1109 }
 0x234   : > { %1112 = vst.msk [vmem:[%s2212_s27 + $0x4] sm:$0xc] %vm1011_vm14, %v1110_v16  ;;  %v1087_v17 = vpop.permute.xlu0 %1086 }
 0x235   : > { %1124 = vst.msk [vmem:[%s2212_s27 + $0x4] sm:$0xc] %vm1024_vm15, %v2702_v18  ;;  %v1638_v18 = vsel %vm995_vm12, %v1636_v14, %v1637_v21 }
 0x236   : > { %1090 = vst.msk [vmem:[%s2212_s27] sm:$0xc] %vm1089_vm4, %v1087_v17 }
 0x239   : > { %1557 = vrot.lane.b32.xlu2 %v1556_v26, %s2056_s16  ;;  %1733 = vrot.lane.b32.xlu1 %v1732_v27, %s2060_s23 }
 0x23a   : > { %1639 = vrot.lane.b32.xlu0 %v1638_v18, %s2060_s23 }
 0x23b   : > { %v1276_v33 = vpop.permute.xlu2 %1275  ;;  %v1146_v34 = vpop.permute.xlu1 %1145 }
 0x23c   : > { %v1134_v36 = vpop.permute.xlu0 %1133 }
 0x23d   : > { %1136 = vst.msk [vmem:[%s2212_s27 + $0x4] sm:$0xc] %vm1037_vm0, %v1134_v36 }
 0x23e   : > { %1148 = vst.msk [vmem:[%s2212_s27 + $0x4] sm:$0xc] %vm1050_vm1, %v1146_v34 }
 0x23f   : > { %1160 = vst.msk [vmem:[%s2212_s27 + $0x4] sm:$0xc] %vm1063_vm2, %v2713_v38 }
 0x241   : > { %1745 = vrot.lane.b32.xlu1 %v1744_v39, %s2056_s16 }
 0x242   : > { %1651 = vrot.lane.b32.xlu0 %v1650_v40, %s2056_s16 }
 0x243   : > { %v1322_v41 = vpop.permute.xlu2 %1321  ;;  %v1182_v42 = vpop.permute.xlu1 %1181 }
 0x244   : > { %v1170_v43 = vpop.permute.xlu0 %1169 }
 0x245   : > { %1172 = vst.msk [vmem:[%s2212_s27 + $0x4] sm:$0xc] %vm1076_vm3, %v1170_v43 }
 0x246   : > { %1184 = vst.msk [vmem:[%s2212_s27 + $0x4] sm:$0xc] %vm1089_vm4, %v1182_v42 }
 0x24b   : > { %v1358_v38 = vpop.permute.xlu2 %1357  ;;  %v1228_v44 = vpop.permute.xlu1 %1227 }
 0x24c   : > { %v1216_v45 = vpop.permute.xlu0 %1215 }
 0x24d   : > { %1218 = vst.msk [vmem:[%s2212_s27 + $0x8] sm:$0xc] %vm1024_vm15, %v1216_v45 }
 0x24e   : > { %1230 = vst.msk [vmem:[%s2212_s27 + $0x8] sm:$0xc] %vm1037_vm0, %v1228_v44 }
 0x24f   : > { %1242 = vst.msk [vmem:[%s2212_s27 + $0x8] sm:$0xc] %vm1050_vm1, %v1240_v15 }
 0x253   : > { %v1404_v46 = vpop.permute.xlu2 %1403  ;;  %v1264_v47 = vpop.permute.xlu1 %1263 }
 0x254   : > { %v1252_v48 = vpop.permute.xlu0 %1251 }
 0x255   : > { %1254 = vst.msk [vmem:[%s2212_s27 + $0x8] sm:$0xc] %vm1063_vm2, %v1252_v48 }
 0x256   : > { %1266 = vst.msk [vmem:[%s2212_s27 + $0x8] sm:$0xc] %vm1076_vm3, %v1264_v47 }
 0x257   : > { %1278 = vst.msk [vmem:[%s2212_s27 + $0x8] sm:$0xc] %vm1089_vm4, %v1276_v33 }
 0x25b   : > { %v1440_v49 = vpop.permute.xlu2 %1439  ;;  %v1310_v50 = vpop.permute.xlu1 %1309 }
 0x25c   : > { %v1298_v51 = vpop.permute.xlu0 %1297 }
 0x25d   : > { %1300 = vst.msk [vmem:[%s2212_s27 + $0xc] sm:$0xc] %vm1011_vm14, %v1298_v51 }
 0x25e   : > { %1312 = vst.msk [vmem:[%s2212_s27 + $0xc] sm:$0xc] %vm1024_vm15, %v1310_v50 }
 0x25f   : > { %1324 = vst.msk [vmem:[%s2212_s27 + $0xc] sm:$0xc] %vm1037_vm0, %v1322_v41 }
 0x263   : > { %v1486_v52 = vpop.permute.xlu2 %1485  ;;  %v1346_v53 = vpop.permute.xlu1 %1345 }
 0x264   : > { %1488 = vst.msk [vmem:[%s2212_s27 + $0x14] sm:$0xc] %vm1011_vm14, %v1486_v52  ;;  %v1334_v54 = vpop.permute.xlu0 %1333 }
 0x265   : > { %1336 = vst.msk [vmem:[%s2212_s27 + $0xc] sm:$0xc] %vm1050_vm1, %v1334_v54 }
 0x266   : > { %1348 = vst.msk [vmem:[%s2212_s27 + $0xc] sm:$0xc] %vm1063_vm2, %v1346_v53 }
 0x267   : > { %1360 = vst.msk [vmem:[%s2212_s27 + $0xc] sm:$0xc] %vm1076_vm3, %v1358_v38 }
 0x26b   : > { %v1522_v56 = vpop.permute.xlu2 %1521  ;;  %v1392_v57 = vpop.permute.xlu1 %1391 }
 0x26c   : > { %1394 = vst.msk [vmem:[%s2212_s27 + $0x10] sm:$0xc] %vm1011_vm14, %v1392_v57  ;;  %v1370_v35 = vpop.permute.xlu0 %1369 }
 0x26d   : > { %1406 = vst.msk [vmem:[%s2212_s27 + $0x10] sm:$0xc] %vm1024_vm15, %v1404_v46 }
 0x26e   : > { %1372 = vst.msk [vmem:[%s2212_s27 + $0xc] sm:$0xc] %vm1089_vm4, %v1370_v35 }
 0x273   : > { %v1580_v58 = vpop.permute.xlu2 %1579  ;;  %v1428_v59 = vpop.permute.xlu1 %1427 }
 0x274   : > { %1582 = vst.msk [vmem:[%s2212_s27 + $0x18] sm:$0xc] %vm1011_vm14, %v1580_v58  ;;  %v1416_v60 = vpop.permute.xlu0 %1415 }
 0x275   : > { %1418 = vst.msk [vmem:[%s2212_s27 + $0x10] sm:$0xc] %vm1037_vm0, %v1416_v60 }
 0x276   : > { %1430 = vst.msk [vmem:[%s2212_s27 + $0x10] sm:$0xc] %vm1050_vm1, %v1428_v59 }
 0x277   : > { %1442 = vst.msk [vmem:[%s2212_s27 + $0x10] sm:$0xc] %vm1063_vm2, %v1440_v49 }
 0x27b   : > { %v1686_v61 = vpop.permute.xlu2 %1685  ;;  %v1464_v62 = vpop.permute.xlu1 %1463 }
 0x27c   : > { %v1452_v63 = vpop.permute.xlu0 %1451 }
 0x27d   : > { %1454 = vst.msk [vmem:[%s2212_s27 + $0x10] sm:$0xc] %vm1076_vm3, %v1452_v63 }
 0x27e   : > { %1466 = vst.msk [vmem:[%s2212_s27 + $0x10] sm:$0xc] %vm1089_vm4, %v1464_v62 }
 0x283   : > { %v1616_v0 = vpop.permute.xlu2 %1615  ;;  %v1510_v1 = vpop.permute.xlu1 %1509 }
 0x284   : > { %v1498_v2 = vpop.permute.xlu0 %1497 }
 0x285   : > { %1500 = vst.msk [vmem:[%s2212_s27 + $0x14] sm:$0xc] %vm1024_vm15, %v1498_v2 }
 0x286   : > { %1512 = vst.msk [vmem:[%s2212_s27 + $0x14] sm:$0xc] %vm1037_vm0, %v1510_v1 }
 0x287   : > { %1524 = vst.msk [vmem:[%s2212_s27 + $0x14] sm:$0xc] %vm1050_vm1, %v1522_v56 }
 0x28b   : > { %v1722_v3 = vpop.permute.xlu2 %1721  ;;  %v1546_v4 = vpop.permute.xlu1 %1545 }
 0x28c   : > { %v1534_v5 = vpop.permute.xlu0 %1533 }
 0x28d   : > { %1536 = vst.msk [vmem:[%s2212_s27 + $0x14] sm:$0xc] %vm1063_vm2, %v1534_v5 }
 0x28e   : > { %1548 = vst.msk [vmem:[%s2212_s27 + $0x14] sm:$0xc] %vm1076_vm3, %v1546_v4 }
 0x293   : > { %v1558_v6 = vpop.permute.xlu2 %1557  ;;  %v1592_v7 = vpop.permute.xlu1 %1591 }
 0x294   : > { %1560 = vst.msk [vmem:[%s2212_s27 + $0x14] sm:$0xc] %vm1089_vm4, %v1558_v6  ;;  %v1674_v8 = vpop.permute.xlu0 %1673 }
 0x295   : > { %1594 = vst.msk [vmem:[%s2212_s27 + $0x18] sm:$0xc] %vm1024_vm15, %v1592_v7 }
 0x296   : > { %1676 = vst.msk [vmem:[%s2212_s27 + $0x1c] sm:$0xc] %vm1011_vm14, %v1674_v8 }
 0x297   : > { %1688 = vst.msk [vmem:[%s2212_s27 + $0x1c] sm:$0xc] %vm1024_vm15, %v1686_v61 }
 0x29b   : > { %v1698_v9 = vpop.permute.xlu1 %1697 }
 0x29c   : > { %1700 = vst.msk [vmem:[%s2212_s27 + $0x1c] sm:$0xc] %vm1037_vm0, %v1698_v9  ;;  %v1604_v10 = vpop.permute.xlu0 %1603 }
 0x29d   : > { %1606 = vst.msk [vmem:[%s2212_s27 + $0x18] sm:$0xc] %vm1037_vm0, %v1604_v10 }
 0x29e   : > { %1618 = vst.msk [vmem:[%s2212_s27 + $0x18] sm:$0xc] %vm1050_vm1, %v1616_v0 }
 0x2a3   : > { %v1628_v11 = vpop.permute.xlu1 %1627 }
 0x2a4   : > { %1630 = vst.msk [vmem:[%s2212_s27 + $0x18] sm:$0xc] %vm1063_vm2, %v1628_v11  ;;  %v1710_v12 = vpop.permute.xlu0 %1709 }
 0x2a5   : > { %1712 = vst.msk [vmem:[%s2212_s27 + $0x1c] sm:$0xc] %vm1050_vm1, %v1710_v12 }
 0x2a6   : > { %1724 = vst.msk [vmem:[%s2212_s27 + $0x1c] sm:$0xc] %vm1063_vm2, %v1722_v3 }
 0x2ab   : > { %v1734_v13 = vpop.permute.xlu1 %1733 }
 0x2ac   : > { %1736 = vst.msk [vmem:[%s2212_s27 + $0x1c] sm:$0xc] %vm1076_vm3, %v1734_v13  ;;  %v1640_v55 = vpop.permute.xlu0 %1639 }
 0x2ad   : > { %1642 = vst.msk [vmem:[%s2212_s27 + $0x18] sm:$0xc] %vm1076_vm3, %v1640_v55 }
 0x2b3   : > { %v1746_v14 = vpop.permute.xlu1 %1745 }
 0x2b4   : > { %1748 = vst.msk [vmem:[%s2212_s27 + $0x1c] sm:$0xc] %vm1089_vm4, %v1746_v14  ;;  %v1652_v15 = vpop.permute.xlu0 %1651 }
 0x2b5   : > { %1654 = vst.msk [vmem:[%s2212_s27 + $0x18] sm:$0xc] %vm1089_vm4, %v1652_v15 }
 0x2b6   : > { %1997 = shalt.err (!%p1994_p13)
}
 0x2b7   : > { %1871 = dma.vmem_to_hbm [thread:$0]  (%p2124_p9), %s1766_s3, 512, %s1768_s4, %s1750_s9  }
 0x2b8 PF: > { %s1779_s5 = sand.u32 1, %s2032_s6   ;;  %p1878_p0 = pnand %p1855_p12, %p2131_p11 }
 0x2b9   : > { %s1780_s23 = scalar_lea.sflag [#allocation5], %s1779_s5 }
 0x2ba   : > { %p1879_p1 = pneg %p1878_p0 }
 0x2bc   : > { %2027 = dma.done.wait (%p1879_p1), %s1780_s23, 512  }
 0x2bd   : > { %2029 = vsyncadd (%p1879_p1), %s1780_s23, 4294966784  ;;  %s17_s11 = sadd.s32 1, %s2052_s11   ;;  %s2909_s6 = smov %s2036_s7 }
 0x2be   : > { %p14_p2 = scmp.ge.s32.totalorder %s17_s11, 4   ;;  %s2910_s7 = smov %s2040_s8 }
 0x2bf   : > { %s2911_s8 = smov %s2129_s20  ;;  %s2912_s9 = smov %s2048_s10 }
 0x2c0   : > { %s2913_s10 = smov %s2915_s14  ;;  %16 = sbr.rel (!%p14_p2) target bundleno = 6 (0x6), region = 73 }
 0x2c5   :  { %1786 = vsyncpa [#allocation4], 1 }
 0x2c6   :  { %1788 = vsyncpa [#allocation4 + $0x1], 1 }
 0x2c7   :  { %1789 = vsyncpa [#allocation5], 1 }
 0x2c8   :  { %1791 = vsyncpa [#allocation5 + $0x1], 1 }

</bundles_post_ra>
